<compile_context>
chip_gen: v5e
topology: v5e:2x2
jax: 0.10.0
libtpu: 0.0.40
codegen_flags: <defaults>
</compile_context>

<pallas_src>
import functools
import math

import jax
import jax.numpy as jnp
from jax import lax
from jax.experimental import pallas as pl
from jax.experimental.pallas import tpu as pltpu


# ---------------------------------------------------------------------------
# Pallas kernels
# ---------------------------------------------------------------------------

def _ign_2to2_kernel(x_ref, m2_ref, cfull_ref, crow_ref, ccol_ref, cdiag_ref,
                     dbias_ref, abias_ref, o_ref, *, apply_relu):
    """One permutation-equivariant 2->2 layer for a single graph.

    x_ref     : (1, D, n, n)  input tensor
    m2_ref    : (1, n, n)     mask outer-product (keeps padding at zero)
    cfull_ref : (2, S, D)     coeffs for ops 10 (identity) and 11 (transpose)
    crow_ref  : (S, 5*D)      coeffs for ops 6, 7, 12, 14, 15 (row broadcast)
    ccol_ref  : (S, 3*D)      coeffs for ops 8, 9, 13          (col broadcast)
    cdiag_ref : (S, 5*D)      coeffs for ops 1..5              (diagonal)
    dbias_ref : (S, 1), abias_ref : (S, 1)
    o_ref     : (1, S, n, n)
    """
    _, D, n, _ = x_ref.shape
    S = o_ref.shape[1]
    inv_n = 1.0 / float(n)
    inv_n2 = inv_n * inv_n

    x = x_ref[0]                                          # [D, n, n]
    m2 = m2_ref[0]                                        # [n, n]

    ii = lax.broadcasted_iota(jnp.int32, (n, n), 0)
    jj = lax.broadcasted_iota(jnp.int32, (n, n), 1)
    eye = (ii == jj).astype(jnp.float32)                  # [n, n]

    # Basic contractions.
    diag = jnp.sum(x * eye[None], axis=2)                 # [D, n]
    sr = jnp.sum(x, axis=2)                               # [D, n]  row sums
    sc = jnp.sum(x, axis=1)                               # [D, n]  col sums
    sd_b = jnp.broadcast_to(jnp.sum(diag, axis=1, keepdims=True), (D, n))
    sa_b = jnp.broadcast_to(jnp.sum(sr, axis=1, keepdims=True), (D, n))

    # Vector families -> MXU matmuls over the channel dimension.
    vrow = jnp.concatenate(
        [sc * inv_n, sr * inv_n, diag, sd_b * inv_n, sa_b * inv_n2], axis=0)
    rrow = jnp.dot(crow_ref[...], vrow, preferred_element_type=jnp.float32)   # [S, n]

    vcol = jnp.concatenate([sc * inv_n, sr * inv_n, diag], axis=0)
    rcol = jnp.dot(ccol_ref[...], vcol, preferred_element_type=jnp.float32)   # [S, n]

    vdia = jnp.concatenate(
        [diag, sd_b * inv_n, sr * inv_n, sc * inv_n, sa_b * inv_n2], axis=0)
    rdia = jnp.dot(cdiag_ref[...], vdia, preferred_element_type=jnp.float32)  # [S, n]

    # Full-matrix family (ops 10 identity, 11 transpose): per-channel broadcast
    # accumulation — avoids lane-dimension reshapes entirely.
    cfull = cfull_ref[...]                                # [2, S, D]
    y = jnp.zeros((S, n, n), jnp.float32)
    for d in range(D):
        xd = x[d]                                         # [n, n]
        c10d = cfull[0, :, d:d + 1]                       # [S, 1]
        c11d = cfull[1, :, d:d + 1]                       # [S, 1]
        y = y + c10d[:, :, None] * xd[None]
        y = y + c11d[:, :, None] * xd.T[None]

    y = (y
         + rrow[:, :, None]                               # broadcast over columns
         + rcol[:, None, :]                               # broadcast over rows
         + (rdia + dbias_ref[...])[:, :, None] * eye[None]
         + abias_ref[...][:, :, None])

    y = y * m2[None]                                      # masked IGN: zero padding
    if apply_relu:
        y = jnp.maximum(y, 0.0)
    o_ref[0] = y


def _ign_2to1_kernel(x_ref, m1_ref, c_ref, bias_ref, o_ref):
    """Final permutation-equivariant 2->1 layer for a single graph.

    x_ref  : (1, D, n, n); m1_ref : (1, 1, n)
    c_ref  : (S, 5*D) coeffs for ops 1..5; bias_ref : (S, 1)
    o_ref  : (1, S, n)
    """
    _, D, n, _ = x_ref.shape
    inv_n = 1.0 / float(n)
    inv_n2 = inv_n * inv_n

    x = x_ref[0]                                          # [D, n, n]
    ii = lax.broadcasted_iota(jnp.int32, (n, n), 0)
    jj = lax.broadcasted_iota(jnp.int32, (n, n), 1)
    eye = (ii == jj).astype(jnp.float32)

    diag = jnp.sum(x * eye[None], axis=2)                 # [D, n]
    sr = jnp.sum(x, axis=2)
    sc = jnp.sum(x, axis=1)
    sd_b = jnp.broadcast_to(jnp.sum(diag, axis=1, keepdims=True), (D, n))
    sa_b = jnp.broadcast_to(jnp.sum(sr, axis=1, keepdims=True), (D, n))

    v = jnp.concatenate(
        [diag, sd_b * inv_n, sr * inv_n, sc * inv_n, sa_b * inv_n2], axis=0)  # [5D, n]
    out = jnp.dot(c_ref[...], v, preferred_element_type=jnp.float32) + bias_ref[...]
    out = out * m1_ref[0]                                 # [S, n] * [1, n]
    o_ref[0] = out


# ---------------------------------------------------------------------------
# Layer wrappers (pallas_call plumbing)
# ---------------------------------------------------------------------------

def _full_spec(a):
    nd = a.ndim
    return pl.BlockSpec(a.shape, lambda b: (0,) * nd)


def ign_2to2_layer(x, mask2d, p, apply_relu=True):
    B, D, n, _ = x.shape
    coeffs = p["coeffs"]                                  # [D, S, 15]
    S = int(coeffs.shape[1])

    def csel(idxs):                                       # [S, len(idxs)*D], index k*D + d
        return jnp.concatenate([coeffs[:, :, i].T for i in idxs], axis=1)

    cfull = jnp.stack([coeffs[:, :, 9].T, coeffs[:, :, 10].T], axis=0)   # ops 10, 11
    crow = csel([5, 6, 11, 13, 14])                        # ops 6, 7, 12, 14, 15
    ccol = csel([7, 8, 12])                                # ops 8, 9, 13
    cdia = csel([0, 1, 2, 3, 4])                           # ops 1..5
    dbias = p["diag_bias"].reshape(S, 1)
    abias = p["all_bias"].reshape(S, 1)

    kernel = functools.partial(_ign_2to2_kernel, apply_relu=apply_relu)
    flops = 2 * B * S * D * (2 * n * n + 13 * n)
    bytes_accessed = 4 * (B * D * n * n + B * S * n * n + B * n * n + 15 * D * S + 2 * S)

    return pl.pallas_call(
        kernel,
        out_shape=jax.ShapeDtypeStruct((B, S, n, n), jnp.float32),
        grid_spec=pltpu.PrefetchScalarGridSpec(
            num_scalar_prefetch=0,
            grid=(B,),
            in_specs=[
                pl.BlockSpec((1, D, n, n), lambda b: (b, 0, 0, 0)),
                pl.BlockSpec((1, n, n), lambda b: (b, 0, 0)),
                _full_spec(cfull), _full_spec(crow), _full_spec(ccol),
                _full_spec(cdia), _full_spec(dbias), _full_spec(abias),
            ],
            out_specs=pl.BlockSpec((1, S, n, n), lambda b: (b, 0, 0, 0)),
        ),
        compiler_params=pltpu.CompilerParams(dimension_semantics=("parallel",)),
        cost_estimate=pl.CostEstimate(flops=int(flops), transcendentals=0,
                                      bytes_accessed=int(bytes_accessed)),
    )(x, mask2d, cfull, crow, ccol, cdia, dbias, abias)


def ign_2to1_layer(x, mask1, p):
    B, D, n, _ = x.shape
    coeffs = p["coeffs"]                                  # [D, S, 5]
    S = int(coeffs.shape[1])
    c21 = jnp.concatenate([coeffs[:, :, i].T for i in range(5)], axis=1)  # [S, 5D]
    bias = p["bias"].reshape(S, 1)

    flops = 2 * B * S * 5 * D * n
    bytes_accessed = 4 * (B * D * n * n + B * S * n + B * n + S * (5 * D + 1))

    return pl.pallas_call(
        _ign_2to1_kernel,
        out_shape=jax.ShapeDtypeStruct((B, S, n), jnp.float32),
        grid_spec=pltpu.PrefetchScalarGridSpec(
            num_scalar_prefetch=0,
            grid=(B,),
            in_specs=[
                pl.BlockSpec((1, D, n, n), lambda b: (b, 0, 0, 0)),
                pl.BlockSpec((1, 1, n), lambda b: (b, 0, 0)),
                _full_spec(c21), _full_spec(bias),
            ],
            out_specs=pl.BlockSpec((1, S, n), lambda b: (b, 0, 0)),
        ),
        compiler_params=pltpu.CompilerParams(dimension_semantics=("parallel",)),
        cost_estimate=pl.CostEstimate(flops=int(flops), transcendentals=0,
                                      bytes_accessed=int(bytes_accessed)),
    )(x, mask1, c21, bias)


# ---------------------------------------------------------------------------
# IGNPhi forward (wrapper: padding / masking / gather are layout plumbing)
# ---------------------------------------------------------------------------

def init_ign_params(key, in_dims, hidden_dims, out_dims, n_layers):
    if n_layers < 2:
        layer_dims = [("2to1", in_dims, out_dims)]
    else:
        layer_dims = [("2to2", in_dims, hidden_dims)]
        layer_dims += [("2to2", hidden_dims, hidden_dims)] * (n_layers - 2)
        layer_dims += [("2to1", hidden_dims, out_dims)]
    params = []
    for kind, d_in, d_out in layer_dims:
        key, sub = jax.random.split(key)
        basis = 15 if kind == "2to2" else 5
        scale = math.sqrt(2.0 / (d_in + d_out))
        coeffs = scale * jax.random.normal(sub, (d_in, d_out, basis), dtype=jnp.float32)
        if kind == "2to2":
            params.append({"kind": kind, "coeffs": coeffs,
                           "diag_bias": jnp.zeros((d_out,), jnp.float32),
                           "all_bias": jnp.zeros((d_out,), jnp.float32)})
        else:
            params.append({"kind": kind, "coeffs": coeffs,
                           "bias": jnp.zeros((d_out,), jnp.float32)})
    return params


def ign_phi_forward(W_list, edge_index, params):
    """Pallas implementation of IGNPhi.forward -> [N_sum, out_dims] float32."""
    del edge_index  # unused by the reference forward (signature parity only)
    B = len(W_list)
    sizes = [int(W.shape[0]) for W in W_list]
    n_max = max(sizes)

    # Pad + stack exactly as the PyTorch reference.
    W_pad = jnp.stack(
        [jnp.pad(W, ((0, n_max - s), (0, n_max - s), (0, 0))) for W, s in zip(W_list, sizes)],
        axis=0)
    # torch.transpose(W, 1, -1)
    x = jnp.transpose(W_pad, (0, 3, 2, 1)).astype(jnp.float32)      # [B, M, n, n]

    mask = jnp.stack([jnp.arange(n_max) < s for s in sizes], axis=0).astype(jnp.float32)
    mask1 = mask[:, None, :]                                        # [B, 1, n]
    mask2d = mask[:, :, None] * mask[:, None, :]                    # [B, n, n]

    h = x
    for p in params:
        if p["kind"] == "2to2":
            h = ign_2to2_layer(h, mask2d, p, apply_relu=True)
        else:
            h = ign_2to1_layer(h, mask1, p)                         # [B, out_dims, n]

    out_dims = int(h.shape[1])
    pe = jnp.transpose(h, (0, 2, 1)).reshape(B * n_max, out_dims)
    # Static row gather: PE.reshape(-1, D)[mask.view(-1)]
    row_idx = jnp.concatenate(
        [b * n_max + jnp.arange(s, dtype=jnp.int32) for b, s in enumerate(sizes)], axis=0)
    return jnp.take(pe, row_idx, axis=0)


# ---------------------------------------------------------------------------
# Pure-JAX reference (independent 15-op / 5-op formulation) for validation
# ---------------------------------------------------------------------------

def ign_phi_forward_reference(W_list, edge_index, params):
    del edge_index
    B = len(W_list)
    sizes = [int(W.shape[0]) for W in W_list]
    n = max(sizes)
    W_pad = jnp.stack(
        [jnp.pad(W, ((0, n - s), (0, n - s), (0, 0))) for W, s in zip(W_list, sizes)], axis=0)
    x = jnp.transpose(W_pad, (0, 3, 2, 1)).astype(jnp.float32)
    mask = jnp.stack([jnp.arange(n) < s for s in sizes], axis=0).astype(jnp.float32)
    mask2d = mask[:, :, None] * mask[:, None, :]
    eye = jnp.eye(n, dtype=jnp.float32)
    r = 1.0 / n
    r2 = r * r

    def contractions(xb):
        diag = jnp.einsum('bdij,ij->bdi', xb, eye)
        sr = xb.sum(3)
        sc = xb.sum(2)
        sd = jnp.broadcast_to(diag.sum(2, keepdims=True), diag.shape)
        sa = jnp.broadcast_to(sr.sum(2, keepdims=True), diag.shape)
        de = lambda v: v[..., None] * eye
        bi = lambda v: jnp.broadcast_to(v[..., :, None], xb.shape)
        bj = lambda v: jnp.broadcast_to(v[..., None, :], xb.shape)
        ops2 = [de(diag), de(sd) * r, de(sr) * r, de(sc) * r, de(sa) * r2,
                bi(sc) * r, bi(sr) * r, bj(sc) * r, bj(sr) * r,
                xb, jnp.swapaxes(xb, 2, 3), bi(diag), bj(diag),
                bi(sd) * r, bi(sa) * r2]
        ops1 = [diag, sd * r, sr * r, sc * r, sa * r2]
        return ops2, ops1

    h = x
    for p in params:
        ops2, ops1 = contractions(h)
        if p["kind"] == "2to2":
            ops = jnp.stack(ops2, axis=2)                           # [B, D, 15, n, n]
            y = jnp.einsum('dsb,Bdbij->Bsij', p["coeffs"], ops)
            y = y + p["all_bias"][None, :, None, None] \
                  + p["diag_bias"][None, :, None, None] * eye[None, None]
            h = jax.nn.relu(y * mask2d[:, None])
        else:
            ops = jnp.stack(ops1, axis=2)                           # [B, D, 5, n]
            y = jnp.einsum('dsb,Bdbi->Bsi', p["coeffs"], ops)
            y = y + p["bias"][None, :, None]
            h = y * mask[:, None, :]
    pe = jnp.transpose(h, (0, 2, 1)).reshape(B * n, -1)
    row_idx = jnp.concatenate(
        [b * n + jnp.arange(s, dtype=jnp.int32) for b, s in enumerate(sizes)], axis=0)
    return jnp.take(pe, row_idx, axis=0)


# ---------------------------------------------------------------------------

if __name__ == "__main__":
    key = jax.random.PRNGKey(0)
    k1, k2, k3, kp = jax.random.split(key, 4)

    in_dims = 4        # M spectral channels
    hidden_dims = 16
    out_dims = 8
    n_layers = 3

    # Two small graphs of different size (exercises padding + masking).
    n1, n2 = 12, 16
    W_list = [
        jax.random.normal(k1, (n1, n1, in_dims), dtype=jnp.float32),
        jax.random.normal(k2, (n2, n2, in_dims), dtype=jnp.float32),
    ]
    edge_index = jax.random.randint(k3, (2, 40), 0, n1 + n2, dtype=jnp.int32)

    params = init_ign_params(kp, in_dims, hidden_dims, out_dims, n_layers)

    pe = jax.block_until_ready(ign_phi_forward(W_list, edge_index, params))

    n_sum = n1 + n2
    assert pe.shape == (n_sum, out_dims), pe.shape
    assert pe.dtype == jnp.float32, pe.dtype
    assert bool(jnp.all(jnp.isfinite(pe)))

    pe_ref = jax.block_until_ready(ign_phi_forward_reference(W_list, edge_index, params))
    max_err = float(jnp.max(jnp.abs(pe - pe_ref)))
    assert jnp.allclose(pe, pe_ref, rtol=2e-2, atol=2e-2), max_err

    print("KERNEL_OK")
</pallas_src>

<mosaic_0001>
module attributes {stable_mosaic.version = 11 : i64} {
  func.func @_ign_2to2_kernel(%arg0: i32, %arg1: memref<1x4x16x16xf32, #tpu.memory_space<vmem>>, %arg2: memref<1x16x16xf32, #tpu.memory_space<vmem>>, %arg3: memref<2x16x4xf32, #tpu.memory_space<vmem>>, %arg4: memref<16x20xf32, #tpu.memory_space<vmem>>, %arg5: memref<16x12xf32, #tpu.memory_space<vmem>>, %arg6: memref<16x20xf32, #tpu.memory_space<vmem>>, %arg7: memref<16x1xf32, #tpu.memory_space<vmem>>, %arg8: memref<16x1xf32, #tpu.memory_space<vmem>>, %arg9: memref<1x16x16x16xf32, #tpu.memory_space<vmem>>) attributes {dimension_semantics = [#tpu.dimension_semantics<parallel>], iteration_bounds = array<i64: 2>, scalar_prefetch = 0 : i64, scratch_operands = 0 : i64, tpu.core_type = #tpu.core_type<tc>, window_params = [{transform_indices = @transform_0, window_bounds = array<i64: 1, 4, 16, 16>}, {transform_indices = @transform_1, window_bounds = array<i64: 1, 16, 16>}, {pipeline_mode = #tpu.pipeline_mode<synchronous>, transform_indices = @transform_2, window_bounds = array<i64: 2, 16, 4>}, {pipeline_mode = #tpu.pipeline_mode<synchronous>, transform_indices = @transform_3, window_bounds = array<i64: 16, 20>}, {pipeline_mode = #tpu.pipeline_mode<synchronous>, transform_indices = @transform_4, window_bounds = array<i64: 16, 12>}, {pipeline_mode = #tpu.pipeline_mode<synchronous>, transform_indices = @transform_5, window_bounds = array<i64: 16, 20>}, {pipeline_mode = #tpu.pipeline_mode<synchronous>, transform_indices = @transform_6, window_bounds = array<i64: 16, 1>}, {pipeline_mode = #tpu.pipeline_mode<synchronous>, transform_indices = @transform_7, window_bounds = array<i64: 16, 1>}, {transform_indices = @transform_8, window_bounds = array<i64: 1, 16, 16, 16>}]} {
    %c0 = arith.constant 0 : index
    %c0_0 = arith.constant 0 : index
    %c0_1 = arith.constant 0 : index
    %c0_2 = arith.constant 0 : index
    %0 = vector.load %arg1[%c0, %c0_0, %c0_1, %c0_2] : memref<1x4x16x16xf32, #tpu.memory_space<vmem>>, vector<1x4x16x16xf32>
    %1 = vector.shape_cast %0 : vector<1x4x16x16xf32> to vector<4x16x16xf32>
    %c0_3 = arith.constant 0 : index
    %c0_4 = arith.constant 0 : index
    %c0_5 = arith.constant 0 : index
    %2 = vector.load %arg2[%c0_3, %c0_4, %c0_5] : memref<1x16x16xf32, #tpu.memory_space<vmem>>, vector<1x16x16xf32>
    %3 = vector.shape_cast %2 : vector<1x16x16xf32> to vector<16x16xf32>
    %4 = tpu.iota {dimensions = array<i32: 0>} : vector<16x16xi32>
    %5 = tpu.iota {dimensions = array<i32: 1>} : vector<16x16xi32>
    %6 = arith.cmpi eq, %4, %5 : vector<16x16xi32>
    %7 = arith.extui %6 : vector<16x16xi1> to vector<16x16xi32>
    %8 = arith.sitofp %7 : vector<16x16xi32> to vector<16x16xf32>
    %9 = vector.shape_cast %8 : vector<16x16xf32> to vector<1x16x16xf32>
    %10 = vector.broadcast %9 : vector<1x16x16xf32> to vector<4x16x16xf32>
    %11 = arith.mulf %1, %10 : vector<4x16x16xf32>
    %cst = arith.constant dense<0.000000e+00> : vector<4x16xf32>
    %12 = vector.multi_reduction <add>, %11, %cst [2] : vector<4x16x16xf32> to vector<4x16xf32>
    %cst_6 = arith.constant dense<0.000000e+00> : vector<4x16xf32>
    %13 = vector.multi_reduction <add>, %1, %cst_6 [2] : vector<4x16x16xf32> to vector<4x16xf32>
    %cst_7 = arith.constant dense<0.000000e+00> : vector<4x16xf32>
    %14 = vector.multi_reduction <add>, %1, %cst_7 [1] : vector<4x16x16xf32> to vector<4x16xf32>
    %cst_8 = arith.constant dense<0.000000e+00> : vector<4xf32>
    %15 = vector.multi_reduction <add>, %12, %cst_8 [1] : vector<4x16xf32> to vector<4xf32>
    %16 = vector.shape_cast %15 : vector<4xf32> to vector<4x1xf32>
    %17 = vector.shape_cast %16 : vector<4x1xf32> to vector<4x1xf32>
    %18 = vector.broadcast %17 : vector<4x1xf32> to vector<4x16xf32>
    %cst_9 = arith.constant dense<0.000000e+00> : vector<4xf32>
    %19 = vector.multi_reduction <add>, %13, %cst_9 [1] : vector<4x16xf32> to vector<4xf32>
    %20 = vector.shape_cast %19 : vector<4xf32> to vector<4x1xf32>
    %21 = vector.shape_cast %20 : vector<4x1xf32> to vector<4x1xf32>
    %22 = vector.broadcast %21 : vector<4x1xf32> to vector<4x16xf32>
    %cst_10 = arith.constant 6.250000e-02 : f32
    %23 = vector.broadcast %cst_10 : f32 to vector<4x16xf32>
    %24 = arith.mulf %14, %23 : vector<4x16xf32>
    %cst_11 = arith.constant 6.250000e-02 : f32
    %25 = vector.broadcast %cst_11 : f32 to vector<4x16xf32>
    %26 = arith.mulf %13, %25 : vector<4x16xf32>
    %cst_12 = arith.constant 6.250000e-02 : f32
    %27 = vector.broadcast %cst_12 : f32 to vector<4x16xf32>
    %28 = arith.mulf %18, %27 : vector<4x16xf32>
    %cst_13 = arith.constant 3.906250e-03 : f32
    %29 = vector.broadcast %cst_13 : f32 to vector<4x16xf32>
    %30 = arith.mulf %22, %29 : vector<4x16xf32>
    %31 = tpu.concatenate %24, %26, %12, %28, %30 in 0 : vector<4x16xf32>, vector<4x16xf32>, vector<4x16xf32>, vector<4x16xf32>, vector<4x16xf32> -> vector<20x16xf32>
    %c0_14 = arith.constant 0 : index
    %c0_15 = arith.constant 0 : index
    %32 = vector.load %arg4[%c0_14, %c0_15] : memref<16x20xf32, #tpu.memory_space<vmem>>, vector<16x20xf32>
    %cst_16 = arith.constant dense<0.000000e+00> : vector<16x16xf32>
    %33 = tpu.matmul %32, %31, %cst_16 {dimension_numbers = #tpu.dot_dimension_numbers<[1], [0], [0], [1], [0, 0, 1, 1], [], []>} : vector<16x20xf32>, vector<20x16xf32>, vector<16x16xf32> -> vector<16x16xf32>
    %cst_17 = arith.constant 6.250000e-02 : f32
    %34 = vector.broadcast %cst_17 : f32 to vector<4x16xf32>
    %35 = arith.mulf %14, %34 : vector<4x16xf32>
    %cst_18 = arith.constant 6.250000e-02 : f32
    %36 = vector.broadcast %cst_18 : f32 to vector<4x16xf32>
    %37 = arith.mulf %13, %36 : vector<4x16xf32>
    %38 = tpu.concatenate %35, %37, %12 in 0 : vector<4x16xf32>, vector<4x16xf32>, vector<4x16xf32> -> vector<12x16xf32>
    %c0_19 = arith.constant 0 : index
    %c0_20 = arith.constant 0 : index
    %39 = vector.load %arg5[%c0_19, %c0_20] : memref<16x12xf32, #tpu.memory_space<vmem>>, vector<16x12xf32>
    %cst_21 = arith.constant dense<0.000000e+00> : vector<16x16xf32>
    %40 = tpu.matmul %39, %38, %cst_21 {dimension_numbers = #tpu.dot_dimension_numbers<[1], [0], [0], [1], [0, 0, 1, 1], [], []>} : vector<16x12xf32>, vector<12x16xf32>, vector<16x16xf32> -> vector<16x16xf32>
    %cst_22 = arith.constant 6.250000e-02 : f32
    %41 = vector.broadcast %cst_22 : f32 to vector<4x16xf32>
    %42 = arith.mulf %18, %41 : vector<4x16xf32>
    %cst_23 = arith.constant 6.250000e-02 : f32
    %43 = vector.broadcast %cst_23 : f32 to vector<4x16xf32>
    %44 = arith.mulf %13, %43 : vector<4x16xf32>
    %cst_24 = arith.constant 6.250000e-02 : f32
    %45 = vector.broadcast %cst_24 : f32 to vector<4x16xf32>
    %46 = arith.mulf %14, %45 : vector<4x16xf32>
    %cst_25 = arith.constant 3.906250e-03 : f32
    %47 = vector.broadcast %cst_25 : f32 to vector<4x16xf32>
    %48 = arith.mulf %22, %47 : vector<4x16xf32>
    %49 = tpu.concatenate %12, %42, %44, %46, %48 in 0 : vector<4x16xf32>, vector<4x16xf32>, vector<4x16xf32>, vector<4x16xf32>, vector<4x16xf32> -> vector<20x16xf32>
    %c0_26 = arith.constant 0 : index
    %c0_27 = arith.constant 0 : index
    %50 = vector.load %arg6[%c0_26, %c0_27] : memref<16x20xf32, #tpu.memory_space<vmem>>, vector<16x20xf32>
    %cst_28 = arith.constant dense<0.000000e+00> : vector<16x16xf32>
    %51 = tpu.matmul %50, %49, %cst_28 {dimension_numbers = #tpu.dot_dimension_numbers<[1], [0], [0], [1], [0, 0, 1, 1], [], []>} : vector<16x20xf32>, vector<20x16xf32>, vector<16x16xf32> -> vector<16x16xf32>
    %c0_29 = arith.constant 0 : index
    %c0_30 = arith.constant 0 : index
    %c0_31 = arith.constant 0 : index
    %52 = vector.load %arg3[%c0_29, %c0_30, %c0_31] : memref<2x16x4xf32, #tpu.memory_space<vmem>>, vector<2x16x4xf32>
    %cst_32 = arith.constant 0.000000e+00 : f32
    %53 = vector.broadcast %cst_32 : f32 to vector<16x16x16xf32>
    %54 = vector.extract_strided_slice %1 {offsets = [0, 0, 0], sizes = [1, 16, 16], strides = [1, 1, 1]} : vector<4x16x16xf32> to vector<1x16x16xf32>
    %55 = vector.shape_cast %54 : vector<1x16x16xf32> to vector<16x16xf32>
    %56 = vector.extract_strided_slice %52 {offsets = [0, 0, 0], sizes = [1, 16, 1], strides = [1, 1, 1]} : vector<2x16x4xf32> to vector<1x16x1xf32>
    %57 = vector.shape_cast %56 : vector<1x16x1xf32> to vector<16x1xf32>
    %58 = vector.extract_strided_slice %52 {offsets = [1, 0, 0], sizes = [1, 16, 1], strides = [1, 1, 1]} : vector<2x16x4xf32> to vector<1x16x1xf32>
    %59 = vector.shape_cast %58 : vector<1x16x1xf32> to vector<16x1xf32>
    %60 = vector.shape_cast %57 : vector<16x1xf32> to vector<16x1x1xf32>
    %61 = vector.shape_cast %55 : vector<16x16xf32> to vector<1x16x16xf32>
    %62 = vector.broadcast %60 : vector<16x1x1xf32> to vector<16x16x16xf32>
    %63 = vector.broadcast %61 : vector<1x16x16xf32> to vector<16x16x16xf32>
    %64 = arith.mulf %62, %63 : vector<16x16x16xf32>
    %65 = arith.addf %53, %64 : vector<16x16x16xf32>
    %66 = vector.shape_cast %59 : vector<16x1xf32> to vector<16x1x1xf32>
    %67 = tpu.transpose %55, [1, 0] : vector<16x16xf32> -> vector<16x16xf32>
    %68 = vector.shape_cast %67 : vector<16x16xf32> to vector<1x16x16xf32>
    %69 = vector.broadcast %66 : vector<16x1x1xf32> to vector<16x16x16xf32>
    %70 = vector.broadcast %68 : vector<1x16x16xf32> to vector<16x16x16xf32>
    %71 = arith.mulf %69, %70 : vector<16x16x16xf32>
    %72 = arith.addf %65, %71 : vector<16x16x16xf32>
    %73 = vector.extract_strided_slice %1 {offsets = [1, 0, 0], sizes = [1, 16, 16], strides = [1, 1, 1]} : vector<4x16x16xf32> to vector<1x16x16xf32>
    %74 = vector.shape_cast %73 : vector<1x16x16xf32> to vector<16x16xf32>
    %75 = vector.extract_strided_slice %52 {offsets = [0, 0, 1], sizes = [1, 16, 1], strides = [1, 1, 1]} : vector<2x16x4xf32> to vector<1x16x1xf32>
    %76 = vector.shape_cast %75 : vector<1x16x1xf32> to vector<16x1xf32>
    %77 = vector.extract_strided_slice %52 {offsets = [1, 0, 1], sizes = [1, 16, 1], strides = [1, 1, 1]} : vector<2x16x4xf32> to vector<1x16x1xf32>
    %78 = vector.shape_cast %77 : vector<1x16x1xf32> to vector<16x1xf32>
    %79 = vector.shape_cast %76 : vector<16x1xf32> to vector<16x1x1xf32>
    %80 = vector.shape_cast %74 : vector<16x16xf32> to vector<1x16x16xf32>
    %81 = vector.broadcast %79 : vector<16x1x1xf32> to vector<16x16x16xf32>
    %82 = vector.broadcast %80 : vector<1x16x16xf32> to vector<16x16x16xf32>
    %83 = arith.mulf %81, %82 : vector<16x16x16xf32>
    %84 = arith.addf %72, %83 : vector<16x16x16xf32>
    %85 = vector.shape_cast %78 : vector<16x1xf32> to vector<16x1x1xf32>
    %86 = tpu.transpose %74, [1, 0] : vector<16x16xf32> -> vector<16x16xf32>
    %87 = vector.shape_cast %86 : vector<16x16xf32> to vector<1x16x16xf32>
    %88 = vector.broadcast %85 : vector<16x1x1xf32> to vector<16x16x16xf32>
    %89 = vector.broadcast %87 : vector<1x16x16xf32> to vector<16x16x16xf32>
    %90 = arith.mulf %88, %89 : vector<16x16x16xf32>
    %91 = arith.addf %84, %90 : vector<16x16x16xf32>
    %92 = vector.extract_strided_slice %1 {offsets = [2, 0, 0], sizes = [1, 16, 16], strides = [1, 1, 1]} : vector<4x16x16xf32> to vector<1x16x16xf32>
    %93 = vector.shape_cast %92 : vector<1x16x16xf32> to vector<16x16xf32>
    %94 = vector.extract_strided_slice %52 {offsets = [0, 0, 2], sizes = [1, 16, 1], strides = [1, 1, 1]} : vector<2x16x4xf32> to vector<1x16x1xf32>
    %95 = vector.shape_cast %94 : vector<1x16x1xf32> to vector<16x1xf32>
    %96 = vector.extract_strided_slice %52 {offsets = [1, 0, 2], sizes = [1, 16, 1], strides = [1, 1, 1]} : vector<2x16x4xf32> to vector<1x16x1xf32>
    %97 = vector.shape_cast %96 : vector<1x16x1xf32> to vector<16x1xf32>
    %98 = vector.shape_cast %95 : vector<16x1xf32> to vector<16x1x1xf32>
    %99 = vector.shape_cast %93 : vector<16x16xf32> to vector<1x16x16xf32>
    %100 = vector.broadcast %98 : vector<16x1x1xf32> to vector<16x16x16xf32>
    %101 = vector.broadcast %99 : vector<1x16x16xf32> to vector<16x16x16xf32>
    %102 = arith.mulf %100, %101 : vector<16x16x16xf32>
    %103 = arith.addf %91, %102 : vector<16x16x16xf32>
    %104 = vector.shape_cast %97 : vector<16x1xf32> to vector<16x1x1xf32>
    %105 = tpu.transpose %93, [1, 0] : vector<16x16xf32> -> vector<16x16xf32>
    %106 = vector.shape_cast %105 : vector<16x16xf32> to vector<1x16x16xf32>
    %107 = vector.broadcast %104 : vector<16x1x1xf32> to vector<16x16x16xf32>
    %108 = vector.broadcast %106 : vector<1x16x16xf32> to vector<16x16x16xf32>
    %109 = arith.mulf %107, %108 : vector<16x16x16xf32>
    %110 = arith.addf %103, %109 : vector<16x16x16xf32>
    %111 = vector.extract_strided_slice %1 {offsets = [3, 0, 0], sizes = [1, 16, 16], strides = [1, 1, 1]} : vector<4x16x16xf32> to vector<1x16x16xf32>
    %112 = vector.shape_cast %111 : vector<1x16x16xf32> to vector<16x16xf32>
    %113 = vector.extract_strided_slice %52 {offsets = [0, 0, 3], sizes = [1, 16, 1], strides = [1, 1, 1]} : vector<2x16x4xf32> to vector<1x16x1xf32>
    %114 = vector.shape_cast %113 : vector<1x16x1xf32> to vector<16x1xf32>
    %115 = vector.extract_strided_slice %52 {offsets = [1, 0, 3], sizes = [1, 16, 1], strides = [1, 1, 1]} : vector<2x16x4xf32> to vector<1x16x1xf32>
    %116 = vector.shape_cast %115 : vector<1x16x1xf32> to vector<16x1xf32>
    %117 = vector.shape_cast %114 : vector<16x1xf32> to vector<16x1x1xf32>
    %118 = vector.shape_cast %112 : vector<16x16xf32> to vector<1x16x16xf32>
    %119 = vector.broadcast %117 : vector<16x1x1xf32> to vector<16x16x16xf32>
    %120 = vector.broadcast %118 : vector<1x16x16xf32> to vector<16x16x16xf32>
    %121 = arith.mulf %119, %120 : vector<16x16x16xf32>
    %122 = arith.addf %110, %121 : vector<16x16x16xf32>
    %123 = vector.shape_cast %116 : vector<16x1xf32> to vector<16x1x1xf32>
    %124 = tpu.transpose %112, [1, 0] : vector<16x16xf32> -> vector<16x16xf32>
    %125 = vector.shape_cast %124 : vector<16x16xf32> to vector<1x16x16xf32>
    %126 = vector.broadcast %123 : vector<16x1x1xf32> to vector<16x16x16xf32>
    %127 = vector.broadcast %125 : vector<1x16x16xf32> to vector<16x16x16xf32>
    %128 = arith.mulf %126, %127 : vector<16x16x16xf32>
    %129 = arith.addf %122, %128 : vector<16x16x16xf32>
    %130 = vector.shape_cast %33 : vector<16x16xf32> to vector<16x16x1xf32>
    %131 = vector.broadcast %130 : vector<16x16x1xf32> to vector<16x16x16xf32>
    %132 = arith.addf %129, %131 : vector<16x16x16xf32>
    %133 = vector.shape_cast %40 : vector<16x16xf32> to vector<16x1x16xf32>
    %134 = vector.broadcast %133 : vector<16x1x16xf32> to vector<16x16x16xf32>
    %135 = arith.addf %132, %134 : vector<16x16x16xf32>
    %c0_33 = arith.constant 0 : index
    %c0_34 = arith.constant 0 : index
    %136 = vector.load %arg7[%c0_33, %c0_34] : memref<16x1xf32, #tpu.memory_space<vmem>>, vector<16x1xf32>
    %137 = vector.broadcast %136 : vector<16x1xf32> to vector<16x16xf32>
    %138 = arith.addf %51, %137 : vector<16x16xf32>
    %139 = vector.shape_cast %138 : vector<16x16xf32> to vector<16x16x1xf32>
    %140 = vector.shape_cast %8 : vector<16x16xf32> to vector<1x16x16xf32>
    %141 = vector.broadcast %139 : vector<16x16x1xf32> to vector<16x16x16xf32>
    %142 = vector.broadcast %140 : vector<1x16x16xf32> to vector<16x16x16xf32>
    %143 = arith.mulf %141, %142 : vector<16x16x16xf32>
    %144 = arith.addf %135, %143 : vector<16x16x16xf32>
    %c0_35 = arith.constant 0 : index
    %c0_36 = arith.constant 0 : index
    %145 = vector.load %arg8[%c0_35, %c0_36] : memref<16x1xf32, #tpu.memory_space<vmem>>, vector<16x1xf32>
    %146 = vector.shape_cast %145 : vector<16x1xf32> to vector<16x1x1xf32>
    %147 = vector.broadcast %146 : vector<16x1x1xf32> to vector<16x16x16xf32>
    %148 = arith.addf %144, %147 : vector<16x16x16xf32>
    %149 = vector.shape_cast %3 : vector<16x16xf32> to vector<1x16x16xf32>
    %150 = vector.broadcast %149 : vector<1x16x16xf32> to vector<16x16x16xf32>
    %151 = arith.mulf %148, %150 : vector<16x16x16xf32>
    %cst_37 = arith.constant 0.000000e+00 : f32
    %152 = vector.broadcast %cst_37 : f32 to vector<16x16x16xf32>
    %153 = arith.maximumf %151, %152 : vector<16x16x16xf32>
    %c0_38 = arith.constant 0 : index
    %c0_39 = arith.constant 0 : index
    %c0_40 = arith.constant 0 : index
    %c0_41 = arith.constant 0 : index
    %154 = vector.load %arg9[%c0_38, %c0_39, %c0_40, %c0_41] : memref<1x16x16x16xf32, #tpu.memory_space<vmem>>, vector<1x16x16x16xf32>
    %155 = vector.shape_cast %154 : vector<1x16x16x16xf32> to vector<16x16x16xf32>
    %156 = vector.shape_cast %153 : vector<16x16x16xf32> to vector<1x16x16x16xf32>
    tpu.vector_store %arg9[%c0_38, %c0_39, %c0_40, %c0_41], %156 {strides = array<i32>} : memref<1x16x16x16xf32, #tpu.memory_space<vmem>>, vector<1x16x16x16xf32>,
    return
  }
  func.func @transform_0(%arg0: i32) -> (i32, i32, i32, i32) {
    %c0_i32 = arith.constant 0 : i32
    %c0_i32_0 = arith.constant 0 : i32
    %c0_i32_1 = arith.constant 0 : i32
    %c0_i32_2 = arith.constant 0 : i32
    return %arg0, %c0_i32, %c0_i32_0, %c0_i32_1 : i32, i32, i32, i32
  }
  func.func @transform_1(%arg0: i32) -> (i32, i32, i32) {
    %c0_i32 = arith.constant 0 : i32
    %c0_i32_0 = arith.constant 0 : i32
    %c0_i32_1 = arith.constant 0 : i32
    return %arg0, %c0_i32, %c0_i32_0 : i32, i32, i32
  }
  func.func @transform_2(%arg0: i32) -> (i32, i32, i32) {
    %c0_i32 = arith.constant 0 : i32
    %c0_i32_0 = arith.constant 0 : i32
    %c0_i32_1 = arith.constant 0 : i32
    %c0_i32_2 = arith.constant 0 : i32
    return %c0_i32, %c0_i32_0, %c0_i32_1 : i32, i32, i32
  }
  func.func @transform_3(%arg0: i32) -> (i32, i32) {
    %c0_i32 = arith.constant 0 : i32
    %c0_i32_0 = arith.constant 0 : i32
    %c0_i32_1 = arith.constant 0 : i32
    return %c0_i32, %c0_i32_0 : i32, i32
  }
  func.func @transform_4(%arg0: i32) -> (i32, i32) {
    %c0_i32 = arith.constant 0 : i32
    %c0_i32_0 = arith.constant 0 : i32
    %c0_i32_1 = arith.constant 0 : i32
    return %c0_i32, %c0_i32_0 : i32, i32
  }
  func.func @transform_5(%arg0: i32) -> (i32, i32) {
    %c0_i32 = arith.constant 0 : i32
    %c0_i32_0 = arith.constant 0 : i32
    %c0_i32_1 = arith.constant 0 : i32
    return %c0_i32, %c0_i32_0 : i32, i32
  }
  func.func @transform_6(%arg0: i32) -> (i32, i32) {
    %c0_i32 = arith.constant 0 : i32
    %c0_i32_0 = arith.constant 0 : i32
    %c0_i32_1 = arith.constant 0 : i32
    return %c0_i32, %c0_i32_0 : i32, i32
  }
  func.func @transform_7(%arg0: i32) -> (i32, i32) {
    %c0_i32 = arith.constant 0 : i32
    %c0_i32_0 = arith.constant 0 : i32
    %c0_i32_1 = arith.constant 0 : i32
    return %c0_i32, %c0_i32_0 : i32, i32
  }
  func.func @transform_8(%arg0: i32) -> (i32, i32, i32, i32) {
    %c0_i32 = arith.constant 0 : i32
    %c0_i32_0 = arith.constant 0 : i32
    %c0_i32_1 = arith.constant 0 : i32
    %c0_i32_2 = arith.constant 0 : i32
    return %arg0, %c0_i32, %c0_i32_0, %c0_i32_1 : i32, i32, i32, i32
  }
}

</mosaic_0001>

<bundles_post_ra>
// kernel: tpu_custom_call.1
= control target key start
LH: loop header
LB: loop body
LE: loop exit
PB: predicated region body
PF: predicated region fallthrough
CT: control target
= control target key end

     0   :  { %s5195_s0 = inlined_call_operand.hbm [shape: f32[2,4,16,16], index: 0, kind: input, shape index: {}]   ;;  %s5196_s1 = inlined_call_operand.vmem [shape: f32[2,16,16], index: 1, kind: input, shape index: {}]   ;;  %s5197_s2 = inlined_call_operand.vmem [shape: f32[2,16,4], index: 2, kind: input, shape index: {}]   ;;  %s5198_s3 = inlined_call_operand.vmem [shape: f32[16,20], index: 3, kind: input, shape index: {}]   ;;  %s5199_s4 = inlined_call_operand.vmem [shape: f32[16,12], index: 4, kind: input, shape index: {}]   ;;  %s5200_s5 = inlined_call_operand.hbm [shape: f32[16,20], index: 5, kind: input, shape index: {}]   ;;  %s5201_s6 = inlined_call_operand.vmem [shape: f32[16,1], index: 6, kind: input, shape index: {}]   ;;  %s5202_s7 = inlined_call_operand.vmem [shape: f32[16,1], index: 7, kind: input, shape index: {}]   ;;  %s5203_s8 = inlined_call_operand.hbm [shape: f32[2,16,16,16], index: 8, kind: output, shape index: {}]  }
   0x1   :  { %5315 = sst [smem:[#allocation96_spill]] %s5200_s5 }
   0x2   :  { %13 = vsyncpa [#allocation3], 0 }
   0x3   :  { %15 = vsyncpa [#allocation3 + $0x1], 0 }
   0x4   :  { %16 = vsyncpa [#allocation6], 0 }
   0x5   :  { %17 = vsyncpa [#allocation4], 0 }
   0x6   :  { %19 = vsyncpa [#allocation4 + $0x1], 0  ;;  %s3196_s27 = smov 0   ;;  %s3198_s28 = smov 0  }
   0x7   :  { %s3200_s29 = smov 0   ;;  %s3202_s30 = smov 0  }
   0x8 LB: > { %s3217_s9 = sadd.s32 4294967295, %s3139_s30   ;;  %s2854_s10 = sadd.s32 4294967294, %s3139_s30   ;;  %s3139_s30 = sphi %s3202_s30, %s5563_s30   ;;  %s3135_s29 = sphi %s3200_s29, %s5562_s29   ;;  %s3131_s28 = sphi %s3198_s28, %s5561_s28   ;;  %s3127_s27 = sphi %s3196_s27, %s5560_s27  }
   0x9   : > { %p45_p0 = scmp.ne.s32.totalorder %s3131_s28, %s3127_s27  ;;  %p46_p1 = scmp.eq.s32.totalorder %s3217_s9, 0 }
   0xa   : > { %p221_p2 = scmp.eq.s32.totalorder %s3217_s9, 1  ;;  %p227_p3 = scmp.eq.s32.totalorder %s2854_s10, 1 }
   0xb   : > { %p3226_p4 = por %p46_p1, %p45_p0  ;;  %p2855_p5 = scmp.ge.s32.totalorder %s3139_s30, 1 }
   0xc   : > { %p3231_p6 = por %p227_p3, %p45_p0  ;;  %p234_p7 = scmp.lt.s32.totalorder %s3139_s30, 3 }
   0xd   : > { %s5318_s5 = sld [smem:[#allocation96_spill]]  ;;  %s3141_s17 = smov [#allocation5]  }
   0xe   : > { %p3239_p8 = pnand %p2855_p5, %p234_p7  ;;  %s256_s18 = sshll.u32 %s3141_s17, 4  ;;  %s257_s18 = int_to_ptr.vmem [resolvable:$true] %s256_s18 }
   0xf   : > { %s3249_s19 = sadd.s32 1, %s3139_s30   ;;  %s5204_s20 = smov 128  }
  0x10   : > { %p2897_p9 = pneg %p3239_p8  ;;  %s5205_s21 = smov 8  }
  0x11   : > { %s29_s22 = ssub.s32 %s3139_s30, %s3249_s19  ;;  %s32_s23 = sadd.s32 1, %s3135_s29 }
  0x12   : > { %p2898_p10 = pnand %p2897_p9, %p46_p1  ;;  %p30_p12 = scmp.eq.s32.totalorder %s29_s22, 0 }
  0x13   : > { %s254_s15 = sshll.u32 %s5318_s5, 4  ;;  %p39_p13 = scmp.ne.s32.totalorder %s3135_s29, %s3131_s28  ;;  %s255_s15 = int_to_ptr.hbm [resolvable:$true] %s254_s15 }
  0x14   : > { %2900 = dma.hbm_to_vmem [thread:$0]  (!%p2898_p10), %s255_s15, 256, %s257_s18, [#allocation6], %s5204_s20, %s5204_s20, %s5205_s21  }
  0x15   : > { %p40_p0 = scmp.eq.s32.totalorder %s3139_s30, 0  ;;  %p3265_p3 = por %p221_p2, %p39_p13 }
  0x16   : > { %s3261_s24 = scalar_select %p30_p12, %s3135_s29, %s32_s23  }
  0x17   : > { %p2910_p5 = scmp.lt.s32.totalorder %s3139_s30, 2  ;;  %s276_s26 = sand.u32 1, %s3135_s29  }
  0x18   : > { %5320 = sst [smem:[#allocation11_spill]] %s3261_s24  ;;  %s2883_s10 = sshll.u32 %s3139_s30, 6 }
  0x19   : > { %p41_p7 = por %p40_p0, %p39_p13  ;;  %s2858_s13 = sshll.u32 %s276_s26, 6 }
  0x1a   : > { %s285_s15 = scalar_lea.hbm %s5195_s0, %s2883_s10  ;;  %s280_s22 = scalar_lea.vmem [#allocation2], %s2858_s13 }
  0x1b   : > { %s286_s18 = sshll.u32 %s285_s15, 4  ;;  %s288_s20 = sshll.u32 %s280_s22, 4  ;;  %s287_s18 = int_to_ptr.hbm [resolvable:$true] %s286_s18  ;;  %s289_s20 = int_to_ptr.vmem [resolvable:$true] %s288_s20 }
  0x1c   : > { %p3275_p9 = pnand %p2910_p5, %p41_p7  ;;  %s277_s21 = scalar_lea.sflag [#allocation3], %s276_s26 }
  0x1d   : > { %s3039_s5 = sshra.s32 %s287_s18, 4  ;;  %s3046_s13 = scalar_lea.hbm %s5195_s0, 128  ;;  %s3040_s5 = int_to_ptr.hbm [resolvable:$true] %s3039_s5 }
  0x1e   : > { %s3041_s24 = scalar_lea.hbm %s3040_s5, 64  ;;  %p3043_p10 = pneg %p3275_p9 }
  0x1f   : > { %p3042_p2 = scmp.ne.s32.totalorder %s3040_s5, %s3041_s24  ;;  %p3047_p0 = scmp.lt.s32.totalorder %s3040_s5, %s5195_s0 }
  0x20   : > { %p3048_p5 = scmp.lt.s32.totalorder %s3046_s13, %s3041_s24 }
  0x21   : > { %p3044_p12 = pnand %p3043_p10, %p3042_p2 }
  0x22   : > { %p3049_p7 = por %p3048_p5, %p3047_p0 }
  0x23   : > { %p3045_p13 = pneg %p3044_p12 }
  0x25   : > { %p3050_p11 = pnand %p3049_p7, %p3045_p13 }
  0x27   : > { %3053 = shalt.err (!%p3050_p11)
}
  0x28   : > { %s5323_s26 = smov 8   ;;  %s5324_s22 = smov 128  }
  0x29   : > { %2904 = dma.hbm_to_vmem [thread:$0]  (!%p3275_p9), %s287_s18, 1024, %s289_s20, %s277_s21, %s5324_s22, %s5324_s22, %s5323_s26  }
  0x2a   : > { %308 = sbr.rel (%p3239_p8) target bundleno = 1324 (0x52c), region = 52 }
  0x2f   : > { %s3295_s10 = sand.u32 1, %s3131_s28  }
  0x30   : > { %s2862_s5 = sshll.u32 %s3295_s10, 6  ;;  %s311_s24 = scalar_lea.sflag [#allocation3], %s3295_s10 }
  0x31   : > { %s3299_s14 = scalar_lea.vmem [#allocation2], %s2862_s5 }
  0x32   : > { %3114 = dma.done.wait (%p3226_p4), %s311_s24, 1024  }
  0x33   : > { %3116 = vsyncadd (%p3226_p4), %s311_s24, 4294966272 }
  0x34   : > { %3118 = dma.done.wait (%p46_p1), [#allocation6], 256  }
  0x35   : > { %3120 = vsyncadd (%p46_p1), [#allocation6], 4294967040  ;;  %v373_v0 = vlaneseq  ;;  %v3144_v4 = vmov 0.0   ;;  %v3323_v6 = vld [vmem:[%s3299_s14 + $0x10] sm:$0xff]  ;;  %v3326_v7 = vld [vmem:[%s3299_s14] sm:$0xff]  ;;  %vm392_vm2 = vcmask 130048  }
  0x36   : > { %1148 = vxpose.xlu1.b32.start [1/2] (short) (narrow) %v3323_v6, 16  ;;  %v3332_v9 = vld [vmem:[%s3299_s14 + $0x8] sm:$0xff]  ;;  %v3340_v13 = vld [vmem:[%s3299_s14 + $0x18] sm:$0xff]  ;;  %v3345_v15 = vld [vmem:[%s3299_s14 + $0x30] sm:$0xff]  ;;  %v417_v28 = vsel %vm392_vm2, %v3326_v7, 0.0  ;;  %v423_v30 = vsel %vm392_vm2, %v3323_v6, 0.0 }
  0x37   : > { %v3309_v1 = vshrl.u32 %v373_v0, 7  ;;  %v3311_v2 = vand.u32 127, %v373_v0  ;;  %v420_v18 = vsel %vm392_vm2, %v3332_v9, 0.0  ;;  %v3353_v19 = vld [vmem:[%s3299_s14 + $0x20] sm:$0xff]  ;;  %v3358_v21 = vld [vmem:[%s3299_s14 + $0x38] sm:$0xff]  ;;  %v3366_v25 = vld [vmem:[%s3299_s14 + $0x28] sm:$0xff] }
  0x38   : > { %v429_v20 = vsel %vm392_vm2, %v3353_v19, 0.0  ;;  %v438_v22 = vsel %vm392_vm2, %v3358_v21, 0.0  ;;  %v441_v29 = vadd.f32 %v420_v18, %v417_v28  ;;  %v426_v31 = vsel %vm392_vm2, %v3340_v13, 0.0  ;;  %v3398_v44 = vld [vmem:[%s5197_s2] sm:$0xff]  ;;  %p358_p1 = scmp.lt.s32.totalorder %s3217_s9, 1  ;;  %s2864_s20 = sshll.u32 %s3295_s10, 8 }
  0x39   : > { %5325 = vst [vmem:[#allocation12_spill] sm:$0xff] %v3309_v1  ;;  %vm378_vm0 = vcmp.eq.s32.totalorder %v3309_v1, %v3311_v2  ;;  %v3316_v3 = vadd.s32 8, %v3309_v1  ;;  %v448_v32 = vadd.f32 %v426_v31, %v423_v30  ;;  %v432_v33 = vsel %vm392_vm2, %v3366_v25, 0.0  ;;  %s4990_s21 = scalar_lea.vmem [#allocation7], %s2864_s20  ;;  %s2885_s18 = sshll.u32 %s3217_s9, 8 }
  0x3a   : > { %v3318_v5 = vsel %vm378_vm0, 1.0, %v3144_v4  ;;  %v455_v35 = vadd.f32 %v432_v33, %v429_v20  ;;  %v435_v37 = vsel %vm392_vm2, %v3345_v15, 0.0  ;;  %v5207_v40 = vmov 0   ;;  %s359_s22 = scalar_select %p358_p1, %s3217_s9, 1 }
  0x3b   : > { %5326 = vst [vmem:[#allocation13_spill] sm:$0xff] %v3318_v5  ;;  %vm379_vm1 = vcmp.eq.s32.totalorder %v3316_v3, %v3311_v2  ;;  %v384_v8 = vmul.f32 %v3318_v5, %v3326_v7  ;;  %v390_v16 = vmul.f32 %v3318_v5, %v3345_v15  ;;  %v388_v23 = vmul.f32 %v3318_v5, %v3353_v19  ;;  %s2755_s13 = scalar_lea.hbm %s5203_s8, %s2885_s18  ;;  %s2756_s9 = sshll.u32 %s4990_s21, 4  ;;  %s2757_s9 = int_to_ptr.vmem [resolvable:$true] %s2756_s9 }
  0x3c   : > { %v3334_v10 = vsel %vm379_vm1, 1.0, %v3144_v4  ;;  %v386_v34 = vmul.f32 %v3318_v5, %v3323_v6  ;;  %v462_v39 = vadd.f32 %v438_v22, %v435_v37  ;;  %v670_v45 = vrot.slane %v3398_v44, 1  ;;  %v3417_v4 = vld [vmem:[%s5197_s2 + $0x10] sm:$0xff]  ;;  %s2884_s5 = sshll.u32 %s359_s22, 4  ;;  %s2758_s17 = sshll.u32 %s2755_s13, 4  ;;  %s2759_s17 = int_to_ptr.hbm [resolvable:$true] %s2758_s17 }
  0x3d   : > { %5327 = vst [vmem:[#allocation14_spill] sm:$0xff] %v3334_v10  ;;  %v393_v11 = vsel %vm392_vm2, %v384_v8, 0.0  ;;  %v385_v12 = vmul.f32 %v3334_v10, %v3332_v9  ;;  %v411_v17 = vsel %vm392_vm2, %v390_v16, 0.0  ;;  %v405_v24 = vsel %vm392_vm2, %v388_v23, 0.0  ;;  %s362_s16 = scalar_lea.vmem %s5196_s1, %s2884_s5  ;;  %s2744_s15 = scalar_lea.sflag [#allocation4], %s3295_s10 }
  0x3e   : > { %394 = vadd.xlane.f32.xlu0 %v393_v11  ;;  %1149 = vxpose.xlu1.b32.end [2/2] (short) (narrow) %v3340_v13, 16  ;;  %v389_v26 = vmul.f32 %v3334_v10, %v3366_v25  ;;  %v399_v36 = vsel %vm392_vm2, %v386_v34, 0.0  ;;  %v387_v38 = vmul.f32 %v3334_v10, %v3340_v13  ;;  %v391_v42 = vmul.f32 %v3334_v10, %v3358_v21  ;;  %s3083_s26 = sshra.s32 %s2759_s17, 4  ;;  %s3089_s11 = scalar_lea.hbm %s5203_s8, 512  ;;  %s3084_s26 = int_to_ptr.hbm [resolvable:$true] %s3083_s26 }
  0x3f   : > { %v396_v14 = vsel %vm392_vm2, %v385_v12, 0.0  ;;  %406 = vadd.xlane.f32.xlu2 %v405_v24  ;;  %v3401_v46 = vperm.slane %v670_v45, 0  ;;  %v673_v47 = vrot.slane %v3398_v44, 4  ;;  %v442_v49 = vrot.slane %v441_v29, 4  ;;  %s3085_s22 = scalar_lea.hbm %s3084_s26, 256  ;;  %p3090_p9 = scmp.lt.s32.totalorder %s3084_s26, %s5203_s8 }
  0x40   : > { %v408_v27 = vsel %vm392_vm2, %v389_v26, 0.0  ;;  %v402_v41 = vsel %vm392_vm2, %v387_v38, 0.0  ;;  %v414_v43 = vsel %vm392_vm2, %v391_v42, 0.0  ;;  %v449_v50 = vrot.slane %v448_v32, 4  ;;  %p3086_p4 = scmp.ne.s32.totalorder %s3084_s26, %s3085_s22  ;;  %p3091_p2 = scmp.lt.s32.totalorder %s3089_s11, %s3085_s22 }
  0x41   : > { %v3405_v48 = vperm.slane %v673_v47, 0  ;;  %v456_v52 = vrot.slane %v455_v35, 4  ;;  %v463_v53 = vrot.slane %v462_v39, 4  ;;  %v443_v55 = vadd.f32 %v442_v49, %v441_v29 }
  0x42   : > { %v450_v56 = vadd.f32 %v449_v50, %v448_v32  ;;  %vm491_vm3 = vcmask 1041409   ;;  %vm493_vm4 = vcmask 1042434   ;;  %vm571_vm5 = vcmask 1045509   ;;  %p3087_p8 = pnand %p3086_p4, %p3265_p3  ;;  %p3092_p10 = por %p3091_p2, %p3090_p9 }
  0x43   : > { %5328 = vst [vmem:[#allocation15_spill] sm:$0xff] %v3405_v48  ;;  %v457_v57 = vadd.f32 %v456_v52, %v455_v35  ;;  %v464_v58 = vadd.f32 %v463_v53, %v462_v39  ;;  %v444_v59 = vrot.slane %v443_v55, 2  ;;  %vm573_vm6 = vcmask 1046534  }
  0x44   : > { %v451_v60 = vrot.slane %v450_v56, 2  ;;  %vm495_vm7 = vcmask 1043459   ;;  %vm575_vm8 = vcmask 1047559   ;;  %v3437_v49 = vadd.s32 4294967288, %v3311_v2  ;;  %p3088_p11 = pneg %p3087_p8 }
  0x45   : > { %v458_v61 = vrot.slane %v457_v57, 2  ;;  %v465_v62 = vrot.slane %v464_v58, 2  ;;  %v445_v8 = vadd.f32 %v444_v59, %v443_v55  ;;  %v3447_v55 = vld [vmem:[%s5197_s2 + $0x18] sm:$0xff]  ;;  %vm480_vm9 = vcmask 130112  }
  0x46   : > { %397 = vadd.xlane.f32.xlu0 %v396_v14  ;;  %v452_v11 = vadd.f32 %v451_v60, %v450_v56  ;;  %vm581_vm10 = vcmask 1043456   ;;  %vm498_vm11 = vcmask 125952   ;;  %vm586_vm12 = vcmask 162816   ;;  %p3093_p12 = pnand %p3092_p10, %p3088_p11 }
  0x47   : > { %409 = vadd.xlane.f32.xlu2 %v408_v27  ;;  %v459_v12 = vadd.f32 %v458_v61, %v457_v57  ;;  %v466_v16 = vadd.f32 %v465_v62, %v464_v58  ;;  %v3458_v61 = vperm.slane %v3447_v55, 0  ;;  %vm621_vm13 = vcmask 97280  }
  0x49   : > { %v460_v23 = vrot.slane %v459_v12, 1  ;;  %v467_v24 = vrot.slane %v466_v16, 1 }
  0x4b   : > { %v468_v32 = vadd.f32 %v467_v24, %v466_v16 }
  0x4d   : > { %v532_v38 = vmul.f32 0.0625, %v468_v32 }
  0x4e   : > { %412 = vadd.xlane.f32.xlu0 %v411_v17  ;;  %v832_v17 = vrot.slane %v3417_v4, 3 }
  0x4f   : > { %418 = vadd.xlane.f32.xlu2 %v417_v28 }
  0x50   : > { %v3423_v26 = vperm.slane %v832_v17, 0 }
  0x52   : > { %5329 = vst [vmem:[#allocation16_spill] sm:$0xff] %v3423_v26 }
  0x56   : > { %421 = vadd.xlane.f32.xlu0 %v420_v18  ;;  %v5206_v18 = vmov 1  }
  0x57   : > { %427 = vadd.xlane.f32.xlu2 %v426_v31  ;;  %v461_v31 = vadd.f32 %v460_v23, %v459_v12 }
  0x5e   : > { %430 = vadd.xlane.f32.xlu0 %v429_v20  ;;  %v446_v20 = vrot.slane %v445_v8, 1 }
  0x5f   : > { %436 = vadd.xlane.f32.xlu2 %v435_v37  ;;  %v531_v37 = vmul.f32 0.0625, %v461_v31 }
  0x60   : > { %v447_v28 = vadd.f32 %v446_v20, %v445_v8 }
  0x62   : > { %v529_v35 = vmul.f32 0.0625, %v447_v28 }
  0x66   : > { %439 = vadd.xlane.f32.xlu0 %v438_v22  ;;  %v453_v22 = vrot.slane %v452_v11, 1 }
  0x68   : > { %v454_v29 = vadd.f32 %v453_v22, %v452_v11 }
  0x8f   : > { %844 = vxpose.xlu0.b32.start [1/2] (short) (narrow) %v3326_v7, 16 }
  0x91   : > { %2955 = vset.pattern.permute.xlu1 %v5207_v40 }
  0x97   : > { %845 = vxpose.xlu0.b32.end [2/2] (short) (narrow) %v3332_v9, 16 }
  0x9e   : > { %400 = vadd.xlane.f32.xlu1 %v399_v36  ;;  %v530_v36 = vmul.f32 0.0625, %v454_v29 }
  0x9f   : > { %1436 = vxpose.xlu0.b32.start [1/2] (short) (narrow) %v3353_v19, 16 }
  0xa0   : > { %v657_v47 = vsel %vm571_vm5, %v530_v36, %v529_v35 }
  0xa1   : > { %v658_v52 = vsel %vm573_vm6, %v531_v37, %v657_v47 }
  0xa2   : > { %v3450_v56 = vsel %vm575_vm8, %v532_v38, %v658_v52 }
  0xa6   : > { %403 = vadd.xlane.f32.xlu1 %v402_v41 }
  0xa7   : > { %1437 = vxpose.xlu0.b32.end [2/2] (short) (narrow) %v3366_v25, 16 }
  0xae   : > { %415 = vadd.xlane.f32.xlu1 %v414_v43  ;;  %v547_v43 = vsel %vm491_vm3, %v530_v36, %v529_v35 }
  0xaf   : > { %v548_v45 = vsel %vm493_vm4, %v531_v37, %v547_v43 }
  0xb0   : > { %v3441_v50 = vsel %vm495_vm7, %v532_v38, %v548_v45 }
  0xb1   : > { %v3408_v51 = vpop.xlane.xlu0 %394 }
  0xb2   : > { %v3412_v63 = vpop.xlane.xlu2 %406  ;;  %v477_v58 = vperm.slane %v3408_v51, %v3311_v2  ;;  %v839_v51 = vrot.slane %v3447_v55, 3 }
  0xb3   : > { %v485_v8 = vperm.slane %v3412_v63, %v3311_v2 }
  0xb4   : > { %v3473_v29 = vperm.slane %v839_v51, 0 }
  0xb6   : > { %424 = vadd.xlane.f32.xlu1 %v423_v30  ;;  %5331 = vst [vmem:[#allocation18_spill] sm:$0xff] %v3473_v29 }
  0xb9   : > { %v398_v0 = vpop.xlane.xlu0 %397 }
  0xba   : > { %v410_v30 = vpop.xlane.xlu2 %409  ;;  %v479_v59 = vperm.slane %v398_v0, %v3437_v49 }
  0xbb   : > { %v486_v11 = vperm.slane %v410_v30, %v3437_v49 }
  0xbc   : > { %v481_v12 = vsel %vm480_vm9, %v479_v59, %v477_v58 }
  0xbd   : > { %v487_v24 = vsel %vm480_vm9, %v486_v11, %v485_v8 }
  0xbe   : > { %433 = vadd.xlane.f32.xlu1 %v432_v33  ;;  %v835_v33 = vrot.slane %v3417_v4, 6 }
  0xc0   : > { %v3427_v39 = vperm.slane %v835_v33, 0 }
  0xc1   : > { %v413_v27 = vpop.xlane.xlu0 %412 }
  0xc2   : > { %5330 = vst [vmem:[#allocation17_spill] sm:$0xff] %v3427_v39  ;;  %v3429_v41 = vpop.xlane.xlu2 %418  ;;  %v488_v22 = vperm.slane %v413_v27, %v3311_v2 }
  0xc3   : > { %v533_v31 = vmul.f32 0.0625, %v3429_v41 }
  0xc5   : > { %v559_v36 = vperm.slane %v533_v31, %v3311_v2 }
  0xc9   : > { %v3431_v42 = vpop.xlane.xlu0 %421 }
  0xca   : > { %v428_v0 = vpop.xlane.xlu2 %427  ;;  %v534_v32 = vmul.f32 0.0625, %v3431_v42  ;;  %v511_v8 = vperm.slane %v3431_v42, %v3437_v49 }
  0xcb   : > { %v536_v33 = vmul.f32 0.0625, %v428_v0  ;;  %v514_v58 = vperm.slane %v428_v0, %v3437_v49  ;;  %v843_v0 = vrot.slane %v3447_v55, 7 }
  0xcc   : > { %v560_v37 = vperm.slane %v534_v32, %v3437_v49 }
  0xcd   : > { %v563_v43 = vperm.slane %v536_v33, %v3437_v49 }
  0xce   : > { %v561_v11 = vsel %vm480_vm9, %v560_v37, %v559_v36 }
  0xd1   : > { %v431_v16 = vpop.xlane.xlu0 %430 }
  0xd2   : > { %v437_v45 = vpop.xlane.xlu2 %436  ;;  %v537_v51 = vmul.f32 0.0625, %v431_v16 }
  0xd3   : > { %v539_v59 = vmul.f32 0.0625, %v437_v45 }
  0xd5   : > { %v568_v42 = vperm.slane %v539_v59, %v3311_v2 }
  0xd7   : > { %705 = vperm.xlu1 %2955, %v3401_v46  }
  0xd9   : > { %v440_v47 = vpop.xlane.xlu0 %439 }
  0xda   : > { %v3410_v54 = vpop.trf.xlu1 }
  0xdf   : > { %717 = vperm.xlu1 %2955, %v3405_v48  }
  0xe2   : > { %v3419_v14 = vpop.trf.xlu1 }
 0x10e   : > { %2957 = vset.pattern.permute.xlu0 %v5206_v18 }
 0x111   : > { %v401_v34 = vpop.xlane.xlu1 %400 }
 0x112   : > { %v482_v60 = vperm.slane %v401_v34, %v3311_v2  ;;  %v841_v34 = vrot.slane %v3447_v55, 5 }
 0x115   : > { %1193 = vperm.xlu0 %2957, %v3423_v26  }
 0x119   : > { %v404_v53 = vpop.xlane.xlu1 %403 }
 0x11a   : > { %v483_v57 = vperm.slane %v404_v53, %v3437_v49  ;;  %v3490_v53 = vperm.slane %v841_v34, 0 }
 0x11c   : > { %v484_v62 = vsel %vm480_vm9, %v483_v57, %v482_v60  ;;  %v540_v60 = vmul.f32 0.0625, %v440_v47 }
 0x11d   : > { %1205 = vperm.xlu0 %2957, %v3427_v39   ;;  %v492_v20 = vsel %vm491_vm3, %v484_v62, %v481_v12  ;;  %v510_v62 = vperm.slane %v3429_v41, %v3311_v2 }
 0x11e   : > { %v494_v28 = vsel %vm493_vm4, %v487_v24, %v492_v20  ;;  %v520_v20 = vperm.slane %v440_v47, %v3437_v49  ;;  %v569_v24 = vperm.slane %v540_v60, %v3437_v49 }
 0x11f   : > { %v512_v32 = vsel %vm480_vm9, %v511_v8, %v510_v62 }
 0x121   : > { %v416_v17 = vpop.xlane.xlu1 %415 }
 0x122   : > { %v489_v23 = vperm.slane %v416_v17, %v3437_v49  ;;  %v519_v17 = vperm.slane %v437_v45, %v3311_v2 }
 0x124   : > { %v490_v63 = vsel %vm480_vm9, %v489_v23, %v488_v22  ;;  %v521_v33 = vsel %vm480_vm9, %v520_v20, %v519_v17 }
 0x125   : > { %1213 = vperm.xlu0 %2957, %v3458_v61   ;;  %v3476_v30 = vsel %vm495_vm7, %v490_v63, %v494_v28  ;;  %v516_v63 = vperm.slane %v431_v16, %v3311_v2  ;;  %v570_v16 = vsel %vm480_vm9, %v569_v24, %v568_v42 }
 0x126   : > { %2872 = vmatpush.msk.msra.mxu1 %vm581_vm10, %v3476_v30  ;;  %v499_v27 = vsel %vm498_vm11, %v3476_v30, 0.0 }
 0x127   : > { %500 = vadd.xlane.f32.xlu1 %v499_v27  ;;  %v565_v27 = vperm.slane %v537_v51, %v3311_v2 }
 0x129   : > { %v425_v35 = vpop.xlane.xlu1 %424 }
 0x12a   : > { %v535_v38 = vmul.f32 0.0625, %v425_v35  ;;  %v513_v57 = vperm.slane %v425_v35, %v3311_v2  ;;  %v3514_v35 = vperm.slane %v843_v0, 0 }
 0x12c   : > { %v562_v52 = vperm.slane %v535_v38, %v3311_v2  ;;  %v515_v41 = vsel %vm480_vm9, %v514_v58, %v513_v57  ;;  %v675_v58 = vrot.slane %v3398_v44, 6 }
 0x12d   : > { %1225 = vperm.xlu0 %2957, %v3473_v29   ;;  %v522_v37 = vsel %vm491_vm3, %v515_v41, %v512_v32  ;;  %v830_v41 = vrot.slane %v3417_v4, 1 }
 0x12e   : > { %v564_v12 = vsel %vm480_vm9, %v563_v43, %v562_v52  ;;  %v3539_v8 = vperm.slane %v675_v58, 0 }
 0x12f   : > { %v653_v22 = vsel %vm491_vm3, %v564_v12, %v561_v11  ;;  %v572_v2 = vsel %vm571_vm5, %v564_v12, %v561_v11  ;;  %v3544_v11 = vld [vmem:[%s5197_s2 + $0x8] sm:$0xff]  ;;  %v5211_v12 = vmov 2   ;;  %v3569_v42 = vperm.slane %v830_v41, 0 }
 0x130   : > { %5332 = vst [vmem:[#allocation19_spill] sm:$0xff] %v3539_v8  ;;  %v680_v51 = vrot.slane %v3544_v11, 4  ;;  %v683_v20 = vrot.slane %v3544_v11, 7  ;;  %v3563_v0 = vperm.slane %v3544_v11, 0 }
 0x131   : > { %v434_v23 = vpop.xlane.xlu1 %433 }
 0x132   : > { %v517_v28 = vperm.slane %v434_v23, %v3437_v49  ;;  %v538_v31 = vmul.f32 0.0625, %v434_v23  ;;  %v3555_v17 = vperm.slane %v680_v51, 0  ;;  %5334 = vst [vmem:[#allocation21_spill] sm:$0xff] %v3563_v0  ;;  %v678_v23 = vrot.slane %v3544_v11, 2 }
 0x134   : > { %v566_v34 = vperm.slane %v538_v31, %v3437_v49  ;;  %v518_v36 = vsel %vm480_vm9, %v517_v28, %v516_v63  ;;  %5333 = vst [vmem:[#allocation20_spill] sm:$0xff] %v3555_v17  ;;  %v3571_v24 = vperm.slane %v678_v23, 0  ;;  %v834_v63 = vrot.slane %v3417_v4, 5 }
 0x135   : > { %1233 = vperm.xlu0 %2957, %v3490_v53   ;;  %v523_v38 = vsel %vm493_vm4, %v518_v36, %v522_v37  ;;  %v682_v28 = vrot.slane %v3544_v11, 6  ;;  %v3598_v37 = vpop.trf.xlu0 }
 0x136   : > { %v524_v43 = vsel %vm495_vm7, %v521_v33, %v523_v38  ;;  %v567_v45 = vsel %vm480_vm9, %v566_v34, %v565_v27  ;;  %5335 = vst [vmem:[#allocation22_spill] sm:$0xff] %v3571_v24  ;;  %v3581_v31 = vperm.slane %v834_v63, 0  ;;  %v836_v27 = vrot.slane %v3417_v4, 7 }
 0x137   : > { %v526_v47 = vsel %vm498_vm11, %v524_v43, 0.0  ;;  %v574_v49 = vsel %vm573_vm6, %v567_v45, %v572_v2  ;;  %v654_v52 = vsel %vm493_vm4, %v567_v45, %v653_v22  ;;  %v3560_v22 = vperm.slane %v683_v20, 0 }
 0x138   : > { %527 = vadd.xlane.f32.xlu2 %v526_v47  ;;  %v576_v57 = vsel %vm575_vm8, %v570_v16, %v574_v49  ;;  %v655_v59 = vsel %vm495_vm7, %v570_v16, %v654_v52  ;;  %v3583_v32 = vperm.slane %v682_v28, 0  ;;  %v3589_v33 = vperm.slane %v836_v27, 0 }
 0x139   : > { %v3532_v60 = vsel %vm581_vm10, %v3441_v50, %v576_v57  ;;  %v3536_v62 = vsel %vm581_vm10, %v655_v59, %v3450_v56  ;;  %v677_v50 = vrot.slane %v3544_v11, 1  ;;  %v5209_v38 = vmov 3  }
 0x13a   : > { %645 = vmatpush.msra.mxu1 %v3532_v60  ;;  %5336 = vst [vmem:[#allocation23_spill] sm:$0xff] %v3583_v32  ;;  %v842_v16 = vrot.slane %v3447_v55, 6  ;;  %v3617_v49 = vperm.slane %v3398_v44, 0  ;;  %v671_v52 = vrot.slane %v3398_v44, 2 }
 0x13b   : > { %v3550_v56 = vperm.slane %v677_v50, 0 }
 0x13c   : > { %v3608_v45 = vperm.slane %v842_v16, 0  ;;  %v3627_v59 = vperm.slane %v671_v52, 0 }
 0x13d   : > { %1241 = vperm.xlu0 %2957, %v3514_v35   ;;  %v3605_v43 = vpop.trf.xlu0 }
 0x140   : > { %725 = vperm.xlu1 %2955, %v3539_v8  }
 0x145   : > { %2958 = vset.pattern.permute.xlu0 %v5211_v12  ;;  %v3614_v47 = vpop.trf.xlu0  ;;  %v3694_v12 = vperm.slane %v3417_v4, 0 }
 0x146   : > { %1313 = vperm.xlu0 %2958, %v3401_v46  }
 0x148   : > { %737 = vperm.xlu1 %2955, %v3550_v56  }
 0x149   : > { %v3610_v2 = vpop.permute.xlu1 %705 }
 0x14a   : > { %5337 = vst [vmem:[#allocation24_spill] sm:$0xff] %v3610_v2 }
 0x14d   : > { %v3625_v58 = vpop.trf.xlu0 }
 0x14e   : > { %1325 = vperm.xlu0 %2958, %v3405_v48   ;;  %5339 = vst [vmem:[#allocation26_spill] sm:$0xff] %v3625_v58 }
 0x150   : > { %749 = vperm.xlu1 %2955, %v3555_v17  }
 0x151   : > { %v3622_v57 = vpop.permute.xlu1 %717 }
 0x152   : > { %5338 = vst [vmem:[#allocation25_spill] sm:$0xff] %v3622_v57  ;;  %v831_v57 = vrot.slane %v3417_v4, 2 }
 0x156   : > { %1333 = vperm.xlu0 %2958, %v3539_v8  }
 0x158   : > { %761 = vperm.xlu1 %2955, %v3560_v22  }
 0x15e   : > { %1341 = vperm.xlu0 %2958, %v3563_v0  }
 0x160   : > { %897 = vperm.xlu1 %2955, %v3569_v42  }
 0x161   : > { %1724 = vxpose.xlu2.b32.start [1/2] (short) (narrow) %v3345_v15, 16  ;;  %v840_v15 = vrot.slane %v3447_v55, 4 }
 0x163   : > { %v3591_v34 = vperm.slane %v840_v15, 0 }
 0x166   : > { %1349 = vperm.xlu0 %2958, %v3571_v24  }
 0x168   : > { %905 = vperm.xlu1 %2955, %v3423_v26  }
 0x169   : > { %1725 = vxpose.xlu2.b32.end [2/2] (short) (narrow) %v3358_v21, 16  ;;  %v837_v21 = vrot.slane %v3447_v55, 1 }
 0x16b   : > { %v3596_v36 = vperm.slane %v837_v21, 0 }
 0x16e   : > { %1357 = vperm.xlu0 %2958, %v3555_v17  }
 0x170   : > { %913 = vperm.xlu1 %2955, %v3581_v31  }
 0x176   : > { %1365 = vperm.xlu0 %2958, %v3583_v32  }
 0x178   : > { %921 = vperm.xlu1 %2955, %v3589_v33  }
 0x17e   : > { %1517 = vperm.xlu0 %2958, %v3591_v34  }
 0x180   : > { %929 = vperm.xlu1 %2955, %v3596_v36  }
 0x186   : > { %2965 = vset.pattern.permute.xlu0 %v5209_v38 }
 0x187   : > { %1769 = vperm.xlu0 %2965, %v3423_v26   ;;  %v3631_v51 = vpop.permute.xlu0 %1193 }
 0x188   : > { %937 = vperm.xlu1 %2955, %v3473_v29   ;;  %5340 = vst [vmem:[#allocation27_spill] sm:$0xff] %v3631_v51 }
 0x18f   : > { %1785 = vperm.xlu0 %2965, %v3589_v33   ;;  %v3640_v27 = vpop.permute.xlu0 %1205 }
 0x190   : > { %949 = vperm.xlu1 %2955, %v3608_v45  }
 0x197   : > { %1793 = vperm.xlu0 %2965, %v3596_v36   ;;  %v3656_v16 = vpop.permute.xlu0 %1213 }
 0x198   : > { %2956 = vset.pattern.permute.xlu1 %v5206_v18 }
 0x199   : > { %1021 = vperm.xlu1 %2956, %v3617_v49  }
 0x19a   : > { %v501_v50 = vpop.xlane.xlu1 %500 }
 0x19b   : > { %v541_v20 = vmul.f32 0.0625, %v501_v50 }
 0x19d   : > { %v579_v41 = vrot.slane %v541_v20, 4 }
 0x19f   : > { %1801 = vperm.xlu0 %2965, %v3473_v29   ;;  %v583_v28 = vsel %vm581_vm10, %v3476_v30, %v579_v41  ;;  %v676_v30 = vrot.slane %v3398_v44, 7  ;;  %v3664_v50 = vpop.permute.xlu0 %1225 }
 0x1a0   : > { %5342 = vst [vmem:[#allocation29_spill] sm:$0xff] %v3664_v50  ;;  %v662_v50 = vld [vmem:[#allocation5] sm:$0xff] }
 0x1a1   : > { %1029 = vperm.xlu1 %2956, %v3627_v59   ;;  %v3651_v21 = vperm.slane %v676_v30, 0  ;;  %v672_v30 = vrot.slane %v3398_v44, 3 }
 0x1a3   : > { %v3684_v18 = vperm.slane %v672_v30, 0 }
 0x1a7   : > { %1809 = vperm.xlu0 %2965, %v3490_v53  }
 0x1a9   : > { %1037 = vperm.xlu1 %2956, %v3405_v48  }
 0x1ab   : > { %v528_v23 = vpop.xlane.xlu2 %527 }
 0x1ac   : > { %v542_v63 = vmul.f32 0.00390625, %v528_v23  ;;  %v3673_v23 = vpop.permute.xlu0 %1233 }
 0x1ae   : > { %2869 = vmatpush.msk.msra.mxu0 %vm581_vm10, %v542_v63  ;;  %2886 = vmatpush.msk.msra.mxu3 %vm581_vm10, %v542_v63 }
 0x1af   : > { %1817 = vperm.xlu0 %2965, %v3514_v35   ;;  %2875 = vmatpush.msk.msra.mxu2 %vm581_vm10, %v542_v63  ;;  %v838_v63 = vrot.slane %v3447_v55, 2  ;;  %v674_v55 = vrot.slane %v3398_v44, 5 }
 0x1b0   : > { %610 = vmatpush.msra.mxu0 %v583_v28  ;;  %2887 = vmatpush.msra.mxu3 %v583_v28 }
 0x1b1   : > { %2236 = vmatpush.msra.mxu2 %v3536_v62  ;;  %1045 = vperm.xlu1 %2956, %v3539_v8   ;;  %v3696_v5 = vperm.slane %v674_v55, 0  ;;  %v833_v55 = vrot.slane %v3417_v4, 4 }
 0x1b2   : > { %v3645_v15 = vpop.permute.xlu1 %725  ;;  %611 = vmatpush.msra.mxu0 %v3532_v60  ;;  %2888 = vmatpush.msra.mxu3 %v3532_v60  ;;  %v681_v60 = vrot.slane %v3544_v11, 5 }
 0x1b3   : > { %2237 = vmatpush.msra.mxu2 %v583_v28  ;;  %v3716_v51 = vperm.slane %v833_v55, 0 }
 0x1b4   : > { %v3666_v20 = vperm.slane %v681_v60, 0  ;;  %v3682_v60 = vperm.slane %v838_v63, 0  ;;  %v5348_v63 = vmov 2   ;;  %2876 = vmatmul.msk.f32.vlgmr.msra.gmra.mxu2 %vm586_vm12, %v662_v50  ;;  %v2204_v50 = vld [vmem:[%s5201_s6] sm:$0xff] }
 0x1b7   : > { %2966 = vset.pattern.permute.xlu0 %v5207_v40 }
 0x1b8   : > { %701 = vperm.xlu0 %2966, %v3617_v49  }
 0x1b9   : > { %1053 = vperm.xlu1 %2956, %v3563_v0  }
 0x1ba   : > { %v3654_v62 = vpop.permute.xlu1 %737 }
 0x1bb   : > { %5341 = vst [vmem:[#allocation28_spill] sm:$0xff] %v3654_v62  ;;  %v3706_v62 = vperm.slane %v831_v57, 0 }
 0x1c0   : > { %729 = vperm.xlu0 %2966, %v3651_v21  }
 0x1c1   : > { %1061 = vperm.xlu1 %2956, %v3571_v24  }
 0x1c2   : > { %v3660_v52 = vpop.permute.xlu1 %749 }
 0x1c8   : > { %741 = vperm.xlu0 %2966, %v3571_v24  }
 0x1c9   : > { %1069 = vperm.xlu1 %2956, %v3555_v17   ;;  %v679_v17 = vrot.slane %v3544_v11, 3 }
 0x1ca   : > { %v3669_v41 = vpop.permute.xlu1 %761 }
 0x1cb   : > { %5343 = vst [vmem:[#allocation30_spill] sm:$0xff] %v3669_v41  ;;  %2961 = vset.pattern.permute.xlu2 %v5207_v40  ;;  %v3686_v40 = vpop.permute.xlu0 %1241 }
 0x1cc   : > { %5345 = vst [vmem:[#allocation32_spill] sm:$0xff] %v3686_v40 }
 0x1d0   : > { %753 = vperm.xlu0 %2966, %v3666_v20  }
 0x1d1   : > { %1077 = vperm.xlu1 %2956, %v3583_v32  }
 0x1d2   : > { %v3677_v28 = vpop.permute.xlu1 %897  ;;  %709 = vperm.xlu2 %2961, %v3627_v59  }
 0x1d3   : > { %5344 = vst [vmem:[#allocation31_spill] sm:$0xff] %v3677_v28  ;;  %v3698_v10 = vpop.permute.xlu0 %1313 }
 0x1d4   : > { %5347 = vst [vmem:[#allocation34_spill] sm:$0xff] %v3698_v10  ;;  %v5360_v10 = vmov 3  }
 0x1d8   : > { %941 = vperm.xlu0 %2966, %v3591_v34  }
 0x1d9   : > { %1221 = vperm.xlu1 %2956, %v3682_v60  }
 0x1da   : > { %v3689_v38 = vpop.permute.xlu1 %905  ;;  %713 = vperm.xlu2 %2961, %v3684_v18  }
 0x1db   : > { %5346 = vst [vmem:[#allocation33_spill] sm:$0xff] %v3689_v38  ;;  %v3714_v24 = vpop.permute.xlu0 %1325 }
 0x1dc   : > { %5351 = vst [vmem:[#allocation37_spill] sm:$0xff] %v3714_v24 }
 0x1e0   : > { %2208 = vperm.xlu0 %2966, %v2204_v50  }
 0x1e1   : > { %2959 = vset.pattern.permute.xlu1 %v5348_v63 }
 0x1e2   : > { %1469 = vperm.xlu1 %2959, %v3694_v12   ;;  %v3702_v30 = vpop.permute.xlu1 %913  ;;  %721 = vperm.xlu2 %2961, %v3696_v5  }
 0x1e3   : > { %5349 = vst [vmem:[#allocation35_spill] sm:$0xff] %v3702_v30  ;;  %v3718_v30 = vperm.slane %v679_v17, 0  ;;  %v3724_v38 = vpop.permute.xlu0 %1333 }
 0x1e8   : > { %2981 = vset.pattern.permute.xlu0 %v3316_v3 }
 0x1ea   : > { %1477 = vperm.xlu1 %2959, %v3706_v62   ;;  %v3709_v44 = vpop.permute.xlu1 %921  ;;  %733 = vperm.xlu2 %2961, %v3563_v0  }
 0x1eb   : > { %5350 = vst [vmem:[#allocation36_spill] sm:$0xff] %v3709_v44  ;;  %v3730_v4 = vpop.permute.xlu0 %1341 }
 0x1f2   : > { %1485 = vperm.xlu1 %2959, %v3716_v51   ;;  %v3721_v57 = vpop.permute.xlu1 %929  ;;  %745 = vperm.xlu2 %2961, %v3718_v30  }
 0x1f3   : > { %5352 = vst [vmem:[#allocation38_spill] sm:$0xff] %v3721_v57  ;;  %v3736_v17 = vpop.permute.xlu0 %1349 }
 0x1fa   : > { %1493 = vperm.xlu1 %2959, %v3427_v39   ;;  %v3727_v0 = vpop.permute.xlu1 %937  ;;  %757 = vperm.xlu2 %2961, %v3583_v32   ;;  %v3752_v57 = vpop.trf.xlu2 }
 0x1fb   : > { %5353 = vst [vmem:[#allocation39_spill] sm:$0xff] %v3727_v0  ;;  %v3744_v24 = vpop.permute.xlu0 %1357 }
 0x1fc   : > { %5357 = vst [vmem:[#allocation43_spill] sm:$0xff] %v3752_v57 }
 0x202   : > { %1501 = vperm.xlu1 %2959, %v3458_v61   ;;  %v3733_v11 = vpop.permute.xlu1 %949  ;;  %893 = vperm.xlu2 %2961, %v3694_v12  }
 0x203   : > { %5354 = vst [vmem:[#allocation40_spill] sm:$0xff] %v3733_v11  ;;  %v584_v11 = vld [vmem:[%s5198_s3] sm:$0xff]  ;;  %v3758_v8 = vpop.permute.xlu0 %1365 }
 0x204   : > { %2870 = vmatmul.msk.f32.vlgmr.msra.gmra.mxu0 %vm586_vm12, %v584_v11  ;;  %5359 = vst [vmem:[#allocation45_spill] sm:$0xff] %v3758_v8 }
 0x20a   : > { %1509 = vperm.xlu1 %2959, %v3682_v60   ;;  %901 = vperm.xlu2 %2961, %v3706_v62  }
 0x20b   : > { %v3740_v55 = vpop.permute.xlu1 %1021  ;;  %v3765_v11 = vpop.permute.xlu0 %1517 }
 0x20c   : > { %5355 = vst [vmem:[#allocation41_spill] sm:$0xff] %v3740_v55 }
 0x212   : > { %1521 = vperm.xlu1 %2959, %v3490_v53   ;;  %909 = vperm.xlu2 %2961, %v3716_v51  }
 0x213   : > { %v3746_v32 = vpop.permute.xlu1 %1029  ;;  %v3773_v8 = vpop.permute.xlu0 %1769 }
 0x214   : > { %5356 = vst [vmem:[#allocation42_spill] sm:$0xff] %v3746_v32  ;;  %v3762_v32 = vpop.trf.xlu2 }
 0x215   : > { %5361 = vst [vmem:[#allocation46_spill] sm:$0xff] %v3762_v32 }
 0x216   : > { %5363 = vst [vmem:[#allocation48_spill] sm:$0xff] %v3773_v8 }
 0x21a   : > { %1529 = vperm.xlu1 %2959, %v3514_v35   ;;  %917 = vperm.xlu2 %2961, %v3427_v39  }
 0x21b   : > { %v3756_v55 = vpop.permute.xlu1 %1037  ;;  %v3782_v28 = vpop.permute.xlu0 %1785 }
 0x21c   : > { %5358 = vst [vmem:[#allocation44_spill] sm:$0xff] %v3756_v55 }
 0x21d   : > { %5365 = vst [vmem:[#allocation50_spill] sm:$0xff] %v3782_v28 }
 0x222   : > { %2960 = vset.pattern.permute.xlu1 %v5360_v10  ;;  %925 = vperm.xlu2 %2961, %v3458_v61  }
 0x223   : > { %1601 = vperm.xlu1 %2960, %v3401_v46   ;;  %v1046_v40 = vpop.permute.xlu1 %1045 }
 0x224   : > { %v1096_v0 = vmul.f32 %v1046_v40, %v3323_v6  ;;  %v1097_v50 = vmul.f32 %v1046_v40, %v3340_v13  ;;  %v1385_v40 = vmul.f32 %v3724_v38, %v3366_v25 }
 0x22a   : > { %933 = vperm.xlu2 %2961, %v3682_v60  }
 0x22b   : > { %1609 = vperm.xlu1 %2960, %v3684_v18   ;;  %v3769_v39 = vpop.permute.xlu1 %1053 }
 0x22c   : > { %v3771_v55 = vpop.permute.xlu2 %709 }
 0x22d   : > { %5362 = vst [vmem:[#allocation47_spill] sm:$0xff] %v3771_v55  ;;  %v5367_v55 = vmov 1  }
 0x232   : > { %945 = vperm.xlu2 %2961, %v3490_v53  }
 0x233   : > { %1617 = vperm.xlu1 %2960, %v3696_v5   ;;  %v3777_v57 = vpop.permute.xlu1 %1061 }
 0x234   : > { %v3779_v32 = vpop.permute.xlu2 %713 }
 0x235   : > { %5364 = vst [vmem:[#allocation49_spill] sm:$0xff] %v3779_v32  ;;  %v3794_v32 = vpop.permute.xlu0 %1793 }
 0x236   : > { %5369 = vst [vmem:[#allocation53_spill] sm:$0xff] %v3794_v32 }
 0x23a   : > { %953 = vperm.xlu2 %2961, %v3514_v35   ;;  %v585_v35 = vld [vmem:[%s5198_s3 + $0x8] sm:$0xff] }
 0x23b   : > { %1625 = vperm.xlu1 %2960, %v3651_v21   ;;  %v3785_v2 = vpop.permute.xlu1 %1069  ;;  %2871 = vmatmul.msk.f32.vlgmr.msra.gmra.mxu3 %vm586_vm12, %v585_v35 }
 0x23c   : > { %v3787_v48 = vpop.permute.xlu2 %721 }
 0x23d   : > { %5366 = vst [vmem:[#allocation51_spill] sm:$0xff] %v3787_v48 }
 0x242   : > { %2962 = vset.pattern.permute.xlu2 %v5367_v55 }
 0x243   : > { %1633 = vperm.xlu1 %2960, %v3550_v56   ;;  %v3791_v53 = vpop.permute.xlu1 %1077  ;;  %1025 = vperm.xlu2 %2962, %v3401_v46  }
 0x244   : > { %5368 = vst [vmem:[#allocation52_spill] sm:$0xff] %v3791_v53  ;;  %v734_v8 = vpop.permute.xlu2 %733  ;;  %v3806_v53 = vpop.permute.xlu0 %1801 }
 0x245   : > { %5371 = vst [vmem:[#allocation55_spill] sm:$0xff] %v3806_v53 }
 0x24b   : > { %1641 = vperm.xlu1 %2960, %v3718_v30   ;;  %1033 = vperm.xlu2 %2962, %v3684_v18   ;;  %v3802_v55 = vpop.permute.xlu1 %1221 }
 0x24c   : > { %v3804_v28 = vpop.permute.xlu2 %745  ;;  %v3814_v48 = vpop.permute.xlu0 %1809 }
 0x24d   : > { %5370 = vst [vmem:[#allocation54_spill] sm:$0xff] %v3804_v28 }
 0x24e   : > { %5374 = vst [vmem:[#allocation58_spill] sm:$0xff] %v3814_v48 }
 0x253   : > { %1649 = vperm.xlu1 %2960, %v3666_v20   ;;  %1041 = vperm.xlu2 %2962, %v3696_v5  }
 0x254   : > { %v3810_v46 = vpop.permute.xlu2 %757  ;;  %v3812_v32 = vpop.permute.xlu1 %1469 }
 0x255   : > { %5372 = vst [vmem:[#allocation56_spill] sm:$0xff] %v3810_v46  ;;  %v3823_v53 = vpop.permute.xlu0 %1817 }
 0x256   : > { %5373 = vst [vmem:[#allocation57_spill] sm:$0xff] %v3812_v32 }
 0x257   : > { %5377 = vst [vmem:[#allocation61_spill] sm:$0xff] %v3823_v53 }
 0x25b   : > { %1657 = vperm.xlu1 %2960, %v3560_v22   ;;  %1049 = vperm.xlu2 %2962, %v3651_v21  }
 0x25c   : > { %v3818_v35 = vpop.permute.xlu2 %893  ;;  %v3820_v41 = vpop.permute.xlu1 %1477 }
 0x25d   : > { %5375 = vst [vmem:[#allocation59_spill] sm:$0xff] %v3818_v35  ;;  %v3837_v48 = vpop.permute.xlu0 %701 }
 0x25e   : > { %5376 = vst [vmem:[#allocation60_spill] sm:$0xff] %v3820_v41 }
 0x25f   : > { %5382 = vst [vmem:[#allocation66_spill] sm:$0xff] %v3837_v48 }
 0x263   : > { %1757 = vperm.xlu1 %2960, %v3694_v12   ;;  %1057 = vperm.xlu2 %2962, %v3550_v56  }
 0x264   : > { %v3827_v32 = vpop.permute.xlu2 %901  ;;  %v3829_v46 = vpop.permute.xlu1 %1485 }
 0x265   : > { %5378 = vst [vmem:[#allocation62_spill] sm:$0xff] %v3827_v32  ;;  %v776_v32 = vmul.f32 %v3645_v15, %v3326_v7  ;;  %v3854_v28 = vpop.permute.xlu0 %729 }
 0x266   : > { %5379 = vst [vmem:[#allocation63_spill] sm:$0xff] %v3829_v46 }
 0x267   : > { %5384 = vst [vmem:[#allocation68_spill] sm:$0xff] %v3854_v28 }
 0x26b   : > { %1761 = vperm.xlu1 %2960, %v3569_v42   ;;  %1065 = vperm.xlu2 %2962, %v3718_v30  }
 0x26c   : > { %v3833_v35 = vpop.permute.xlu2 %909  ;;  %v3835_v41 = vpop.permute.xlu1 %1493 }
 0x26d   : > { %5380 = vst [vmem:[#allocation64_spill] sm:$0xff] %v3833_v35 }
 0x26e   : > { %5381 = vst [vmem:[#allocation65_spill] sm:$0xff] %v3835_v41  ;;  %v777_v41 = vmul.f32 %v3645_v15, %v3332_v9  ;;  %v1257_v15 = vmul.f32 %v3640_v27, %v3419_v14 }
 0x273   : > { %1765 = vperm.xlu1 %2960, %v3706_v62   ;;  %1073 = vperm.xlu2 %2962, %v3666_v20  }
 0x274   : > { %v918_v53 = vpop.permute.xlu2 %917  ;;  %v3844_v46 = vpop.permute.xlu1 %1501 }
 0x275   : > { %5383 = vst [vmem:[#allocation67_spill] sm:$0xff] %v3844_v46  ;;  %v968_v35 = vmul.f32 %v918_v53, %v3598_v37  ;;  %v969_v48 = vmul.f32 %v918_v53, %v3605_v43  ;;  %v1256_v46 = vmul.f32 %v3640_v27, %v3410_v54  ;;  %v1384_v53 = vmul.f32 %v3724_v38, %v3353_v19 }
 0x277   : > { %v1000_v10 = vadd.f32 %v968_v35, %v776_v32  ;;  %v1001_v44 = vadd.f32 %v969_v48, %v777_v41  ;;  %v780_v41 = vmul.f32 %v734_v8, %v3326_v7 }
 0x279   : > { %v1128_v29 = vadd.f32 %v1096_v0, %v1000_v10  ;;  %v1129_v26 = vadd.f32 %v1097_v50, %v1001_v44  ;;  %v781_v10 = vmul.f32 %v734_v8, %v3332_v9  ;;  %v1260_v50 = vmul.f32 %v3656_v16, %v3410_v54 }
 0x27a   : > { %v1261_v8 = vmul.f32 %v3656_v16, %v3419_v14 }
 0x27b   : > { %v1288_v58 = vadd.f32 %v1256_v46, %v1128_v29  ;;  %v1289_v28 = vadd.f32 %v1257_v15, %v1129_v26  ;;  %1773 = vperm.xlu1 %2960, %v3716_v51   ;;  %1081 = vperm.xlu2 %2962, %v3560_v22   ;;  %v1100_v26 = vmul.f32 %v3769_v39, %v3323_v6  ;;  %v742_v15 = vpop.permute.xlu0 %741 }
 0x27c   : > { %v926_v48 = vpop.permute.xlu2 %925  ;;  %v3867_v32 = vpop.permute.xlu1 %1509  ;;  %v1101_v29 = vmul.f32 %v3769_v39, %v3340_v13  ;;  %v785_v39 = vmul.f32 %v742_v15, %v3332_v9  ;;  %v1105_v9 = vmul.f32 %v3777_v57, %v3340_v13 }
 0x27d   : > { %5385 = vst [vmem:[#allocation69_spill] sm:$0xff] %v3867_v32  ;;  %v972_v0 = vmul.f32 %v926_v48, %v3598_v37  ;;  %v973_v27 = vmul.f32 %v926_v48, %v3605_v43  ;;  %v3873_v44 = vadd.f32 %v1384_v53, %v1288_v58  ;;  %v3875_v38 = vadd.f32 %v1385_v40, %v1289_v28  ;;  %v3990_v32 = vld [vmem:[%s3299_s14 + $0x18] sm:$0xff] }
 0x27e   : > { %v1388_v28 = vmul.f32 %v3730_v4, %v3353_v19  ;;  %v1389_v53 = vmul.f32 %v3730_v4, %v3366_v25  ;;  %v784_v40 = vmul.f32 %v742_v15, %v3326_v7  ;;  %v1104_v7 = vmul.f32 %v3777_v57, %v3323_v6 }
 0x27f   : > { %5386 = vst [vmem:[#allocation70_spill] sm:$0xff] %v3873_v44  ;;  %v1004_v46 = vadd.f32 %v972_v0, %v780_v41  ;;  %v1005_v35 = vadd.f32 %v973_v27, %v781_v10 }
 0x280   : > { %5387 = vst [vmem:[#allocation71_spill] sm:$0xff] %v3875_v38 }
 0x281   : > { %v1132_v48 = vadd.f32 %v1100_v26, %v1004_v46  ;;  %v1133_v58 = vadd.f32 %v1101_v29, %v1005_v35 }
 0x283   : > { %v1292_v41 = vadd.f32 %v1260_v50, %v1132_v48  ;;  %v1293_v10 = vadd.f32 %v1261_v8, %v1133_v58  ;;  %1777 = vperm.xlu1 %2960, %v3581_v31   ;;  %1181 = vperm.xlu2 %2962, %v3694_v12   ;;  %v1264_v12 = vmul.f32 %v3802_v55, %v3410_v54 }
 0x284   : > { %v934_v16 = vpop.permute.xlu2 %933  ;;  %v3893_v0 = vpop.permute.xlu1 %1521  ;;  %v1265_v50 = vmul.f32 %v3802_v55, %v3419_v14  ;;  %v1392_v48 = vmul.f32 %v3736_v17, %v3353_v19  ;;  %v1393_v58 = vmul.f32 %v3736_v17, %v3366_v25 }
 0x285   : > { %v976_v27 = vmul.f32 %v934_v16, %v3598_v37  ;;  %v977_v26 = vmul.f32 %v934_v16, %v3605_v43  ;;  %v3897_v29 = vadd.f32 %v1388_v28, %v1292_v41  ;;  %v3899_v4 = vadd.f32 %v1389_v53, %v1293_v10 }
 0x287   : > { %5388 = vst [vmem:[#allocation72_spill] sm:$0xff] %v3897_v29  ;;  %v1008_v46 = vadd.f32 %v976_v27, %v784_v40  ;;  %v1009_v35 = vadd.f32 %v977_v26, %v785_v39  ;;  %v3921_v40 = vpop.f32.mrf.mxu0 }
 0x288   : > { %5389 = vst [vmem:[#allocation73_spill] sm:$0xff] %v3899_v4  ;;  %v1884_v19 = vperm.slane %v3921_v40, 0  ;;  %v1897_v16 = vperm.slane %v3921_v40, 1  ;;  %v5284_v44 = vperm.slane %v3921_v40, 6 }
 0x289   : > { %v1136_v8 = vadd.f32 %v1104_v7, %v1008_v46  ;;  %v1137_v15 = vadd.f32 %v1105_v9, %v1009_v35  ;;  %5392 = vst [vmem:[#allocation76_spill] sm:$0xff] %v3921_v40  ;;  %v619_v7 = vld [vmem:[%s5199_s4] sm:$0xff]  ;;  %v1923_v9 = vperm.slane %v3921_v40, 3  ;;  %v620_v46 = vld [vmem:[%s5199_s4 + $0x8] sm:$0xff]  ;;  %v754_v35 = vpop.permute.xlu0 %753 }
 0x28a   : > { %1895 = vperm.xlu0 %2981, %v1884_v19   ;;  %2873 = vmatmul.msk.f32.vlgmr.msra.gmra.mxu1 %vm621_vm13, %v619_v7 }
 0x28b   : > { %v1296_v6 = vadd.f32 %v1264_v12, %v1136_v8  ;;  %v1297_v28 = vadd.f32 %v1265_v50, %v1137_v15  ;;  %1789 = vperm.xlu1 %2960, %v3458_v61   ;;  %1185 = vperm.xlu2 %2962, %v3569_v42   ;;  %v3971_v50 = vld [vmem:[%s3299_s14] sm:$0xff]  ;;  %v3975_v15 = vld [vmem:[%s3299_s14 + $0x8] sm:$0xff] }
 0x28c   : > { %v946_v13 = vpop.permute.xlu2 %945  ;;  %v3915_v57 = vpop.permute.xlu1 %1529  ;;  %v790_v8 = vmul.f32 %v3971_v50, %v754_v35 }
 0x28d   : > { %v3917_v53 = vadd.f32 %v1392_v48, %v1296_v6  ;;  %v3919_v55 = vadd.f32 %v1393_v58, %v1297_v28  ;;  %v791_v48 = vmul.f32 %v3975_v15, %v754_v35  ;;  %v982_v58 = vmul.f32 %v946_v13, %v3598_v37 }
 0x28e   : > { %v983_v6 = vmul.f32 %v946_v13, %v3605_v43 }
 0x28f   : > { %5390 = vst [vmem:[#allocation74_spill] sm:$0xff] %v3917_v53  ;;  %v3986_v53 = vld [vmem:[%s3299_s14 + $0x10] sm:$0xff] }
 0x290   : > { %5391 = vst [vmem:[#allocation75_spill] sm:$0xff] %v3919_v55  ;;  %v1015_v55 = vadd.f32 %v983_v6, %v791_v48 }
 0x292   : > { %1934 = vperm.xlu0 %2981, %v1923_v9   ;;  %2874 = vmatmul.msk.f32.gmra.mxu1 %vm621_vm13, %v620_v46  ;;  %v1014_v46 = vadd.f32 %v982_v58, %v790_v8  ;;  %v1271_v8 = vmul.f32 %v3673_v23, %v3419_v14 }
 0x293   : > { %1797 = vperm.xlu1 %2960, %v3682_v60   ;;  %1189 = vperm.xlu2 %2962, %v3706_v62  }
 0x294   : > { %v3926_v25 = vpop.permute.xlu2 %953 }
 0x295   : > { %v3928_v61 = vpop.permute.xlu1 %1601 }
 0x29b   : > { %1805 = vperm.xlu1 %2960, %v3591_v34   ;;  %1197 = vperm.xlu2 %2962, %v3716_v51  }
 0x29d   : > { %v3932_v17 = vpop.permute.xlu2 %1025  ;;  %v3934_v39 = vpop.permute.xlu1 %1609 }
 0x2a3   : > { %1813 = vperm.xlu1 %2960, %v3608_v45   ;;  %1201 = vperm.xlu2 %2962, %v3581_v31  }
 0x2a5   : > { %v3938_v60 = vpop.permute.xlu2 %1033  ;;  %v3940_v62 = vpop.permute.xlu1 %1617 }
 0x2ab   : > { %2967 = vset.pattern.permute.xlu1 %v3309_v1  ;;  %1209 = vperm.xlu2 %2962, %v3589_v33  }
 0x2ad   : > { %v3944_v41 = vpop.permute.xlu2 %1041  ;;  %v3947_v51 = vpop.permute.xlu1 %1625 }
 0x2ae   : > { %5393 = vst [vmem:[#allocation77_spill] sm:$0xff] %v3947_v51 }
 0x2b3   : > { %1217 = vperm.xlu2 %2962, %v3596_v36   ;;  %1889 = vperm.xlu1 %2967, %v1884_v19  }
 0x2b5   : > { %v3949_v10 = vpop.permute.xlu2 %1049  ;;  %v3955_v26 = vpop.permute.xlu1 %1633 }
 0x2b6   : > { %5395 = vst [vmem:[#allocation79_spill] sm:$0xff] %v3955_v26 }
 0x2bb   : > { %1229 = vperm.xlu2 %2962, %v3591_v34   ;;  %1902 = vperm.xlu1 %2967, %v1897_v16  }
 0x2bd   : > { %v3953_v27 = vpop.permute.xlu2 %1057  ;;  %v3968_v12 = vpop.permute.xlu1 %1641 }
 0x2be   : > { %5394 = vst [vmem:[#allocation78_spill] sm:$0xff] %v3953_v27  ;;  %v3981_v28 = vpop.f32.mrf.mxu3 }
 0x2bf   : > { %5396 = vst [vmem:[#allocation80_spill] sm:$0xff] %v3968_v12  ;;  %v5272_v7 = vperm.slane %v3981_v28, 0 }
 0x2c1   : > { %1999 = vperm.xlu0 %2981, %v5272_v7   ;;  %v5275_v7 = vperm.slane %v3981_v28, 5 }
 0x2c3   : > { %1237 = vperm.xlu2 %2962, %v3608_v45   ;;  %2968 = vset.pattern.permute.xlu1 %v3316_v3 }
 0x2c5   : > { %v3963_v34 = vpop.permute.xlu2 %1065  ;;  %v4004_v29 = vpop.permute.xlu1 %1649 }
 0x2c9   : > { %2064 = vperm.xlu0 %2981, %v5275_v7  }
 0x2cb   : > { %2963 = vset.pattern.permute.xlu2 %v5348_v63  ;;  %1908 = vperm.xlu1 %2968, %v1897_v16   ;;  %v5273_v63 = vperm.slane %v3921_v40, 2  ;;  %v1270_v16 = vmul.f32 %v3673_v23, %v3410_v54  ;;  %v942_v23 = vpop.permute.xlu0 %941 }
 0x2cc   : > { %1309 = vperm.xlu2 %2963, %v3617_v49  }
 0x2cd   : > { %v1074_v19 = vpop.permute.xlu2 %1073 }
 0x2ce   : > { %v1110_v35 = vmul.f32 %v3986_v53, %v1074_v19  ;;  %v1111_v13 = vmul.f32 %v3990_v32, %v1074_v19 }
 0x2d0   : > { %v1142_v48 = vadd.f32 %v1110_v35, %v1014_v46  ;;  %v1143_v58 = vadd.f32 %v1111_v13, %v1015_v55  ;;  %v4016_v55 = vpop.permute.xlu1 %1657  ;;  %v2239_v35 = vpop.f32.mrf.mxu2 }
 0x2d2   : > { %v4000_v6 = vadd.f32 %v1270_v16, %v1142_v48  ;;  %v4002_v4 = vadd.f32 %v1271_v8, %v1143_v58 }
 0x2d3   : > { %1921 = vperm.xlu1 %2968, %v5273_v63   ;;  %v2209_v13 = vpop.permute.xlu0 %2208  ;;  %v1936_v63 = vperm.slane %v3921_v40, 4 }
 0x2d4   : > { %1317 = vperm.xlu2 %2963, %v3627_v59   ;;  %v4020_v16 = vadd.f32 %v2239_v35, %v2209_v13 }
 0x2d5   : > { %v4009_v19 = vpop.permute.xlu2 %1081 }
 0x2d6   : > { %v5274_v48 = vperm.slane %v4020_v16, 1 }
 0x2d8   : > { %v4026_v58 = vpop.permute.xlu1 %1757  ;;  %2269 = vperm.xlu0 %2981, %v5274_v48   ;;  %v5276_v48 = vperm.slane %v3921_v40, 5 }
 0x2d9   : > { %5398 = vst [vmem:[#allocation82_spill] sm:$0xff] %v4026_v58  ;;  %v4079_v58 = vld [vmem:[%s3299_s14 + $0x28] sm:$0xff] }
 0x2db   : > { %2969 = vset.pattern.permute.xlu1 %v3309_v1 }
 0x2dc   : > { %1321 = vperm.xlu2 %2963, %v3684_v18  }
 0x2dd   : > { %v4018_v46 = vpop.permute.xlu2 %1181 }
 0x2de   : > { %5397 = vst [vmem:[#allocation81_spill] sm:$0xff] %v4018_v46 }
 0x2e3   : > { %1928 = vperm.xlu1 %2969, %v1923_v9   ;;  %v4034_v9 = vpop.permute.xlu1 %1761 }
 0x2e4   : > { %1329 = vperm.xlu2 %2963, %v3696_v5  }
 0x2e5   : > { %v4023_v8 = vpop.permute.xlu2 %1185 }
 0x2eb   : > { %1941 = vperm.xlu1 %2969, %v1936_v63   ;;  %v4040_v35 = vpop.permute.xlu1 %1765 }
 0x2ec   : > { %1337 = vperm.xlu2 %2963, %v3651_v21   ;;  %5401 = vst [vmem:[#allocation85_spill] sm:$0xff] %v4040_v35 }
 0x2ed   : > { %v4032_v18 = vpop.permute.xlu2 %1189 }
 0x2ee   : > { %5399 = vst [vmem:[#allocation83_spill] sm:$0xff] %v4032_v18  ;;  %v1397_v18 = vmul.f32 %v4079_v58, %v3744_v24 }
 0x2f3   : > { %2970 = vset.pattern.permute.xlu1 %v3316_v3  ;;  %v4049_v21 = vpop.permute.xlu1 %1773 }
 0x2f4   : > { %1345 = vperm.xlu2 %2963, %v3550_v56   ;;  %5402 = vst [vmem:[#allocation86_spill] sm:$0xff] %v4049_v21  ;;  %v1109_v21 = vmul.f32 %v3990_v32, %v3785_v2 }
 0x2f5   : > { %v4038_v5 = vpop.permute.xlu2 %1197 }
 0x2f6   : > { %5400 = vst [vmem:[#allocation84_spill] sm:$0xff] %v4038_v5 }
 0x2fb   : > { %1947 = vperm.xlu1 %2970, %v1936_v63   ;;  %v981_v63 = vmul.f32 %v942_v23, %v3605_v43  ;;  %v4059_v38 = vpop.permute.xlu1 %1777 }
 0x2fc   : > { %1353 = vperm.xlu2 %2963, %v3718_v30   ;;  %v980_v30 = vmul.f32 %v942_v23, %v3598_v37  ;;  %v4074_v23 = vld [vmem:[%s3299_s14 + $0x20] sm:$0xff] }
 0x2fd   : > { %v4043_v13 = vpop.permute.xlu2 %1201 }
 0x303   : > { %1960 = vperm.xlu1 %2970, %v5276_v48   ;;  %v789_v48 = vmul.f32 %v3975_v15, %v3660_v52 }
 0x304   : > { %1361 = vperm.xlu2 %2963, %v3666_v20   ;;  %v788_v20 = vmul.f32 %v3971_v50, %v3660_v52  ;;  %v1396_v52 = vmul.f32 %v4074_v23, %v3744_v24  ;;  %v5406_v24 = vld [vmem:[#allocation16_spill] sm:$0xff] }
 0x305   : > { %v4051_v7 = vpop.permute.xlu2 %1209  ;;  %v1013_v5 = vadd.f32 %v981_v63, %v789_v48  ;;  %v5404_v63 = vld [vmem:[#allocation26_spill] sm:$0xff] }
 0x306   : > { %v1012_v35 = vadd.f32 %v980_v30, %v788_v20  ;;  %v1557_v20 = vmul.f32 %v3765_v11, %v5404_v63 }
 0x30b   : > { %2971 = vset.pattern.permute.xlu1 %v3309_v1 }
 0x30c   : > { %1369 = vperm.xlu2 %2963, %v3560_v22   ;;  %v1108_v22 = vmul.f32 %v3986_v53, %v3785_v2  ;;  %v1141_v2 = vadd.f32 %v1109_v21, %v1013_v5  ;;  %v5289_v21 = vperm.slane %v3921_v40, 7 }
 0x30d   : > { %v4055_v56 = vpop.permute.xlu2 %1217 }
 0x30e   : > { %5403 = vst [vmem:[#allocation87_spill] sm:$0xff] %v4055_v56  ;;  %v1140_v12 = vadd.f32 %v1108_v22, %v1012_v35  ;;  %v4089_v56 = vpop.permute.xlu1 %1789 }
 0x30f   : > { %5405 = vst [vmem:[#allocation26_spill] sm:$0xff] %v4089_v56 }
 0x313   : > { %1967 = vperm.xlu1 %2971, %v5284_v44  }
 0x314   : > { %1473 = vperm.xlu2 %2963, %v3569_v42   ;;  %v1556_v42 = vmul.f32 %v3765_v11, %v3614_v47 }
 0x315   : > { %v1230_v46 = vpop.permute.xlu2 %1229 }
 0x316   : > { %v1268_v48 = vmul.f32 %v1230_v46, %v3410_v54  ;;  %v1269_v30 = vmul.f32 %v1230_v46, %v3419_v14  ;;  %v4100_v22 = vpop.permute.xlu1 %1797 }
 0x317   : > { %5410 = vst [vmem:[#allocation90_spill] sm:$0xff] %v4100_v22  ;;  %v5433_v22 = vld [vmem:[#allocation31_spill] sm:$0xff] }
 0x318   : > { %v1300_v44 = vadd.f32 %v1268_v48, %v1140_v12  ;;  %v1301_v26 = vadd.f32 %v1269_v30, %v1141_v2  ;;  %v5290_v12 = vperm.slane %v3981_v28, 2  ;;  %v5418_v30 = vld [vmem:[#allocation36_spill] sm:$0xff]  ;;  %v958_v56 = vmul.f32 %v5433_v22, %v3598_v37 }
 0x31a   : > { %v1428_v51 = vadd.f32 %v1396_v52, %v1300_v44  ;;  %v1429_v27 = vadd.f32 %v1397_v18, %v1301_v26  ;;  %v5416_v18 = vld [vmem:[#allocation68_spill] sm:$0xff] }
 0x31b   : > { %2973 = vset.pattern.permute.xlu1 %v3316_v3  ;;  %v778_v52 = vmul.f32 %v3971_v50, %v5416_v18  ;;  %v779_v48 = vmul.f32 %v3975_v15, %v5416_v18  ;;  %v1259_v18 = vmul.f32 %v4051_v7, %v3419_v14 }
 0x31c   : > { %1481 = vperm.xlu2 %2963, %v5406_v24   ;;  %v4093_v5 = vadd.f32 %v1556_v42, %v1428_v51  ;;  %v4095_v35 = vadd.f32 %v1557_v20, %v1429_v27  ;;  %v5291_v27 = vperm.slane %v3981_v28, 1  ;;  %v970_v42 = vmul.f32 %v5418_v30, %v3598_v37 }
 0x31d   : > { %v4097_v46 = vpop.permute.xlu2 %1237  ;;  %v1098_v20 = vmul.f32 %v3986_v53, %v3949_v10  ;;  %v971_v24 = vmul.f32 %v5418_v30, %v3605_v43 }
 0x31e   : > { %5407 = vst [vmem:[#allocation16_spill] sm:$0xff] %v4093_v5  ;;  %v4109_v44 = vpop.permute.xlu1 %1805 }
 0x31f   : > { %5408 = vst [vmem:[#allocation88_spill] sm:$0xff] %v4095_v35 }
 0x320   : > { %5409 = vst [vmem:[#allocation89_spill] sm:$0xff] %v4097_v46  ;;  %v4237_v46 = vld [vmem:[%s3299_s14 + $0x30] sm:$0xff] }
 0x321   : > { %5412 = vst [vmem:[#allocation92_spill] sm:$0xff] %v4109_v44 }
 0x323   : > { %1986 = vperm.xlu1 %2973, %v5289_v21   ;;  %v1002_v21 = vadd.f32 %v970_v42, %v778_v52 }
 0x324   : > { %1489 = vperm.xlu2 %2963, %v3581_v31  }
 0x326   : > { %v4105_v11 = vpop.permute.xlu2 %1309  ;;  %v4119_v31 = vpop.permute.xlu1 %1813 }
 0x327   : > { %5411 = vst [vmem:[#allocation91_spill] sm:$0xff] %v4105_v11 }
 0x328   : > { %5414 = vst [vmem:[#allocation94_spill] sm:$0xff] %v4119_v31  ;;  %v1130_v31 = vadd.f32 %v1098_v20, %v1002_v21 }
 0x32b   : > { %2975 = vset.pattern.permute.xlu1 %v3309_v1 }
 0x32c   : > { %1497 = vperm.xlu2 %2963, %v3589_v33   ;;  %v5415_v33 = vld [vmem:[#allocation18_spill] sm:$0xff] }
 0x32e   : > { %v4111_v51 = vpop.permute.xlu2 %1317 }
 0x32f   : > { %5413 = vst [vmem:[#allocation93_spill] sm:$0xff] %v4111_v51 }
 0x333   : > { %2006 = vperm.xlu1 %2975, %v5291_v27   ;;  %v1003_v27 = vadd.f32 %v971_v24, %v779_v48  ;;  %v5294_v48 = vperm.slane %v3981_v28, 3  ;;  %v4151_v24 = vpop.permute.xlu0 %1895 }
 0x334   : > { %1505 = vperm.xlu2 %2963, %v3596_v36   ;;  %v4131_v36 = vpop.permute.xlu1 %1889  ;;  %5419 = vst [vmem:[#allocation68_spill] sm:$0xff] %v4151_v24 }
 0x335   : > { %5417 = vst [vmem:[#allocation18_spill] sm:$0xff] %v4131_v36  ;;  %v663_v36 = vld [vmem:[#allocation5 + $0x8] sm:$0xff] }
 0x336   : > { %v4117_v26 = vpop.permute.xlu2 %1321  ;;  %2877 = vmatmul.msk.f32.gmra.mxu2 %vm586_vm12, %v663_v36 }
 0x33b   : > { %2019 = vperm.xlu1 %2975, %v5290_v12   ;;  %v1258_v12 = vmul.f32 %v4051_v7, %v3410_v54 }
 0x33c   : > { %1513 = vperm.xlu2 %2963, %v5415_v33   ;;  %v1099_v33 = vmul.f32 %v3990_v32, %v3949_v10  ;;  %v4157_v21 = vpop.permute.xlu1 %1902 }
 0x33d   : > { %v1290_v35 = vadd.f32 %v1258_v12, %v1130_v31 }
 0x33e   : > { %v4127_v2 = vpop.permute.xlu2 %1329  ;;  %v1131_v30 = vadd.f32 %v1099_v33, %v1003_v27  ;;  %v5422_v27 = vld [vmem:[#allocation54_spill] sm:$0xff]  ;;  %v1106_v33 = vmul.f32 %v3986_v53, %v3963_v34 }
 0x33f   : > { %v786_v31 = vmul.f32 %v3971_v50, %v5422_v27 }
 0x340   : > { %v1291_v10 = vadd.f32 %v1259_v18, %v1131_v30  ;;  %v1107_v18 = vmul.f32 %v3990_v32, %v3963_v34  ;;  %v5295_v30 = vperm.slane %v3981_v28, 4 }
 0x343   : > { %2977 = vset.pattern.permute.xlu1 %v3316_v3 }
 0x344   : > { %1525 = vperm.xlu2 %2963, %v3608_v45   ;;  %v5421_v45 = vmov 3  }
 0x346   : > { %v1338_v5 = vpop.permute.xlu2 %1337 }
 0x347   : > { %v1386_v52 = vmul.f32 %v4074_v23, %v1338_v5  ;;  %v1387_v42 = vmul.f32 %v4079_v58, %v1338_v5  ;;  %v787_v5 = vmul.f32 %v3975_v15, %v5422_v27  ;;  %v4180_v27 = vpop.permute.xlu1 %1908 }
 0x349   : > { %v4153_v7 = vadd.f32 %v1386_v52, %v1290_v35  ;;  %v4155_v44 = vadd.f32 %v1387_v42, %v1291_v10  ;;  %v5423_v35 = vld [vmem:[#allocation39_spill] sm:$0xff]  ;;  %v4178_v42 = vpop.permute.xlu0 %1934 }
 0x34a   : > { %v978_v12 = vmul.f32 %v5423_v35, %v3598_v37  ;;  %v979_v20 = vmul.f32 %v5423_v35, %v3605_v43  ;;  %v5425_v35 = vld [vmem:[#allocation29_spill] sm:$0xff] }
 0x34b   : > { %5420 = vst [vmem:[#allocation36_spill] sm:$0xff] %v4155_v44  ;;  %2038 = vperm.xlu1 %2977, %v5294_v48   ;;  %v1266_v48 = vmul.f32 %v5425_v35, %v3410_v54  ;;  %v1267_v24 = vmul.f32 %v5425_v35, %v3419_v14  ;;  %v5431_v35 = vld [vmem:[#allocation15_spill] sm:$0xff] }
 0x34c   : > { %2964 = vset.pattern.permute.xlu2 %v5421_v45  ;;  %v1010_v10 = vadd.f32 %v978_v12, %v786_v31  ;;  %v1011_v52 = vadd.f32 %v979_v20, %v787_v5 }
 0x34d   : > { %1597 = vperm.xlu2 %2964, %v3617_v49  }
 0x34e   : > { %v4169_v36 = vpop.permute.xlu2 %1345  ;;  %v1138_v49 = vadd.f32 %v1106_v33, %v1010_v10  ;;  %v1139_v45 = vadd.f32 %v1107_v18, %v1011_v52  ;;  %v986_v10 = vmul.f32 %v3926_v25, %v3598_v37  ;;  %v987_v52 = vmul.f32 %v3926_v25, %v3605_v43 }
 0x34f   : > { %5424 = vst [vmem:[#allocation54_spill] sm:$0xff] %v4169_v36  ;;  %v5439_v36 = vld [vmem:[#allocation19_spill] sm:$0xff] }
 0x350   : > { %v1298_v31 = vadd.f32 %v1266_v48, %v1138_v49  ;;  %v1299_v5 = vadd.f32 %v1267_v24, %v1139_v45  ;;  %v5429_v48 = vld [vmem:[#allocation30_spill] sm:$0xff]  ;;  %v1114_v49 = vmul.f32 %v3986_v53, %v4009_v19  ;;  %v4206_v45 = vpop.permute.xlu1 %1921 }
 0x351   : > { %v794_v24 = vmul.f32 %v3971_v50, %v5429_v48  ;;  %5430 = vst [vmem:[#allocation30_spill] sm:$0xff] %v4206_v45  ;;  %v795_v25 = vmul.f32 %v3975_v15, %v5429_v48  ;;  %v1558_v48 = vmul.f32 %v3893_v0, %v3614_v47 }
 0x353   : > { %2051 = vperm.xlu1 %2977, %v5295_v30   ;;  %v1018_v30 = vadd.f32 %v986_v10, %v794_v24  ;;  %v1559_v10 = vmul.f32 %v3893_v0, %v5404_v63  ;;  %v1686_v0 = vmul.f32 %v4237_v46, %v4004_v29 }
 0x355   : > { %1605 = vperm.xlu2 %2964, %v3627_v59   ;;  %v4200_v59 = vpop.permute.xlu0 %1999  ;;  %v1146_v24 = vadd.f32 %v1114_v49, %v1018_v30  ;;  %v4242_v30 = vld [vmem:[%s3299_s14 + $0x38] sm:$0xff] }
 0x356   : > { %v1354_v34 = vpop.permute.xlu2 %1353  ;;  %5428 = vst [vmem:[#allocation95_spill] sm:$0xff] %v4200_v59 }
 0x357   : > { %v1394_v12 = vmul.f32 %v4074_v23, %v1354_v34  ;;  %v1395_v20 = vmul.f32 %v4079_v58, %v1354_v34  ;;  %v5432_v34 = vld [vmem:[#allocation24_spill] sm:$0xff] }
 0x359   : > { %v4191_v33 = vadd.f32 %v1394_v12, %v1298_v31  ;;  %v4193_v18 = vadd.f32 %v1395_v20, %v1299_v5  ;;  %v766_v31 = vmul.f32 %v3971_v50, %v5432_v34  ;;  %v767_v5 = vmul.f32 %v3975_v15, %v5432_v34 }
 0x35a   : > { %v1115_v12 = vmul.f32 %v3990_v32, %v4009_v19  ;;  %v959_v34 = vmul.f32 %v5433_v22, %v3605_v43  ;;  %v1019_v19 = vadd.f32 %v987_v52, %v795_v25  ;;  %v1086_v25 = vmul.f32 %v3986_v53, %v3932_v17 }
 0x35b   : > { %5426 = vst [vmem:[#allocation39_spill] sm:$0xff] %v4191_v33  ;;  %2979 = vset.pattern.permute.xlu1 %v3309_v1  ;;  %v990_v49 = vadd.f32 %v958_v56, %v766_v31  ;;  %v1087_v1 = vmul.f32 %v3990_v32, %v3932_v17  ;;  %v1247_v56 = vmul.f32 %v4023_v8, %v3419_v14 }
 0x35c   : > { %5427 = vst [vmem:[#allocation29_spill] sm:$0xff] %v4193_v18  ;;  %v5435_v18 = vld [vmem:[#allocation34_spill] sm:$0xff]  ;;  %v1147_v33 = vadd.f32 %v1115_v12, %v1019_v19 }
 0x35d   : > { %1613 = vperm.xlu2 %2964, %v5431_v35   ;;  %v5434_v35 = vld [vmem:[#allocation32_spill] sm:$0xff]  ;;  %v1374_v22 = vmul.f32 %v4074_v23, %v5435_v18  ;;  %v5437_v12 = vld [vmem:[#allocation46_spill] sm:$0xff] }
 0x35e   : > { %v1362_v20 = vpop.permute.xlu2 %1361  ;;  %v1274_v11 = vmul.f32 %v5434_v35, %v3410_v54  ;;  %v1275_v40 = vmul.f32 %v5434_v35, %v3419_v14  ;;  %v5438_v35 = vld [vmem:[#allocation58_spill] sm:$0xff] }
 0x35f   : > { %v1398_v59 = vmul.f32 %v4074_v23, %v1362_v20  ;;  %v1399_v45 = vmul.f32 %v4079_v58, %v1362_v20  ;;  %v1847_v19 = vmul.f32 %v5438_v35, %v5437_v12 }
 0x360   : > { %v1306_v44 = vadd.f32 %v1274_v11, %v1146_v24  ;;  %v5309_v24 = vperm.slane %v3981_v28, 7 }
 0x361   : > { %v1430_v51 = vadd.f32 %v1398_v59, %v4000_v6  ;;  %v1431_v20 = vadd.f32 %v1399_v45, %v4002_v4  ;;  %v1687_v4 = vmul.f32 %v4242_v30, %v4004_v29  ;;  %v5436_v59 = vperm.slane %v3981_v28, 6 }
 0x362   : > { %v991_v45 = vadd.f32 %v959_v34, %v767_v5  ;;  %v1307_v5 = vadd.f32 %v1275_v40, %v1147_v33  ;;  %v2065_v34 = vpop.permute.xlu0 %2064  ;;  %v1563_v40 = vmul.f32 %v3915_v57, %v5404_v63  ;;  %v1118_v33 = vadd.f32 %v1086_v25, %v990_v49 }
 0x363   : > { %v1590_v6 = vadd.f32 %v1558_v48, %v1430_v51  ;;  %v1591_v52 = vadd.f32 %v1559_v10, %v1431_v20  ;;  %2071 = vperm.xlu1 %2979, %v5436_v59   ;;  %v1246_v48 = vmul.f32 %v4023_v8, %v3410_v54  ;;  %v5306_v10 = vperm.slane %v4020_v16, 6  ;;  %v4262_v20 = vpop.permute.xlu1 %1928 }
 0x364   : > { %v1562_v8 = vmul.f32 %v3915_v57, %v3614_v47  ;;  %v1691_v57 = vmul.f32 %v4242_v30, %v4016_v55 }
 0x365   : > { %1621 = vperm.xlu2 %2964, %v5439_v36   ;;  %v1719_v29 = vadd.f32 %v1687_v4, %v1591_v52  ;;  %v4255_v51 = vadd.f32 %v1686_v0, %v1590_v6  ;;  %v1375_v0 = vmul.f32 %v4079_v58, %v5435_v18  ;;  %2334 = vperm.xlu0 %2981, %v5306_v10  }
 0x366   : > { %v1370_v31 = vpop.permute.xlu2 %1369  ;;  %v1119_v4 = vadd.f32 %v1087_v1, %v991_v45  ;;  %v1278_v49 = vadd.f32 %v1246_v48, %v1118_v33 }
 0x367   : > { %v1402_v17 = vmul.f32 %v4074_v23, %v1370_v31  ;;  %v1403_v11 = vmul.f32 %v4079_v58, %v1370_v31  ;;  %v1879_v36 = vadd.f32 %v1847_v19, %v1719_v29  ;;  %v5441_v19 = vld [vmem:[#allocation49_spill] sm:$0xff]  ;;  %v1690_v31 = vmul.f32 %v4237_v46, %v4016_v55 }
 0x368   : > { %v770_v29 = vmul.f32 %v3971_v50, %v5441_v19  ;;  %v771_v18 = vmul.f32 %v3975_v15, %v5441_v19  ;;  %v1279_v25 = vadd.f32 %v1247_v56, %v1119_v4  ;;  %v5443_v55 = vld [vmem:[#allocation21_spill] sm:$0xff] }
 0x369   : > { %v1434_v6 = vadd.f32 %v1402_v17, %v1306_v44  ;;  %v1435_v52 = vadd.f32 %v1403_v11, %v1307_v5  ;;  %v4275_v59 = vadd.f32 %v2065_v34, %v1879_v36  ;;  %v5442_v44 = vld [vmem:[#allocation33_spill] sm:$0xff]  ;;  %v1090_v34 = vmul.f32 %v3986_v53, %v3938_v60 }
 0x36a   : > { %v962_v45 = vmul.f32 %v5442_v44, %v3598_v37  ;;  %v963_v5 = vmul.f32 %v5442_v44, %v3605_v43  ;;  %v1091_v17 = vmul.f32 %v3990_v32, %v3938_v60  ;;  %v1407_v33 = vadd.f32 %v1375_v0, %v1279_v25  ;;  %v5445_v0 = vld [vmem:[#allocation27_spill] sm:$0xff] }
 0x36b   : > { %5440 = vst [vmem:[#allocation15_spill] sm:$0xff] %v4275_v59  ;;  %v1594_v10 = vadd.f32 %v1562_v8, %v1434_v6  ;;  %v1595_v1 = vadd.f32 %v1563_v40, %v1435_v52  ;;  %2084 = vperm.xlu1 %2979, %v5309_v24   ;;  %v1406_v40 = vadd.f32 %v1374_v22, %v1278_v49  ;;  %v2205_v22 = vld [vmem:[%s5201_s6 + $0x8] sm:$0xff]  ;;  %v5310_v24 = vperm.slane %v4020_v16, 3  ;;  %v5476_v59 = vld [vmem:[#allocation80_spill] sm:$0xff] }
 0x36c   : > { %v994_v11 = vadd.f32 %v962_v45, %v770_v29  ;;  %v995_v36 = vadd.f32 %v963_v5, %v771_v18  ;;  %v1662_v60 = vmul.f32 %v4237_v46, %v3928_v61  ;;  %v1250_v18 = vmul.f32 %v5445_v0, %v3410_v54 }
 0x36d   : > { %1629 = vperm.xlu2 %2964, %v5443_v55   ;;  %v4296_v48 = vadd.f32 %v1690_v31, %v1594_v10  ;;  %v4298_v56 = vadd.f32 %v1691_v57, %v1595_v1  ;;  %v1663_v10 = vmul.f32 %v4242_v30, %v3928_v61  ;;  %v4306_v31 = vpop.permute.xlu1 %1941  ;;  %v1251_v49 = vmul.f32 %v5445_v0, %v3419_v14  ;;  %v5446_v1 = vld [vmem:[#allocation43_spill] sm:$0xff] }
 0x36e   : > { %v1474_v8 = vpop.permute.xlu2 %1473  ;;  %v1122_v52 = vadd.f32 %v1090_v34, %v994_v11  ;;  %v1123_v19 = vadd.f32 %v1091_v17, %v995_v36  ;;  %5444 = vst [vmem:[#allocation24_spill] sm:$0xff] %v4306_v31  ;;  %v1378_v25 = vmul.f32 %v4074_v23, %v4117_v26  ;;  %v1379_v61 = vmul.f32 %v4079_v58, %v4117_v26  ;;  %v5448_v55 = vld [vmem:[#allocation51_spill] sm:$0xff] }
 0x36f   : > { %v1534_v4 = vmul.f32 %v1474_v8, %v3614_v47  ;;  %v1535_v6 = vmul.f32 %v1474_v8, %v5404_v63  ;;  %v1822_v44 = vmul.f32 %v4034_v9, %v5446_v1  ;;  %v1823_v45 = vmul.f32 %v4034_v9, %v5437_v12  ;;  %v5449_v26 = vld [vmem:[#allocation35_spill] sm:$0xff] }
 0x370   : > { %v5447_v17 = vmov 0   ;;  %v774_v11 = vmul.f32 %v3971_v50, %v5448_v55  ;;  %v775_v36 = vmul.f32 %v3975_v15, %v5448_v55  ;;  %v1282_v8 = vadd.f32 %v1250_v18, %v1122_v52 }
 0x371   : > { %v1566_v57 = vadd.f32 %v1534_v4, %v1406_v40  ;;  %v1567_v29 = vadd.f32 %v1535_v6, %v1407_v33  ;;  %v1283_v40 = vadd.f32 %v1251_v49, %v1123_v19  ;;  %v966_v33 = vmul.f32 %v5449_v26, %v3598_v37 }
 0x372   : > { %v967_v4 = vmul.f32 %v5449_v26, %v3605_v43  ;;  %v5453_v26 = vld [vmem:[#allocation48_spill] sm:$0xff]  ;;  %v1682_v31 = vmul.f32 %v4237_v46, %v5476_v59 }
 0x373   : > { %v1694_v5 = vadd.f32 %v1662_v60, %v1566_v57  ;;  %v1695_v34 = vadd.f32 %v1663_v10, %v1567_v29  ;;  %2982 = vset.pattern.permute.xlu1 %v5447_v17  ;;  %v5450_v60 = vld [vmem:[#allocation22_spill] sm:$0xff]  ;;  %v1094_v10 = vmul.f32 %v3986_v53, %v3944_v41  ;;  %v1095_v57 = vmul.f32 %v3990_v32, %v3944_v41 }
 0x374   : > { %2213 = vperm.xlu1 %2982, %v2205_v22   ;;  %v1410_v29 = vadd.f32 %v1378_v25, %v1282_v8  ;;  %v1411_v52 = vadd.f32 %v1379_v61, %v1283_v40  ;;  %v1255_v41 = vmul.f32 %v4043_v13, %v3419_v14  ;;  %v1666_v25 = vmul.f32 %v4237_v46, %v3934_v39 }
 0x375   : > { %v1854_v9 = vadd.f32 %v1822_v44, %v1694_v5  ;;  %v1855_v6 = vadd.f32 %v1823_v45, %v1695_v34  ;;  %1637 = vperm.xlu2 %2964, %v5450_v60   ;;  %v998_v44 = vadd.f32 %v966_v33, %v774_v11  ;;  %v999_v45 = vadd.f32 %v967_v4, %v775_v36  ;;  %v4357_v36 = vpop.permute.xlu1 %1947 }
 0x376   : > { %v1482_v19 = vpop.permute.xlu2 %1481  ;;  %v1254_v5 = vmul.f32 %v4043_v13, %v3410_v54  ;;  %v1667_v61 = vmul.f32 %v4242_v30, %v3934_v39  ;;  %v1383_v11 = vmul.f32 %v4079_v58, %v4127_v2  ;;  %v1826_v33 = vmul.f32 %v5453_v26, %v5446_v1 }
 0x377   : > { %v1538_v22 = vmul.f32 %v1482_v19, %v3614_v47  ;;  %v1539_v0 = vmul.f32 %v1482_v19, %v5404_v63  ;;  %v4340_v18 = vadd.f32 %v4180_v27, %v1855_v6  ;;  %v4343_v49 = vadd.f32 %v4157_v21, %v1854_v9 }
 0x378   : > { %v1126_v55 = vadd.f32 %v1094_v10, %v998_v44  ;;  %v1127_v8 = vadd.f32 %v1095_v57, %v999_v45  ;;  %v1382_v21 = vmul.f32 %v4074_v23, %v4127_v2  ;;  %v1827_v39 = vmul.f32 %v5453_v26, %v5437_v12  ;;  %v5454_v10 = vld [vmem:[#allocation20_spill] sm:$0xff] }
 0x379   : > { %5451 = vst [vmem:[#allocation31_spill] sm:$0xff] %v4340_v18  ;;  %v1570_v34 = vadd.f32 %v1538_v22, %v1410_v29  ;;  %v1571_v27 = vadd.f32 %v1539_v0, %v1411_v52  ;;  %v5308_v44 = vperm.slane %v4020_v16, 0  ;;  %v1670_v45 = vmul.f32 %v4237_v46, %v3940_v62 }
 0x37a   : > { %5452 = vst [vmem:[#allocation32_spill] sm:$0xff] %v4343_v49  ;;  %v1286_v4 = vadd.f32 %v1254_v5, %v1126_v55  ;;  %v1287_v9 = vadd.f32 %v1255_v41, %v1127_v8  ;;  %v1671_v5 = vmul.f32 %v4242_v30, %v3940_v62 }
 0x37b   : > { %v1698_v40 = vadd.f32 %v1666_v25, %v1570_v34  ;;  %v1699_v13 = vadd.f32 %v1667_v61, %v1571_v27  ;;  %v1830_v61 = vmul.f32 %v4059_v38, %v5446_v1 }
 0x37c   : > { %2984 = vset.pattern.permute.xlu1 %v3316_v3  ;;  %v1414_v57 = vadd.f32 %v1382_v21, %v1286_v4  ;;  %v1415_v2 = vadd.f32 %v1383_v11, %v1287_v9  ;;  %v5456_v11 = vld [vmem:[#allocation23_spill] sm:$0xff] }
 0x37d   : > { %v1858_v6 = vadd.f32 %v1826_v33, %v1698_v40  ;;  %v1859_v60 = vadd.f32 %v1827_v39, %v1699_v13  ;;  %1645 = vperm.xlu2 %2964, %v5454_v10   ;;  %v1961_v62 = vpop.permute.xlu1 %1960  ;;  %v5457_v13 = vld [vmem:[#allocation28_spill] sm:$0xff]  ;;  %v5458_v33 = vld [vmem:[#allocation78_spill] sm:$0xff] }
 0x37e   : > { %v1490_v29 = vpop.permute.xlu2 %1489  ;;  %v783_v26 = vmul.f32 %v3975_v15, %v5457_v13  ;;  %v1102_v39 = vmul.f32 %v3986_v53, %v5458_v33  ;;  %v1103_v4 = vmul.f32 %v3990_v32, %v5458_v33  ;;  %v5466_v33 = vld [vmem:[#allocation56_spill] sm:$0xff] }
 0x37f   : > { %v1542_v52 = vmul.f32 %v1490_v29, %v3614_v47  ;;  %v1543_v19 = vmul.f32 %v1490_v29, %v5404_v63  ;;  %v4368_v22 = vadd.f32 %v4262_v20, %v1858_v6  ;;  %v4371_v0 = vadd.f32 %v4178_v42, %v1859_v60  ;;  %v5455_v42 = vld [vmem:[#allocation38_spill] sm:$0xff]  ;;  %v5459_v29 = vld [vmem:[#allocation77_spill] sm:$0xff] }
 0x380   : > { %v1831_v20 = vmul.f32 %v4059_v38, %v5437_v12  ;;  %v974_v55 = vmul.f32 %v5455_v42, %v3598_v37  ;;  %v975_v8 = vmul.f32 %v5455_v42, %v3605_v43  ;;  %v782_v38 = vmul.f32 %v3971_v50, %v5457_v13  ;;  %v5462_v42 = vld [vmem:[#allocation54_spill] sm:$0xff] }
 0x381   : > { %v1574_v41 = vadd.f32 %v1542_v52, %v1414_v57  ;;  %v1575_v25 = vadd.f32 %v1543_v19, %v1415_v2  ;;  %v1674_v52 = vmul.f32 %v4237_v46, %v5459_v29  ;;  %v1675_v19 = vmul.f32 %v4242_v30, %v5459_v29 }
 0x382   : > { %v1006_v57 = vadd.f32 %v974_v55, %v782_v38  ;;  %v1007_v2 = vadd.f32 %v975_v8, %v783_v26  ;;  %v1390_v55 = vmul.f32 %v4074_v23, %v5462_v42  ;;  %v1391_v8 = vmul.f32 %v4079_v58, %v5462_v42 }
 0x383   : > { %v1703_v34 = vadd.f32 %v1671_v5, %v1575_v25  ;;  %v1702_v27 = vadd.f32 %v1670_v45, %v1574_v41  ;;  %v5460_v45 = vld [vmem:[#allocation87_spill] sm:$0xff] }
 0x384   : > { %2256 = vperm.xlu1 %2984, %v5308_v44   ;;  %v1262_v5 = vmul.f32 %v5460_v45, %v3410_v54  ;;  %v1263_v41 = vmul.f32 %v5460_v45, %v3419_v14  ;;  %v5307_v45 = vperm.slane %v4020_v16, 2 }
 0x385   : > { %v1863_v21 = vadd.f32 %v1831_v20, %v1703_v34  ;;  %1653 = vperm.xlu2 %2964, %v5456_v11   ;;  %v4389_v40 = vadd.f32 %v1830_v61, %v1702_v27  ;;  %v5461_v61 = vld [vmem:[#allocation36_spill] sm:$0xff]  ;;  %v1134_v34 = vadd.f32 %v1102_v39, %v1006_v57  ;;  %v1135_v27 = vadd.f32 %v1103_v4, %v1007_v2  ;;  %v4420_v26 = vpop.permute.xlu1 %1967 }
 0x386   : > { %v1498_v9 = vpop.permute.xlu2 %1497  ;;  %v5463_v11 = vld [vmem:[#allocation12_spill] sm:$0xff]  ;;  %5464 = vst [vmem:[#allocation34_spill] sm:$0xff] %v4420_v26  ;;  %v792_v39 = vmul.f32 %v3971_v50, %v5466_v33 }
 0x387   : > { %v1546_v6 = vmul.f32 %v1498_v9, %v3614_v47  ;;  %v1547_v60 = vmul.f32 %v1498_v9, %v5404_v63  ;;  %v4401_v10 = vadd.f32 %v1961_v62, %v1863_v21  ;;  %v1294_v13 = vadd.f32 %v1262_v5, %v1134_v34  ;;  %v5467_v2 = vld [vmem:[#allocation40_spill] sm:$0xff]  ;;  %v5468_v5 = vld [vmem:[#allocation79_spill] sm:$0xff]  ;;  %v5469_v34 = vld [vmem:[#allocation66_spill] sm:$0xff] }
 0x388   : > { %v1295_v38 = vadd.f32 %v1263_v41, %v1135_v27  ;;  %v984_v29 = vmul.f32 %v5467_v2, %v3598_v37  ;;  %v1678_v41 = vmul.f32 %v4237_v46, %v5468_v5  ;;  %v764_v27 = vmul.f32 %v3971_v50, %v5469_v34 }
 0x389   : > { %v1578_v25 = vadd.f32 %v1546_v6, %v4153_v7  ;;  %v1579_v20 = vadd.f32 %v1547_v60, %v5461_v61  ;;  %v5465_v7 = vld [vmem:[#allocation17_spill] sm:$0xff]  ;;  %v1422_v9 = vadd.f32 %v1390_v55, %v1294_v13  ;;  %v765_v42 = vmul.f32 %v3975_v15, %v5469_v34  ;;  %v5470_v55 = vld [vmem:[#allocation52_spill] sm:$0xff]  ;;  %v5471_v13 = vld [vmem:[#allocation50_spill] sm:$0xff] }
 0x38a   : > { %v1423_v6 = vadd.f32 %v1391_v8, %v1295_v38  ;;  %v1112_v8 = vmul.f32 %v3986_v53, %v5470_v55  ;;  %v1835_v38 = vmul.f32 %v5471_v13, %v5437_v12 }
 0x38b   : > { %v1707_v62 = vadd.f32 %v1675_v19, %v1579_v20  ;;  %v4417_v21 = vadd.f32 %v1674_v52, %v1578_v25  ;;  %v985_v52 = vmul.f32 %v5467_v2, %v3605_v43  ;;  %v793_v19 = vmul.f32 %v3975_v15, %v5466_v33 }
 0x38c   : > { %2985 = vset.pattern.permute.xlu1 %v5463_v11  ;;  %v1679_v25 = vmul.f32 %v4242_v30, %v5468_v5  ;;  %v1016_v33 = vadd.f32 %v984_v29, %v792_v39  ;;  %v5474_v29 = vld [vmem:[#allocation89_spill] sm:$0xff] }
 0x38d   : > { %1781 = vperm.xlu2 %2964, %v5465_v7   ;;  %v1113_v7 = vmul.f32 %v3990_v32, %v5470_v55  ;;  %v1867_v5 = vadd.f32 %v1835_v38, %v1707_v62  ;;  %v5473_v55 = vld [vmem:[#allocation41_spill] sm:$0xff] }
 0x38e   : > { %v1506_v4 = vpop.permute.xlu2 %1505  ;;  %v1084_v39 = vmul.f32 %v3986_v53, %v5473_v55 }
 0x38f   : > { %v1550_v60 = vmul.f32 %v1506_v4, %v3614_v47  ;;  %v1551_v57 = vmul.f32 %v1506_v4, %v5404_v63 }
 0x391   : > { %v1582_v61 = vadd.f32 %v1550_v60, %v1422_v9  ;;  %v1583_v20 = vadd.f32 %v1551_v57, %v1423_v6  ;;  %v1017_v6 = vadd.f32 %v985_v52, %v793_v19  ;;  %v5472_v60 = vld [vmem:[#allocation59_spill] sm:$0xff]  ;;  %v1273_v52 = vmul.f32 %v5474_v29, %v3419_v14 }
 0x392   : > { %v956_v57 = vmul.f32 %v5472_v60, %v3598_v37  ;;  %v957_v2 = vmul.f32 %v5472_v60, %v3605_v43 }
 0x393   : > { %v4448_v4 = vadd.f32 %v1678_v41, %v1582_v61  ;;  %v4450_v9 = vadd.f32 %v1679_v25, %v1583_v20  ;;  %v1272_v41 = vmul.f32 %v5474_v29, %v3410_v54  ;;  %v1085_v61 = vmul.f32 %v3990_v32, %v5473_v55 }
 0x394   : > { %2276 = vperm.xlu1 %2985, %v5307_v45   ;;  %v1144_v20 = vadd.f32 %v1112_v8, %v1016_v33  ;;  %v988_v60 = vadd.f32 %v956_v57, %v764_v27  ;;  %v989_v45 = vadd.f32 %v957_v2, %v765_v42  ;;  %v1145_v44 = vadd.f32 %v1113_v7, %v1017_v6  ;;  %v5479_v8 = vld [vmem:[#allocation45_spill] sm:$0xff] }
 0x395   : > { %v1987_v34 = vpop.permute.xlu1 %1986  ;;  %2972 = vset.pattern.permute.xlu2 %v3316_v3  ;;  %v1400_v33 = vmul.f32 %v4074_v23, %v5479_v8  ;;  %v1401_v27 = vmul.f32 %v4079_v58, %v5479_v8 }
 0x396   : > { %v4465_v19 = vadd.f32 %v1987_v34, %v1867_v5  ;;  %v1514_v25 = vpop.permute.xlu2 %1513  ;;  %v1683_v5 = vmul.f32 %v4242_v30, %v5476_v59  ;;  %v5477_v34 = vld [vmem:[#allocation39_spill] sm:$0xff]  ;;  %v1304_v42 = vadd.f32 %v1272_v41, %v1144_v20  ;;  %v1305_v7 = vadd.f32 %v1273_v52, %v1145_v44  ;;  %v5484_v44 = vld [vmem:[#allocation62_spill] sm:$0xff] }
 0x397   : > { %v1554_v62 = vmul.f32 %v1514_v25, %v3614_v47  ;;  %v1555_v38 = vmul.f32 %v1514_v25, %v5404_v63  ;;  %v1116_v59 = vadd.f32 %v1084_v39, %v988_v60  ;;  %v1117_v2 = vadd.f32 %v1085_v61, %v989_v45  ;;  %v5481_v25 = vld [vmem:[#allocation81_spill] sm:$0xff]  ;;  %v5485_v39 = vld [vmem:[#allocation91_spill] sm:$0xff] }
 0x398   : > { %5475 = vst [vmem:[#allocation46_spill] sm:$0xff] %v4465_v19  ;;  %v5478_v19 = vld [vmem:[#allocation29_spill] sm:$0xff]  ;;  %v960_v41 = vmul.f32 %v5484_v44, %v3598_v37  ;;  %v1432_v20 = vadd.f32 %v1400_v33, %v1304_v42  ;;  %v1372_v45 = vmul.f32 %v4074_v23, %v5485_v39  ;;  %v1373_v61 = vmul.f32 %v4079_v58, %v5485_v39 }
 0x399   : > { %v1586_v29 = vadd.f32 %v1554_v62, %v5477_v34  ;;  %v1587_v55 = vadd.f32 %v1555_v38, %v5478_v19  ;;  %v1244_v19 = vmul.f32 %v5481_v25, %v3410_v54  ;;  %v1245_v62 = vmul.f32 %v5481_v25, %v3419_v14  ;;  %v5482_v38 = vld [vmem:[#allocation76_spill] sm:$0xff]  ;;  %v5487_v42 = vld [vmem:[#allocation25_spill] sm:$0xff] }
 0x39a   : > { %v5483_v34 = vperm.slane %v5482_v38, 6 }
 0x39b   : > { %v4482_v6 = vadd.f32 %v1683_v5, %v1587_v55  ;;  %v4484_v57 = vadd.f32 %v1682_v31, %v1586_v29  ;;  %v961_v31 = vmul.f32 %v5484_v44, %v3605_v43  ;;  %v1433_v5 = vadd.f32 %v1401_v27, %v1305_v7  ;;  %v5486_v55 = vld [vmem:[#allocation47_spill] sm:$0xff] }
 0x39c   : > { %2289 = vperm.xlu1 %2985, %v5310_v24   ;;  %v768_v8 = vmul.f32 %v3971_v50, %v5486_v55  ;;  %v769_v25 = vmul.f32 %v3975_v15, %v5486_v55  ;;  %v1277_v44 = vadd.f32 %v1245_v62, %v1117_v2  ;;  %v772_v7 = vmul.f32 %v3971_v50, %v5487_v42  ;;  %v5488_v24 = vld [vmem:[#allocation53_spill] sm:$0xff]  ;;  %v5489_v55 = vld [vmem:[#allocation42_spill] sm:$0xff] }
 0x39d   : > { %5480 = vst [vmem:[#allocation58_spill] sm:$0xff] %v4484_v57  ;;  %1973 = vperm.xlu2 %2972, %v5483_v34   ;;  %v1276_v34 = vadd.f32 %v1244_v19, %v1116_v59  ;;  %v1838_v26 = vmul.f32 %v5488_v24, %v5446_v1  ;;  %v1088_v59 = vmul.f32 %v3986_v53, %v5489_v55  ;;  %v5490_v19 = vld [vmem:[#allocation57_spill] sm:$0xff] }
 0x39e   : > { %v1526_v52 = vpop.permute.xlu2 %1525  ;;  %v992_v39 = vadd.f32 %v960_v41, %v768_v8  ;;  %v993_v49 = vadd.f32 %v961_v31, %v769_v25  ;;  %v1405_v57 = vadd.f32 %v1373_v61, %v1277_v44  ;;  %v1089_v2 = vmul.f32 %v3990_v32, %v5489_v55 }
 0x39f   : > { %v1560_v60 = vmul.f32 %v1526_v52, %v3614_v47  ;;  %v1561_v29 = vmul.f32 %v1526_v52, %v5404_v63  ;;  %v773_v52 = vmul.f32 %v3975_v15, %v5487_v42  ;;  %v1404_v18 = vadd.f32 %v1372_v45, %v1276_v34  ;;  %v5491_v15 = vld [vmem:[#allocation64_spill] sm:$0xff] }
 0x3a0   : > { %v1532_v62 = vmul.f32 %v5490_v19, %v3614_v47  ;;  %v1870_v50 = vadd.f32 %v1838_v26, %v4448_v4  ;;  %v1533_v41 = vmul.f32 %v5490_v19, %v5404_v63  ;;  %v964_v31 = vmul.f32 %v5491_v15, %v3598_v37  ;;  %v5494_v37 = vld [vmem:[#allocation93_spill] sm:$0xff] }
 0x3a1   : > { %v4508_v33 = vadd.f32 %v1560_v60, %v1432_v20  ;;  %v4510_v27 = vadd.f32 %v1561_v29, %v1433_v5  ;;  %v965_v20 = vmul.f32 %v5491_v15, %v3605_v43  ;;  %v5492_v5 = vld [vmem:[#allocation83_spill] sm:$0xff]  ;;  %v5493_v60 = vld [vmem:[#allocation44_spill] sm:$0xff]  ;;  %v1120_v8 = vadd.f32 %v1088_v59, %v992_v39 }
 0x3a2   : > { %v1248_v45 = vmul.f32 %v5492_v5, %v3410_v54  ;;  %v1092_v29 = vmul.f32 %v3986_v53, %v5493_v60  ;;  %v1249_v26 = vmul.f32 %v5492_v5, %v3419_v14  ;;  %v1121_v25 = vadd.f32 %v1089_v2, %v993_v49 }
 0x3a3   : > { %v1376_v34 = vmul.f32 %v4074_v23, %v5494_v37  ;;  %v1564_v44 = vadd.f32 %v1532_v62, %v1404_v18  ;;  %v1565_v42 = vadd.f32 %v1533_v41, %v1405_v57  ;;  %v1377_v55 = vmul.f32 %v4079_v58, %v5494_v37 }
 0x3a4   : > { %2987 = vset.pattern.permute.xlu1 %v3316_v3  ;;  %v2297_v39 = vperm.slane %v4020_v16, 4  ;;  %v996_v59 = vadd.f32 %v964_v31, %v772_v7  ;;  %v997_v15 = vadd.f32 %v965_v20, %v773_v52  ;;  %v1280_v2 = vadd.f32 %v1248_v45, %v1120_v8  ;;  %v5497_v8 = vld [vmem:[#allocation60_spill] sm:$0xff] }
 0x3a5   : > { %v2007_v61 = vpop.permute.xlu1 %2006  ;;  %2974 = vset.pattern.permute.xlu2 %v5463_v11  ;;  %v1281_v18 = vadd.f32 %v1249_v26, %v1121_v25  ;;  %v1093_v41 = vmul.f32 %v3990_v32, %v5493_v60  ;;  %v1536_v26 = vmul.f32 %v5497_v8, %v3614_v47  ;;  %v5498_v60 = vperm.slane %v3981_v28, 0 }
 0x3a6   : > { %v4539_v4 = vadd.f32 %v2007_v61, %v1870_v50  ;;  %v5495_v50 = vld [vmem:[#allocation82_spill] sm:$0xff]  ;;  %v5496_v61 = vld [vmem:[#allocation84_spill] sm:$0xff]  ;;  %v1408_v52 = vadd.f32 %v1376_v34, %v1280_v2  ;;  %v1124_v25 = vadd.f32 %v1092_v29, %v996_v59  ;;  %v1537_v34 = vmul.f32 %v5497_v8, %v5404_v63 }
 0x3a7   : > { %v1598_v43 = vpop.permute.xlu2 %1597  ;;  %v1820_v49 = vmul.f32 %v5495_v50, %v5446_v1  ;;  %v1821_v5 = vmul.f32 %v5495_v50, %v5437_v12  ;;  %v1252_v37 = vmul.f32 %v5496_v61, %v3410_v54  ;;  %v1253_v7 = vmul.f32 %v5496_v61, %v3419_v14  ;;  %v5499_v54 = vld [vmem:[#allocation37_spill] sm:$0xff]  ;;  %v5501_v61 = vld [vmem:[#allocation63_spill] sm:$0xff] }
 0x3a8   : > { %v1660_v19 = vmul.f32 %v4237_v46, %v1598_v43  ;;  %v1661_v53 = vmul.f32 %v4242_v30, %v1598_v43  ;;  %v1409_v31 = vadd.f32 %v1377_v55, %v1281_v18  ;;  %v1125_v32 = vadd.f32 %v1093_v41, %v997_v15  ;;  %v5500_v50 = vld [vmem:[#allocation85_spill] sm:$0xff] }
 0x3a9   : > { %v1380_v14 = vmul.f32 %v4074_v23, %v5499_v54  ;;  %v1381_v43 = vmul.f32 %v4079_v58, %v5499_v54  ;;  %v2310_v15 = vperm.slane %v4020_v16, 5  ;;  %v1824_v23 = vmul.f32 %v5500_v50, %v5446_v1  ;;  %v5503_v54 = vld [vmem:[#allocation86_spill] sm:$0xff] }
 0x3aa   : > { %v1692_v57 = vadd.f32 %v1660_v19, %v1564_v44  ;;  %v1693_v62 = vadd.f32 %v1661_v53, %v1565_v42  ;;  %v1284_v44 = vadd.f32 %v1252_v37, %v1124_v25  ;;  %v1285_v42 = vadd.f32 %v1253_v7, %v1125_v32  ;;  %v5502_v32 = vld [vmem:[#allocation55_spill] sm:$0xff] }
 0x3ab   : > { %v1568_v19 = vadd.f32 %v1536_v26, %v1408_v52  ;;  %v1569_v53 = vadd.f32 %v1537_v34, %v1409_v31  ;;  %v1540_v37 = vmul.f32 %v5501_v61, %v3614_v47  ;;  %v1541_v7 = vmul.f32 %v5501_v61, %v5404_v63 }
 0x3ac   : > { %v4558_v20 = vadd.f32 %v1820_v49, %v1692_v57  ;;  %v4560_v45 = vadd.f32 %v1821_v5, %v1693_v62  ;;  %2308 = vperm.xlu1 %2987, %v2297_v39   ;;  %v1825_v49 = vmul.f32 %v5500_v50, %v5437_v12  ;;  %v1412_v18 = vadd.f32 %v1380_v14, %v1284_v44 }
 0x3ad   : > { %1993 = vperm.xlu2 %2974, %v5498_v60   ;;  %v4581_v58 = vpop.permute.xlu1 %2019  ;;  %v1413_v57 = vadd.f32 %v1381_v43, %v1285_v42  ;;  %v1843_v60 = vmul.f32 %v5502_v32, %v5437_v12  ;;  %v1828_v14 = vmul.f32 %v5503_v54, %v5446_v1  ;;  %v1829_v34 = vmul.f32 %v5503_v54, %v5437_v12  ;;  %v5504_v42 = vld [vmem:[#allocation65_spill] sm:$0xff] }
 0x3ae   : > { %v1572_v31 = vadd.f32 %v1540_v37, %v1412_v18 }
 0x3af   : > { %v1606_v55 = vpop.permute.xlu2 %1605  ;;  %v1573_v8 = vadd.f32 %v1541_v7, %v1413_v57  ;;  %v5507_v57 = vld [vmem:[#allocation71_spill] sm:$0xff] }
 0x3b0   : > { %v1664_v29 = vmul.f32 %v4237_v46, %v1606_v55  ;;  %v1665_v59 = vmul.f32 %v4242_v30, %v1606_v55  ;;  %v1544_v55 = vmul.f32 %v5504_v42, %v3614_v47 }
 0x3b2   : > { %v1696_v2 = vadd.f32 %v1664_v29, %v1568_v19  ;;  %v1697_v5 = vadd.f32 %v1665_v59, %v1569_v53  ;;  %v1545_v19 = vmul.f32 %v5504_v42, %v5404_v63  ;;  %v1875_v59 = vadd.f32 %v1843_v60, %v4482_v6 }
 0x3b3   : > { %v5509_v60 = vperm.slane %v3981_v28, 2 }
 0x3b4   : > { %v4583_v62 = vadd.f32 %v1825_v49, %v1697_v5  ;;  %2321 = vperm.xlu1 %2987, %v2310_v15   ;;  %v4587_v41 = vadd.f32 %v1824_v23, %v1696_v2  ;;  %v5505_v23 = vperm.slane %v3981_v28, 1  ;;  %v5506_v5 = vld [vmem:[#allocation70_spill] sm:$0xff]  ;;  %v1577_v61 = vadd.f32 %v1545_v19, %v5507_v57 }
 0x3b5   : > { %2976 = vset.pattern.permute.xlu2 %v3316_v3  ;;  %v1576_v18 = vadd.f32 %v1544_v55, %v5506_v5  ;;  %v5512_v19 = vld [vmem:[#allocation26_spill] sm:$0xff] }
 0x3b7   : > { %v1614_v52 = vpop.permute.xlu2 %1613 }
 0x3b8   : > { %v1668_v26 = vmul.f32 %v4237_v46, %v1614_v52  ;;  %v1669_v25 = vmul.f32 %v4242_v30, %v1614_v52  ;;  %v2336_v52 = vperm.slane %v4020_v16, 7 }
 0x3ba   : > { %v1700_v43 = vadd.f32 %v1668_v26, %v1572_v31  ;;  %v1701_v44 = vadd.f32 %v1669_v25, %v1573_v8  ;;  %v5508_v8 = vld [vmem:[#allocation67_spill] sm:$0xff] }
 0x3bb   : > { %v1548_v26 = vmul.f32 %v5508_v8, %v3614_v47  ;;  %v1549_v25 = vmul.f32 %v5508_v8, %v5404_v63 }
 0x3bc   : > { %v4606_v53 = vadd.f32 %v1828_v14, %v1700_v43  ;;  %v4608_v29 = vadd.f32 %v1829_v34, %v1701_v44  ;;  %2989 = vset.pattern.permute.xlu1 %v5463_v11  ;;  %v5510_v14 = vld [vmem:[#allocation72_spill] sm:$0xff]  ;;  %v5511_v43 = vld [vmem:[#allocation73_spill] sm:$0xff] }
 0x3bd   : > { %v2039_v50 = vpop.permute.xlu1 %2038  ;;  %2012 = vperm.xlu2 %2976, %v5505_v23   ;;  %v1580_v34 = vadd.f32 %v1548_v26, %v5510_v14  ;;  %v1581_v44 = vadd.f32 %v1549_v25, %v5511_v43  ;;  %v5514_v26 = vld [vmem:[#allocation74_spill] sm:$0xff] }
 0x3be   : > { %v4614_v49 = vadd.f32 %v2039_v50, %v1875_v59  ;;  %v1836_v59 = vmul.f32 %v5512_v19, %v5446_v1  ;;  %v1837_v50 = vmul.f32 %v5512_v19, %v5437_v12 }
 0x3bf   : > { %v1622_v2 = vpop.permute.xlu2 %1621 }
 0x3c0   : > { %v1672_v37 = vmul.f32 %v4237_v46, %v1622_v2  ;;  %v1673_v7 = vmul.f32 %v4242_v30, %v1622_v2 }
 0x3c2   : > { %v4621_v6 = vadd.f32 %v1672_v37, %v1576_v18  ;;  %v4623_v31 = vadd.f32 %v1673_v7, %v1577_v61  ;;  %v5513_v18 = vld [vmem:[#allocation69_spill] sm:$0xff] }
 0x3c3   : > { %v1552_v57 = vmul.f32 %v5513_v18, %v3614_v47  ;;  %v1553_v61 = vmul.f32 %v5513_v18, %v5404_v63  ;;  %v5516_v47 = vld [vmem:[#allocation90_spill] sm:$0xff] }
 0x3c4   : > { %2341 = vperm.xlu1 %2989, %v2336_v52   ;;  %v1840_v43 = vmul.f32 %v5516_v47, %v5446_v1  ;;  %v1841_v63 = vmul.f32 %v5516_v47, %v5437_v12 }
 0x3c5   : > { %2025 = vperm.xlu2 %2976, %v5509_v60   ;;  %v2052_v5 = vpop.permute.xlu1 %2051  ;;  %v1584_v25 = vadd.f32 %v1552_v57, %v5514_v26  ;;  %v5515_v60 = vld [vmem:[#allocation75_spill] sm:$0xff]  ;;  %v5519_v26 = vld [vmem:[#allocation92_spill] sm:$0xff] }
 0x3c7   : > { %v1630_v54 = vpop.permute.xlu2 %1629 }
 0x3c8   : > { %v1676_v42 = vmul.f32 %v4237_v46, %v1630_v54  ;;  %v1677_v55 = vmul.f32 %v4242_v30, %v1630_v54  ;;  %v1585_v54 = vadd.f32 %v1553_v61, %v5515_v60  ;;  %v5518_v61 = vld [vmem:[#allocation61_spill] sm:$0xff]  ;;  %v1845_v60 = vmul.f32 %v5519_v26, %v5437_v12 }
 0x3ca   : > { %v1708_v23 = vadd.f32 %v1676_v42, %v1580_v34  ;;  %v1709_v2 = vadd.f32 %v1677_v55, %v1581_v44 }
 0x3cc   : > { %v4645_v37 = vadd.f32 %v1837_v50, %v1709_v2  ;;  %v4647_v7 = vadd.f32 %v1836_v59, %v1708_v23  ;;  %v5517_v50 = vperm.slane %v3981_v28, 4 }
 0x3cd   : > { %2978 = vset.pattern.permute.xlu2 %v5463_v11 }
 0x3cf   : > { %v1638_v8 = vpop.permute.xlu2 %1637 }
 0x3d0   : > { %v1680_v14 = vmul.f32 %v4237_v46, %v1638_v8  ;;  %v1681_v34 = vmul.f32 %v4242_v30, %v1638_v8  ;;  %v1850_v8 = vmul.f32 %v5518_v61, %v5446_v1 }
 0x3d2   : > { %v1712_v44 = vadd.f32 %v1680_v14, %v1584_v25  ;;  %v1713_v42 = vadd.f32 %v1681_v34, %v1585_v54  ;;  %v1844_v25 = vmul.f32 %v5519_v26, %v5446_v1  ;;  %v5520_v54 = vld [vmem:[#allocation16_spill] sm:$0xff] }
 0x3d3   : > { %v5521_v34 = vld [vmem:[#allocation88_spill] sm:$0xff] }
 0x3d4   : > { %v1872_v55 = vadd.f32 %v1840_v43, %v1712_v44  ;;  %v4658_v19 = vadd.f32 %v1841_v63, %v1713_v42  ;;  %v1882_v43 = vadd.f32 %v1850_v8, %v4296_v48  ;;  %v5522_v42 = vperm.slane %v3981_v28, 5 }
 0x3d5   : > { %v2072_v59 = vpop.permute.xlu1 %2071  ;;  %2045 = vperm.xlu2 %2978, %v5517_v50  }
 0x3d6   : > { %v4663_v23 = vadd.f32 %v4581_v58, %v1872_v55 }
 0x3d7   : > { %v1646_v2 = vpop.permute.xlu2 %1645 }
 0x3d8   : > { %v1684_v18 = vmul.f32 %v4237_v46, %v1646_v2  ;;  %v1685_v57 = vmul.f32 %v4242_v30, %v1646_v2 }
 0x3da   : > { %v1716_v14 = vadd.f32 %v1684_v18, %v5520_v54  ;;  %v1717_v47 = vadd.f32 %v1685_v57, %v5521_v34  ;;  %v5523_v57 = vld [vmem:[#allocation94_spill] sm:$0xff] }
 0x3db   : > { %v1849_v48 = vmul.f32 %v5523_v57, %v5437_v12 }
 0x3dc   : > { %v1877_v58 = vadd.f32 %v1845_v60, %v1717_v47  ;;  %v4676_v63 = vadd.f32 %v1844_v25, %v1716_v14  ;;  %v1848_v60 = vmul.f32 %v5523_v57, %v5446_v1  ;;  %v2242_v14 = vpop.f32.mrf.mxu2 }
 0x3dd   : > { %v2085_v44 = vpop.permute.xlu1 %2084  ;;  %2058 = vperm.xlu2 %2978, %v5522_v42  }
 0x3de   : > { %v4680_v55 = vadd.f32 %v2085_v44, %v1882_v43  ;;  %v4682_v50 = vadd.f32 %v2052_v5, %v1877_v58 }
 0x3df   : > { %v1654_v2 = vpop.permute.xlu2 %1653 }
 0x3e0   : > { %v1688_v26 = vmul.f32 %v4237_v46, %v1654_v2  ;;  %v1689_v18 = vmul.f32 %v4242_v30, %v1654_v2  ;;  %v4713_v2 = vpop.f32.mrf.mxu1 }
 0x3e2   : > { %v1720_v8 = vadd.f32 %v1688_v26, %v4508_v33  ;;  %v1721_v25 = vadd.f32 %v1689_v18, %v4510_v27  ;;  %v5525_v26 = vld [vmem:[#allocation68_spill] sm:$0xff]  ;;  %v5526_v18 = vperm.slane %v3981_v28, 7 }
 0x3e4   : > { %v1880_v54 = vadd.f32 %v1848_v60, %v1720_v8  ;;  %v4692_v34 = vadd.f32 %v1849_v48, %v1721_v25  ;;  %v5527_v48 = vld [vmem:[#allocation14_spill] sm:$0xff] }
 0x3e5   : > { %2980 = vset.pattern.permute.xlu2 %v3316_v3 }
 0x3e6   : > { %v2214_v5 = vpop.permute.xlu1 %2213  ;;  %v4695_v46 = vadd.f32 %v2072_v59, %v1880_v54  ;;  %v5524_v59 = vperm.slane %v3981_v28, 6 }
 0x3e7   : > { %v4697_v30 = vadd.f32 %v2242_v14, %v2214_v5  ;;  %v1782_v47 = vpop.permute.xlu2 %1781 }
 0x3e8   : > { %v1832_v58 = vmul.f32 %v1782_v47, %v5446_v1  ;;  %v1833_v43 = vmul.f32 %v1782_v47, %v5437_v12  ;;  %v5528_v47 = vperm.slane %v5482_v38, 2 }
 0x3e9   : > { %v2388_v33 = vperm.slane %v4697_v30, 3  ;;  %v2349_v27 = vperm.slane %v4697_v30, 0  ;;  %v2362_v54 = vperm.slane %v4697_v30, 1 }
 0x3ea   : > { %v4704_v44 = vadd.f32 %v1832_v58, %v4621_v6  ;;  %v1865_v42 = vadd.f32 %v1833_v43, %v4623_v31  ;;  %v2140_v6 = vperm.slane %v4713_v2, 0  ;;  %v2093_v31 = vadd.f32 %v5525_v26, %v4560_v45 }
 0x3eb   : > { %2399 = vperm.xlu0 %2981, %v2388_v33   ;;  %2354 = vperm.xlu1 %2989, %v2349_v27   ;;  %v2375_v45 = vperm.slane %v4697_v30, 2  ;;  %v5529_v58 = vperm.slane %v5482_v38, 5  ;;  %v5530_v43 = vperm.slane %v4020_v16, 0  ;;  %v2128_v26 = vrot.slane %v4713_v2, 3 }
 0x3ec   : > { %v2173_v60 = vadd.f32 %v2140_v6, %v2093_v31 }
 0x3ed   : > { %2077 = vperm.xlu2 %2980, %v5524_v59  }
 0x3f3   : > { %2993 = vset.pattern.permute.xlu0 %v5463_v11  ;;  %2991 = vset.pattern.permute.xlu1 %v3316_v3 }
 0x3f5   : > { %2090 = vperm.xlu2 %2980, %v5526_v18   ;;  %v5531_v18 = vperm.slane %v5482_v38, 7  ;;  %v5534_v38 = vperm.slane %v3981_v28, 3  ;;  %v2101_v28 = vadd.f32 %v4357_v36, %v4608_v29  ;;  %v5536_v29 = vperm.slane %v4020_v16, 3 }
 0x3f6   : > { %v2257_v57 = vpop.permute.xlu1 %2256 }
 0x3f7   : > { %v2454_v8 = vmul.f32 %v5527_v48, %v2257_v57  ;;  %v1974_v25 = vpop.permute.xlu2 %1973  ;;  %v4749_v57 = vperm.slane %v2128_v26, 0 }
 0x3f8   : > { %v4726_v14 = vadd.f32 %v1974_v25, %v1865_v42 }
 0x3f9   : > { %v4728_v5 = vadd.f32 %v2454_v8, %v2173_v60  ;;  %v5532_v60 = vperm.slane %v4020_v16, 1  ;;  %v2178_v25 = vadd.f32 %v4749_v57, %v4368_v22 }
 0x3fb   : > { %1915 = vperm.xlu0 %2993, %v5528_v47   ;;  %2373 = vperm.xlu1 %2991, %v2362_v54   ;;  %v5533_v47 = vld [vmem:[#allocation13_spill] sm:$0xff] }
 0x3fd   : > { %2983 = vset.pattern.permute.xlu2 %v5463_v11 }
 0x403   : > { %1954 = vperm.xlu0 %2993, %v5529_v58   ;;  %2386 = vperm.xlu1 %2991, %v2375_v45  }
 0x405   : > { %2250 = vperm.xlu2 %2983, %v5530_v43   ;;  %v5313_v43 = vperm.slane %v4697_v30, 4 }
 0x406   : > { %v4740_v42 = vpop.permute.xlu1 %2276 }
 0x407   : > { %v1994_v59 = vpop.permute.xlu2 %1993 }
 0x408   : > { %v4744_v31 = vadd.f32 %v1994_v59, %v4647_v7  ;;  %v1839_v59 = vmul.f32 %v5488_v24, %v5437_v12 }
 0x40a   : > { %v1871_v26 = vadd.f32 %v1839_v59, %v4450_v9  ;;  %v5535_v9 = vperm.slane %v4020_v16, 2 }
 0x40b   : > { %1980 = vperm.xlu0 %2993, %v5531_v18   ;;  %2994 = vset.pattern.permute.xlu1 %v5463_v11  ;;  %v5312_v18 = vperm.slane %v4697_v30, 5 }
 0x40d   : > { %2263 = vperm.xlu2 %2983, %v5532_v60   ;;  %v2129_v60 = vrot.slane %v4713_v2, 4 }
 0x40e   : > { %v2290_v8 = vpop.permute.xlu1 %2289 }
 0x40f   : > { %v2459_v58 = vmul.f32 %v5533_v47, %v2290_v8  ;;  %v4777_v24 = vperm.slane %v2129_v60, 0 }
 0x411   : > { %v4757_v7 = vadd.f32 %v2459_v58, %v2178_v25  ;;  %v2181_v58 = vadd.f32 %v4777_v24, %v2101_v28 }
 0x413   : > { %2032 = vperm.xlu0 %2993, %v5534_v38   ;;  %2406 = vperm.xlu1 %2994, %v5313_v43  }
 0x415   : > { %2986 = vset.pattern.permute.xlu2 %v3316_v3 }
 0x417   : > { %v2013_v22 = vpop.permute.xlu2 %2012 }
 0x418   : > { %v4769_v8 = vadd.f32 %v2013_v22, %v1871_v26  ;;  %v2130_v26 = vrot.slane %v4713_v2, 5 }
 0x41a   : > { %v4790_v36 = vperm.slane %v2130_v26, 0 }
 0x41b   : > { %2302 = vperm.xlu0 %2993, %v2297_v39   ;;  %2419 = vperm.xlu1 %2994, %v5312_v18  }
 0x41c   : > { %v2183_v28 = vadd.f32 %v4790_v36, %v4401_v10  ;;  %v5311_v10 = vperm.slane %v4697_v30, 7 }
 0x41d   : > { %2282 = vperm.xlu2 %2986, %v5535_v9  }
 0x41e   : > { %v2309_v25 = vpop.permute.xlu1 %2308 }
 0x41f   : > { %v2462_v38 = vmul.f32 %v5527_v48, %v2309_v25  ;;  %v2026_v59 = vpop.permute.xlu2 %2025  ;;  %v2427_v25 = vperm.slane %v4697_v30, 6 }
 0x420   : > { %v4785_v39 = vadd.f32 %v2026_v59, %v4658_v19 }
 0x421   : > { %v4787_v22 = vadd.f32 %v2462_v38, %v2181_v58 }
 0x423   : > { %2367 = vperm.xlu0 %2993, %v2362_v54   ;;  %2996 = vset.pattern.permute.xlu1 %v3316_v3  ;;  %v4803_v54 = vld [vmem:[%s5202_s7] sm:$0xff] }
 0x424   : > { %v2521_v58 = vrot.slane %v4803_v54, 1 }
 0x425   : > { %2295 = vperm.xlu2 %2986, %v5536_v29   ;;  %v1846_v29 = vmul.f32 %v5438_v35, %v5446_v1 }
 0x426   : > { %v2322_v60 = vpop.permute.xlu1 %2321  ;;  %v2536_v26 = vperm.slane %v2521_v58, 0 }
 0x427   : > { %v2464_v9 = vmul.f32 %v5527_v48, %v2322_v60  ;;  %v2526_v60 = vrot.slane %v4803_v54, 6 }
 0x429   : > { %v4798_v19 = vadd.f32 %v2464_v9, %v2183_v28  ;;  %v2522_v28 = vrot.slane %v4803_v54, 2  ;;  %v2541_v58 = vperm.slane %v2526_v60, 0 }
 0x42b   : > { %2432 = vperm.xlu0 %2993, %v2427_v25   ;;  %2438 = vperm.xlu1 %2996, %v2427_v25  }
 0x42d   : > { %2988 = vset.pattern.permute.xlu2 %v5463_v11 }
 0x42f   : > { %v2046_v38 = vpop.permute.xlu2 %2045 }
 0x430   : > { %v4809_v59 = vadd.f32 %v2046_v38, %v4676_v63  ;;  %v1878_v63 = vadd.f32 %v1846_v29, %v4255_v51  ;;  %v2537_v38 = vperm.slane %v2522_v28, 0  ;;  %v5537_v51 = vperm.slane %v4020_v16, 6 }
 0x431   : > { %v2527_v28 = vrot.slane %v4803_v54, 7 }
 0x433   : > { %2999 = vset.pattern.permute.xlu0 %v5447_v17  ;;  %2451 = vperm.xlu1 %2996, %v5311_v10   ;;  %v2542_v10 = vperm.slane %v2527_v28, 0 }
 0x434   : > { %2556 = vperm.xlu0 %2999, %v2536_v26   ;;  %v4826_v26 = vld [vmem:[%s5202_s7 + $0x8] sm:$0xff] }
 0x435   : > { %2315 = vperm.xlu2 %2988, %v2310_v15   ;;  %v2528_v35 = vrot.slane %v4826_v26, 1  ;;  %v2524_v15 = vrot.slane %v4803_v54, 4  ;;  %v2531_v60 = vrot.slane %v4826_v26, 4 }
 0x437   : > { %v2059_v9 = vpop.permute.xlu2 %2058  ;;  %v2544_v29 = vperm.slane %v2528_v35, 0  ;;  %v1851_v35 = vmul.f32 %v5518_v61, %v5437_v12  ;;  %v2532_v12 = vrot.slane %v4826_v26, 5 }
 0x438   : > { %v4821_v25 = vadd.f32 %v2059_v9, %v1878_v63  ;;  %v2539_v63 = vperm.slane %v2524_v15, 0  ;;  %v2534_v15 = vrot.slane %v4826_v26, 7 }
 0x43b   : > { %3000 = vset.pattern.permute.xlu1 %v5447_v17 }
 0x43c   : > { %2576 = vperm.xlu0 %2999, %v2541_v58   ;;  %2560 = vperm.xlu1 %3000, %v2537_v38   ;;  %v2547_v38 = vperm.slane %v2531_v60, 0  ;;  %v2550_v60 = vperm.slane %v2534_v15, 0  ;;  %v5538_v15 = vld [vmem:[#allocation18_spill] sm:$0xff] }
 0x43d   : > { %2328 = vperm.xlu2 %2988, %v5537_v51   ;;  %v2529_v51 = vrot.slane %v4826_v26, 2 }
 0x43f   : > { %v2545_v28 = vperm.slane %v2529_v51, 0  ;;  %v2092_v51 = vadd.f32 %v5538_v15, %v4558_v20 }
 0x441   : > { %v2172_v20 = vadd.f32 %v2140_v6, %v2092_v51  ;;  %v2457_v6 = vmul.f32 %v5533_v47, %v4740_v42 }
 0x444   : > { %2588 = vperm.xlu0 %2999, %v2544_v29   ;;  %2568 = vperm.xlu1 %3000, %v2539_v63   ;;  %v4843_v29 = vpop.permute.xlu0 %2269  ;;  %v1883_v63 = vadd.f32 %v1851_v35, %v4298_v56  ;;  %v2548_v56 = vperm.slane %v2532_v12, 0 }
 0x445   : > { %2990 = vset.pattern.permute.xlu2 %v3316_v3 }
 0x447   : > { %v2078_v9 = vpop.permute.xlu2 %2077 }
 0x448   : > { %v4837_v58 = vadd.f32 %v2078_v9, %v4692_v34 }
 0x44c   : > { %2600 = vperm.xlu0 %2999, %v2547_v38   ;;  %2580 = vperm.xlu1 %3000, %v2542_v10   ;;  %v4850_v10 = vpop.f32.mrf.mxu1  ;;  %v4853_v61 = vpop.permute.xlu0 %2334 }
 0x44d   : > { %2347 = vperm.xlu2 %2990, %v2336_v52   ;;  %v2342_v38 = vpop.permute.xlu1 %2341  ;;  %v2135_v16 = vrot.slane %v4850_v10, 3  ;;  %v5314_v35 = vperm.slane %v4850_v10, 0 }
 0x44f   : > { %v2091_v34 = vpop.permute.xlu2 %2090  ;;  %v4858_v52 = vperm.slane %v2135_v16, 0 }
 0x450   : > { %v4848_v9 = vadd.f32 %v2091_v34, %v1883_v63 }
 0x454   : > { %2612 = vperm.xlu0 %2999, %v2550_v60   ;;  %2592 = vperm.xlu1 %3000, %v2545_v28   ;;  %v2195_v60 = vadd.f32 %v4858_v52, %v4614_v49  ;;  %v2127_v49 = vrot.slane %v4713_v2, 2 }
 0x455   : > { %2360 = vperm.xlu2 %2990, %v2349_v27   ;;  %v2188_v27 = vadd.f32 %v5314_v35, %v4744_v31 }
 0x45c   : > { %2604 = vperm.xlu1 %3000, %v2548_v56  }
 0x45d   : > { %v2355_v63 = vpop.permute.xlu1 %2354  ;;  %2992 = vset.pattern.permute.xlu2 %v5463_v11  ;;  %v2400_v34 = vpop.permute.xlu0 %2399 }
 0x45e   : > { %v2469_v28 = vmul.f32 %v5533_v47, %v2355_v63  ;;  %v2476_v12 = vmul.f32 %v5527_v48, %v2400_v34  ;;  %v4885_v63 = vperm.slane %v2127_v49, 0 }
 0x45f   : > { %v2251_v16 = vpop.permute.xlu2 %2250 }
 0x460   : > { %v4871_v56 = vadd.f32 %v2469_v28, %v2188_v27  ;;  %v4873_v18 = vadd.f32 %v2476_v12, %v2195_v60  ;;  %v2453_v15 = vmul.f32 %v5533_v47, %v2251_v16  ;;  %v2132_v16 = vrot.slane %v4713_v2, 7 }
 0x462   : > { %5539 = vst [vmem:[#allocation19_spill] sm:$0xff] %v4873_v18  ;;  %v4878_v43 = vadd.f32 %v2453_v15, %v2172_v20  ;;  %v5540_v20 = vperm.slane %v4697_v30, 4  ;;  %v4905_v49 = vperm.slane %v2132_v16, 0 }
 0x465   : > { %2380 = vperm.xlu2 %2992, %v2375_v45  }
 0x467   : > { %v2264_v60 = vpop.permute.xlu2 %2263 }
 0x46d   : > { %2393 = vperm.xlu2 %2992, %v2388_v33   ;;  %v1916_v31 = vpop.permute.xlu0 %1915  ;;  %v4897_v33 = vpop.permute.xlu1 %2373 }
 0x46e   : > { %v2096_v34 = vadd.f32 %v1916_v31, %v4587_v41  ;;  %v1834_v41 = vmul.f32 %v5471_v13, %v5446_v1 }
 0x470   : > { %v2176_v51 = vadd.f32 %v4885_v63, %v2096_v34  ;;  %v1866_v42 = vadd.f32 %v1834_v41, %v4417_v21  ;;  %v1842_v21 = vmul.f32 %v5502_v32, %v5446_v1  ;;  %v5541_v41 = vld [vmem:[#allocation58_spill] sm:$0xff] }
 0x472   : > { %v4891_v27 = vadd.f32 %v2457_v6, %v2176_v51  ;;  %v2179_v6 = vadd.f32 %v4749_v57, %v4371_v0 }
 0x475   : > { %2995 = vset.pattern.permute.xlu2 %v3316_v3  ;;  %v1955_v45 = vpop.permute.xlu0 %1954  ;;  %v4918_v16 = vpop.permute.xlu1 %2386 }
 0x476   : > { %v2102_v28 = vadd.f32 %v1955_v45, %v4389_v40  ;;  %v2467_v40 = vmul.f32 %v5533_v47, %v2342_v38  ;;  %v5542_v38 = vperm.slane %v4697_v30, 5 }
 0x477   : > { %v4895_v12 = vpop.permute.xlu2 %2282 }
 0x478   : > { %v2182_v32 = vadd.f32 %v4790_v36, %v2102_v28 }
 0x47d   : > { %2412 = vperm.xlu2 %2995, %v5540_v20   ;;  %v1981_v15 = vpop.permute.xlu0 %1980 }
 0x47e   : > { %v2106_v3 = vadd.f32 %v1981_v15, %v1866_v42  ;;  %v1874_v42 = vadd.f32 %v1842_v21, %v5541_v41  ;;  %v2535_v41 = vperm.slane %v4803_v54, 0 }
 0x47f   : > { %v2296_v31 = vpop.permute.xlu2 %2295 }
 0x480   : > { %v2186_v34 = vadd.f32 %v4905_v49, %v2106_v3  ;;  %v2460_v51 = vmul.f32 %v5527_v48, %v2296_v31 }
 0x482   : > { %v4912_v13 = vadd.f32 %v2460_v51, %v2179_v6  ;;  %v4916_v45 = vadd.f32 %v2467_v40, %v2186_v34  ;;  %v2138_v40 = vrot.slane %v4850_v10, 6  ;;  %v5543_v6 = vperm.slane %v4697_v30, 7 }
 0x484   : > { %v2154_v21 = vperm.slane %v2138_v40, 0 }
 0x485   : > { %2425 = vperm.xlu2 %2995, %v5542_v38   ;;  %v2033_v20 = vpop.permute.xlu0 %2032  ;;  %v4925_v0 = vpop.permute.xlu1 %2406 }
 0x486   : > { %v4923_v15 = vadd.f32 %v2033_v20, %v1874_v42  ;;  %v2200_v38 = vadd.f32 %v2154_v21, %v4695_v46  ;;  %v2201_v20 = vadd.f32 %v2154_v21, %v4837_v58  ;;  %v2456_v46 = vmul.f32 %v5527_v48, %v4843_v29  ;;  %v4968_v29 = vld [vmem:[%s362_s16 + $0x8] sm:$0xff] }
 0x487   : > { %v2455_v58 = vmul.f32 %v5533_v47, %v2264_v60  ;;  %v2131_v21 = vrot.slane %v4713_v2, 6 }
 0x48d   : > { %2997 = vset.pattern.permute.xlu2 %v5463_v11  ;;  %v4928_v57 = vpop.permute.xlu0 %2302  ;;  %v4935_v34 = vpop.permute.xlu1 %2419  ;;  %v2126_v11 = vrot.slane %v4713_v2, 1  ;;  %v2525_v2 = vrot.slane %v4803_v54, 5 }
 0x48f   : > { %v2316_v1 = vpop.permute.xlu2 %2315  ;;  %v2141_v36 = vperm.slane %v2126_v11, 0  ;;  %v5546_v11 = vld [vmem:[#allocation31_spill] sm:$0xff] }
 0x490   : > { %v2463_v3 = vmul.f32 %v5533_v47, %v2316_v1 }
 0x492   : > { %v4932_v31 = vadd.f32 %v2463_v3, %v2182_v32  ;;  %v2523_v32 = vrot.slane %v4803_v54, 3 }
 0x495   : > { %2445 = vperm.xlu2 %2997, %v5543_v6   ;;  %v4939_v51 = vpop.permute.xlu0 %2367 }
 0x497   : > { %v2329_v3 = vpop.permute.xlu2 %2328 }
 0x498   : > { %v2465_v54 = vmul.f32 %v5533_v47, %v2329_v3 }
 0x49d   : > { %v2439_v28 = vpop.permute.xlu1 %2438  ;;  %2998 = vset.pattern.permute.xlu2 %v5447_v17  ;;  %v2433_v42 = vpop.permute.xlu0 %2432  ;;  %v2175_v17 = vadd.f32 %v2141_v36, %v5546_v11  ;;  %v4966_v11 = vld [vmem:[%s362_s16] sm:$0xff] }
 0x49e   : > { %v2482_v30 = vmul.f32 %v5527_v48, %v2439_v28  ;;  %v2481_v1 = vmul.f32 %v5533_v47, %v2433_v42  ;;  %2552 = vperm.xlu2 %2998, %v2535_v41   ;;  %v2538_v28 = vperm.slane %v2523_v32, 0  ;;  %v5547_v41 = vld [vmem:[#allocation32_spill] sm:$0xff]  ;;  %v5548_v32 = vld [vmem:[#allocation34_spill] sm:$0xff] }
 0x49f   : > { %v2174_v42 = vadd.f32 %v2141_v36, %v5547_v41  ;;  %v2104_v36 = vadd.f32 %v5548_v32, %v4704_v44  ;;  %v5549_v41 = vld [vmem:[#allocation30_spill] sm:$0xff] }
 0x4a0   : > { %v4951_v40 = vadd.f32 %v2482_v30, %v2201_v20  ;;  %v4953_v6 = vadd.f32 %v2481_v1, %v2200_v38  ;;  %v2488_v20 = vadd.f32 %v2456_v46, %v2175_v17  ;;  %v2146_v1 = vperm.slane %v2131_v21, 0 }
 0x4a1   : > { %v2487_v38 = vadd.f32 %v2455_v58, %v2174_v42  ;;  %v2097_v35 = vadd.f32 %v5549_v41, %v4583_v62  ;;  %v2458_v42 = vmul.f32 %v5527_v48, %v4895_v12  ;;  %v2133_v62 = vrot.slane %v4850_v10, 1 }
 0x4a2   : > { %5544 = vst [vmem:[#allocation49_spill] sm:$0xff] %v4951_v40  ;;  %v2185_v21 = vadd.f32 %v2146_v1, %v4726_v14  ;;  %v2184_v41 = vadd.f32 %v2146_v1, %v2104_v36 }
 0x4a3   : > { %5545 = vst [vmem:[#allocation33_spill] sm:$0xff] %v4953_v6  ;;  %v2177_v14 = vadd.f32 %v4885_v63, %v2097_v35  ;;  %v2149_v3 = vperm.slane %v2133_v62, 0  ;;  %v5552_v63 = vperm.slane %v4850_v10, 0 }
 0x4a4   : > { %v2497_v12 = vadd.f32 %v2465_v54, %v2184_v41  ;;  %v2471_v54 = vmul.f32 %v5533_v47, %v4939_v51  ;;  %v2543_v51 = vperm.slane %v4826_v26, 0  ;;  %v2136_v41 = vrot.slane %v4850_v10, 4 }
 0x4a5   : > { %v4964_v30 = vpop.permute.xlu1 %2451  ;;  %v2490_v18 = vadd.f32 %v2458_v42, %v2177_v14 }
 0x4a6   : > { %2564 = vperm.xlu2 %2998, %v2538_v28   ;;  %v2557_v60 = vpop.permute.xlu0 %2556  ;;  %v2466_v28 = vmul.f32 %v5527_v48, %v4853_v61 }
 0x4a7   : > { %v2617_v17 = vadd.f32 %v2557_v60, %v2487_v38  ;;  %v2618_v46 = vadd.f32 %v2557_v60, %v2488_v20  ;;  %v4976_v58 = vpop.permute.xlu2 %2347  ;;  %v2540_v38 = vperm.slane %v2525_v2, 0  ;;  %v5550_v20 = vld [vmem:[#allocation95_spill] sm:$0xff]  ;;  %v5551_v2 = vld [vmem:[#allocation24_spill] sm:$0xff] }
 0x4a8   : > { %v2109_v60 = vadd.f32 %v5550_v20, %v4645_v37  ;;  %v2498_v6 = vadd.f32 %v2466_v28, %v2185_v21 }
 0x4a9   : > { %v2649_v44 = vmul.f32 %v2617_v17, %v4966_v11  ;;  %v2650_v32 = vmul.f32 %v2618_v46, %v4968_v29  ;;  %v2100_v17 = vadd.f32 %v5551_v2, %v4606_v53  ;;  %v2461_v53 = vmul.f32 %v5533_v47, %v4928_v57 }
 0x4aa   : > { %v2189_v1 = vadd.f32 %v5552_v63, %v2109_v60 }
 0x4ab   : > { %v2681_v40 = vmax.f32 %v2649_v44, 0.0  ;;  %v2682_v61 = vmax.f32 %v2650_v32, 0.0 }
 0x4ad   : > { %2713 = vst.msk [vmem:[%s4990_s21 + $0x10] sm:$0xff] %vm392_vm2, %v2681_v40  ;;  %v2472_v40 = vmul.f32 %v5527_v48, %v4897_v33  ;;  %v2190_v33 = vadd.f32 %v2149_v3, %v4539_v4 }
 0x4ae   : > { %2714 = vst.msk [vmem:[%s4990_s21 + $0x18] sm:$0xff] %vm392_vm2, %v2682_v61  ;;  %v2561_v37 = vpop.permute.xlu1 %2560  ;;  %2572 = vperm.xlu2 %2998, %v2540_v38   ;;  %v2577_v35 = vpop.permute.xlu0 %2576  ;;  %v2191_v38 = vadd.f32 %v2149_v3, %v4769_v8 }
 0x4af   : > { %v2619_v36 = vadd.f32 %v2561_v37, %v4891_v27  ;;  %v2620_v46 = vadd.f32 %v2561_v37, %v2490_v18  ;;  %v2627_v21 = vadd.f32 %v2577_v35, %v2497_v12  ;;  %v2628_v28 = vadd.f32 %v2577_v35, %v2498_v6  ;;  %v2361_v42 = vpop.permute.xlu2 %2360 }
 0x4b0   : > { %v2470_v44 = vmul.f32 %v5527_v48, %v2361_v42  ;;  %v2180_v6 = vadd.f32 %v4777_v24, %v2100_v17  ;;  %v2504_v12 = vadd.f32 %v2472_v40, %v2191_v38  ;;  %v2503_v37 = vadd.f32 %v2471_v54, %v2190_v33  ;;  %v5553_v40 = vld [vmem:[#allocation46_spill] sm:$0xff] }
 0x4b1   : > { %v2651_v32 = vmul.f32 %v2619_v36, %v4966_v11  ;;  %v2652_v62 = vmul.f32 %v2620_v46, %v4968_v29  ;;  %v2659_v18 = vmul.f32 %v2627_v21, %v4966_v11  ;;  %v2660_v27 = vmul.f32 %v2628_v28, %v4968_v29 }
 0x4b2   : > { %v5014_v57 = vadd.f32 %v2470_v44, %v2189_v1  ;;  %v2493_v2 = vadd.f32 %v2461_v53, %v2180_v6  ;;  %v2530_v17 = vrot.slane %v4826_v26, 3  ;;  %v5027_v1 = vperm.slane %v2136_v41, 0 }
 0x4b3   : > { %v2683_v20 = vmax.f32 %v2651_v32, 0.0  ;;  %v2684_v60 = vmax.f32 %v2652_v62, 0.0  ;;  %v2691_v14 = vmax.f32 %v2659_v18, 0.0  ;;  %v2692_v61 = vmax.f32 %v2660_v27, 0.0 }
 0x4b4   : > { %v2477_v36 = vmul.f32 %v5533_v47, %v4925_v0  ;;  %v2468_v46 = vmul.f32 %v5527_v48, %v4976_v58  ;;  %v2187_v53 = vadd.f32 %v4905_v49, %v5553_v40  ;;  %v2134_v0 = vrot.slane %v4850_v10, 2 }
 0x4b5   : > { %2715 = vst.msk [vmem:[%s4990_s21 + $0x20] sm:$0xff] %vm392_vm2, %v2683_v20  ;;  %v2546_v54 = vperm.slane %v2530_v17, 0  ;;  %v2196_v58 = vadd.f32 %v5027_v1, %v4809_v59  ;;  %v2139_v18 = vrot.slane %v4850_v10, 7  ;;  %v2533_v20 = vrot.slane %v4826_v26, 6 }
 0x4b6   : > { %2716 = vst.msk [vmem:[%s4990_s21 + $0x28] sm:$0xff] %vm392_vm2, %v2684_v60  ;;  %v2569_v4 = vpop.permute.xlu1 %2568  ;;  %2584 = vperm.xlu2 %2998, %v2543_v51   ;;  %v2589_v24 = vpop.permute.xlu0 %2588  ;;  %v2500_v6 = vadd.f32 %v2468_v46, %v2187_v53  ;;  %v2150_v51 = vperm.slane %v2134_v0, 0  ;;  %v2479_v0 = vmul.f32 %v5533_v47, %v4935_v34 }
 0x4b7   : > { %2723 = vst.msk [vmem:[%s4990_s21 + $0x60] sm:$0xff] %vm392_vm2, %v2691_v14  ;;  %v2623_v8 = vadd.f32 %v2569_v4, %v2493_v2  ;;  %v2624_v3 = vadd.f32 %v2569_v4, %v4787_v22  ;;  %v2633_v35 = vadd.f32 %v2589_v24, %v2503_v37  ;;  %v2634_v63 = vadd.f32 %v2589_v24, %v2504_v12 }
 0x4b8   : > { %2724 = vst.msk [vmem:[%s4990_s21 + $0x68] sm:$0xff] %vm392_vm2, %v2692_v61  ;;  %v2509_v33 = vadd.f32 %v2477_v36, %v2196_v58  ;;  %v5053_v61 = vperm.slane %v2139_v18, 0  ;;  %v2474_v12 = vmul.f32 %v5527_v48, %v4918_v16  ;;  %v2484_v2 = vmul.f32 %v5527_v48, %v4964_v30 }
 0x4b9   : > { %v2655_v21 = vmul.f32 %v2623_v8, %v4966_v11  ;;  %v2656_v28 = vmul.f32 %v2624_v3, %v4968_v29  ;;  %v2665_v22 = vmul.f32 %v2633_v35, %v4966_v11  ;;  %v2666_v42 = vmul.f32 %v2634_v63, %v4968_v29 }
 0x4ba   : > { %v2193_v24 = vadd.f32 %v2150_v51, %v4785_v39  ;;  %v2192_v16 = vadd.f32 %v2150_v51, %v4663_v23  ;;  %v2549_v17 = vperm.slane %v2533_v20, 0  ;;  %v2203_v30 = vadd.f32 %v5053_v61, %v4848_v9 }
 0x4bb   : > { %v2687_v44 = vmax.f32 %v2655_v21, 0.0  ;;  %v2688_v32 = vmax.f32 %v2656_v28, 0.0  ;;  %v2697_v62 = vmax.f32 %v2665_v22, 0.0  ;;  %v2698_v27 = vmax.f32 %v2666_v42, 0.0 }
 0x4bc   : > { %v2137_v63 = vrot.slane %v4850_v10, 5  ;;  %v2506_v36 = vadd.f32 %v2474_v12, %v2193_v24  ;;  %v2516_v21 = vadd.f32 %v2484_v2, %v2203_v30  ;;  %v2194_v10 = vadd.f32 %v4858_v52, %v4923_v15  ;;  %v5554_v12 = vld [vmem:[#allocation15_spill] sm:$0xff] }
 0x4bd   : > { %2719 = vst.msk [vmem:[%s4990_s21 + $0x40] sm:$0xff] %vm392_vm2, %v2687_v44 }
 0x4be   : > { %2720 = vst.msk [vmem:[%s4990_s21 + $0x48] sm:$0xff] %vm392_vm2, %v2688_v32  ;;  %v2581_v49 = vpop.permute.xlu1 %2580  ;;  %2596 = vperm.xlu2 %2998, %v2546_v54   ;;  %v2601_v38 = vpop.permute.xlu0 %2600  ;;  %v2153_v40 = vperm.slane %v2137_v63, 0 }
 0x4bf   : > { %2729 = vst.msk [vmem:[%s4990_s21 + $0x90] sm:$0xff] %vm392_vm2, %v2697_v62  ;;  %v2629_v59 = vadd.f32 %v2581_v49, %v4916_v45  ;;  %v2630_v60 = vadd.f32 %v2581_v49, %v2500_v6  ;;  %v2639_v14 = vadd.f32 %v2601_v38, %v2509_v33  ;;  %v2381_v41 = vpop.permute.xlu2 %2380  ;;  %v2197_v49 = vadd.f32 %v5027_v1, %v4682_v50 }
 0x4c0   : > { %2730 = vst.msk [vmem:[%s4990_s21 + $0x98] sm:$0xff] %vm392_vm2, %v2698_v27  ;;  %v2473_v4 = vmul.f32 %v5533_v47, %v2381_v41  ;;  %v2198_v62 = vadd.f32 %v2153_v40, %v4821_v25  ;;  %v2199_v2 = vadd.f32 %v2153_v40, %v5554_v12 }
 0x4c1   : > { %v2661_v26 = vmul.f32 %v2629_v59, %v4966_v11  ;;  %v2662_v37 = vmul.f32 %v2630_v60, %v4968_v29  ;;  %v2671_v45 = vmul.f32 %v2639_v14, %v4966_v11 }
 0x4c2   : > { %v2505_v46 = vadd.f32 %v2473_v4, %v2192_v16  ;;  %v2511_v52 = vadd.f32 %v2479_v0, %v2198_v62 }
 0x4c3   : > { %v2693_v8 = vmax.f32 %v2661_v26, 0.0  ;;  %v2694_v3 = vmax.f32 %v2662_v37, 0.0  ;;  %v2703_v35 = vmax.f32 %v2671_v45, 0.0 }
 0x4c5   : > { %2725 = vst.msk [vmem:[%s4990_s21 + $0x70] sm:$0xff] %vm392_vm2, %v2693_v8 }
 0x4c6   : > { %2726 = vst.msk [vmem:[%s4990_s21 + $0x78] sm:$0xff] %vm392_vm2, %v2694_v3  ;;  %v2593_v39 = vpop.permute.xlu1 %2592  ;;  %2608 = vperm.xlu2 %2998, %v2549_v17   ;;  %v2613_v28 = vpop.permute.xlu0 %2612 }
 0x4c7   : > { %2735 = vst.msk [vmem:[%s4990_s21 + $0xc0] sm:$0xff] %vm392_vm2, %v2703_v35  ;;  %v2635_v23 = vadd.f32 %v2593_v39, %v2505_v46  ;;  %v2636_v9 = vadd.f32 %v2593_v39, %v2506_v36  ;;  %v2646_v22 = vadd.f32 %v2613_v28, %v2516_v21  ;;  %v2394_v42 = vpop.permute.xlu2 %2393 }
 0x4c8   : > { %v2475_v53 = vmul.f32 %v5533_v47, %v2394_v42 }
 0x4c9   : > { %v2667_v54 = vmul.f32 %v2635_v23, %v4966_v11  ;;  %v2668_v58 = vmul.f32 %v2636_v9, %v4968_v29  ;;  %v2678_v44 = vmul.f32 %v2646_v22, %v4968_v29 }
 0x4ca   : > { %v5084_v32 = vadd.f32 %v2475_v53, %v2194_v10 }
 0x4cb   : > { %v2699_v18 = vmax.f32 %v2667_v54, 0.0  ;;  %v2700_v27 = vmax.f32 %v2668_v58, 0.0  ;;  %v2710_v33 = vmax.f32 %v2678_v44, 0.0 }
 0x4cd   : > { %2731 = vst.msk [vmem:[%s4990_s21 + $0xa0] sm:$0xff] %vm392_vm2, %v2699_v18 }
 0x4ce   : > { %2732 = vst.msk [vmem:[%s4990_s21 + $0xa8] sm:$0xff] %vm392_vm2, %v2700_v27  ;;  %v2605_v15 = vpop.permute.xlu1 %2604  ;;  %v5555_v27 = vld [vmem:[#allocation19_spill] sm:$0xff] }
 0x4cf   : > { %2742 = vst.msk [vmem:[%s4990_s21 + $0xf8] sm:$0xff] %vm392_vm2, %v2710_v33  ;;  %v2641_v34 = vadd.f32 %v2605_v15, %v2511_v52 }
 0x4d1   : > { %v2673_v6 = vmul.f32 %v2641_v34, %v4966_v11  ;;  %v5556_v34 = vld [vmem:[#allocation33_spill] sm:$0xff] }
 0x4d3   : > { %v2705_v51 = vmax.f32 %v2673_v6, 0.0 }
 0x4d5   : > { %2737 = vst.msk [vmem:[%s4990_s21 + $0xd0] sm:$0xff] %vm392_vm2, %v2705_v51  ;;  %v5557_v51 = vld [vmem:[#allocation49_spill] sm:$0xff] }
 0x4d7   : > { %v2413_v25 = vpop.permute.xlu2 %2412 }
 0x4d8   : > { %v2478_v20 = vmul.f32 %v5527_v48, %v2413_v25 }
 0x4da   : > { %v2510_v59 = vadd.f32 %v2478_v20, %v2197_v49 }
 0x4dc   : > { %v2640_v60 = vadd.f32 %v2601_v38, %v2510_v59  ;;  %v2202_v38 = vadd.f32 %v5053_v61, %v4680_v55 }
 0x4de   : > { %v2672_v14 = vmul.f32 %v2640_v60, %v4968_v29 }
 0x4df   : > { %v2426_v41 = vpop.permute.xlu2 %2425 }
 0x4e0   : > { %v2704_v26 = vmax.f32 %v2672_v14, 0.0  ;;  %v2480_v37 = vmul.f32 %v5527_v48, %v2426_v41 }
 0x4e2   : > { %2736 = vst.msk [vmem:[%s4990_s21 + $0xc8] sm:$0xff] %vm392_vm2, %v2704_v26  ;;  %v2512_v45 = vadd.f32 %v2480_v37, %v2199_v2 }
 0x4e4   : > { %v2642_v4 = vadd.f32 %v2605_v15, %v2512_v45 }
 0x4e6   : > { %v2674_v24 = vmul.f32 %v2642_v4, %v4968_v29 }
 0x4e8   : > { %v2706_v50 = vmax.f32 %v2674_v24, 0.0 }
 0x4ea   : > { %2738 = vst.msk [vmem:[%s4990_s21 + $0xd8] sm:$0xff] %vm392_vm2, %v2706_v50 }
 0x4ef   : > { %v2446_v1 = vpop.permute.xlu2 %2445 }
 0x4f0   : > { %v2483_v16 = vmul.f32 %v5533_v47, %v2446_v1 }
 0x4f2   : > { %v2515_v17 = vadd.f32 %v2483_v16, %v2202_v38 }
 0x4f4   : > { %v2645_v48 = vadd.f32 %v2613_v28, %v2515_v17 }
 0x4f6   : > { %v2677_v30 = vmul.f32 %v2645_v48, %v4966_v11 }
 0x4f8   : > { %v2709_v8 = vmax.f32 %v2677_v30, 0.0  ;;  %v2553_v3 = vpop.permute.xlu2 %2552 }
 0x4f9   : > { %v2615_v35 = vadd.f32 %v2553_v3, %v4878_v43  ;;  %v2616_v63 = vadd.f32 %v2553_v3, %v4728_v5 }
 0x4fa   : > { %2741 = vst.msk [vmem:[%s4990_s21 + $0xf0] sm:$0xff] %vm392_vm2, %v2709_v8 }
 0x4fb   : > { %v2647_v36 = vmul.f32 %v2615_v35, %v4966_v11  ;;  %v2648_v55 = vmul.f32 %v2616_v63, %v4968_v29 }
 0x4fd   : > { %v2679_v61 = vmax.f32 %v2647_v36, 0.0  ;;  %v2680_v47 = vmax.f32 %v2648_v55, 0.0 }
 0x4ff   : > { %2711 = vst.msk [vmem:[%s4990_s21] sm:$0xff] %vm392_vm2, %v2679_v61 }
 0x500   : > { %2712 = vst.msk [vmem:[%s4990_s21 + $0x8] sm:$0xff] %vm392_vm2, %v2680_v47  ;;  %v2565_v46 = vpop.permute.xlu2 %2564 }
 0x501   : > { %v2621_v43 = vadd.f32 %v2565_v46, %v4757_v7  ;;  %v2622_v5 = vadd.f32 %v2565_v46, %v4912_v13 }
 0x503   : > { %v2653_v21 = vmul.f32 %v2621_v43, %v4966_v11  ;;  %v2654_v39 = vmul.f32 %v2622_v5, %v4968_v29 }
 0x505   : > { %v2685_v28 = vmax.f32 %v2653_v21, 0.0  ;;  %v2686_v23 = vmax.f32 %v2654_v39, 0.0 }
 0x507   : > { %2717 = vst.msk [vmem:[%s4990_s21 + $0x30] sm:$0xff] %vm392_vm2, %v2685_v28 }
 0x508   : > { %2718 = vst.msk [vmem:[%s4990_s21 + $0x38] sm:$0xff] %vm392_vm2, %v2686_v23  ;;  %v2573_v9 = vpop.permute.xlu2 %2572 }
 0x509   : > { %v2625_v22 = vadd.f32 %v2573_v9, %v4932_v31  ;;  %v2626_v7 = vadd.f32 %v2573_v9, %v4798_v19 }
 0x50b   : > { %v2657_v42 = vmul.f32 %v2625_v22, %v4966_v11  ;;  %v2658_v13 = vmul.f32 %v2626_v7, %v4968_v29 }
 0x50d   : > { %v2689_v40 = vmax.f32 %v2657_v42, 0.0  ;;  %v2690_v10 = vmax.f32 %v2658_v13, 0.0 }
 0x50f   : > { %2721 = vst.msk [vmem:[%s4990_s21 + $0x50] sm:$0xff] %vm392_vm2, %v2689_v40 }
 0x510   : > { %2722 = vst.msk [vmem:[%s4990_s21 + $0x58] sm:$0xff] %vm392_vm2, %v2690_v10  ;;  %v2585_v53 = vpop.permute.xlu2 %2584 }
 0x511   : > { %v2631_v0 = vadd.f32 %v2585_v53, %v4871_v56  ;;  %v2632_v31 = vadd.f32 %v2585_v53, %v5014_v57 }
 0x513   : > { %v2663_v54 = vmul.f32 %v2631_v0, %v4966_v11  ;;  %v2664_v19 = vmul.f32 %v2632_v31, %v4968_v29 }
 0x515   : > { %v2695_v58 = vmax.f32 %v2663_v54, 0.0  ;;  %v2696_v44 = vmax.f32 %v2664_v19, 0.0 }
 0x517   : > { %2727 = vst.msk [vmem:[%s4990_s21 + $0x80] sm:$0xff] %vm392_vm2, %v2695_v58 }
 0x518   : > { %2728 = vst.msk [vmem:[%s4990_s21 + $0x88] sm:$0xff] %vm392_vm2, %v2696_v44  ;;  %v2597_v62 = vpop.permute.xlu2 %2596 }
 0x519   : > { %v2637_v18 = vadd.f32 %v2597_v62, %v5084_v32  ;;  %v2638_v56 = vadd.f32 %v2597_v62, %v5555_v27 }
 0x51b   : > { %v2669_v33 = vmul.f32 %v2637_v18, %v4966_v11  ;;  %v2670_v57 = vmul.f32 %v2638_v56, %v4968_v29 }
 0x51d   : > { %v2701_v52 = vmax.f32 %v2669_v33, 0.0  ;;  %v2702_v15 = vmax.f32 %v2670_v57, 0.0 }
 0x51f   : > { %2733 = vst.msk [vmem:[%s4990_s21 + $0xb0] sm:$0xff] %vm392_vm2, %v2701_v52 }
 0x520   : > { %2734 = vst.msk [vmem:[%s4990_s21 + $0xb8] sm:$0xff] %vm392_vm2, %v2702_v15  ;;  %v2609_v32 = vpop.permute.xlu2 %2608 }
 0x521   : > { %v2643_v6 = vadd.f32 %v2609_v32, %v5556_v34  ;;  %v2644_v25 = vadd.f32 %v2609_v32, %v5557_v51 }
 0x523   : > { %v2675_v49 = vmul.f32 %v2643_v6, %v4966_v11  ;;  %v2676_v20 = vmul.f32 %v2644_v25, %v4968_v29 }
 0x525   : > { %v2707_v59 = vmax.f32 %v2675_v49, 0.0  ;;  %v2708_v60 = vmax.f32 %v2676_v20, 0.0 }
 0x527   : > { %2739 = vst.msk [vmem:[%s4990_s21 + $0xe0] sm:$0xff] %vm392_vm2, %v2707_v59 }
 0x528   : > { %2740 = vst.msk [vmem:[%s4990_s21 + $0xe8] sm:$0xff] %vm392_vm2, %v2708_v60 }
 0x529   : > { %3096 = shalt.err (!%p3093_p12)
}
 0x52a   : > { %s3149_s10 = smov 128   ;;  %s3150_s21 = smov 8  }
 0x52b   : > { %2895 = dma.vmem_to_hbm [thread:$0]  (%p3265_p3), %s2757_s9, 4096, %s2759_s17, %s2744_s15, %s3149_s10, %s3149_s10, %s3150_s21  }
 0x52c PF: > { %s2773_s18 = sand.u32 1, %s3127_s27   ;;  %p5558_p13 = scmp.ge.s32.totalorder %s3139_s30, 2 }
 0x52d   : > { %s2774_s14 = scalar_lea.sflag [#allocation4], %s2773_s18 }
 0x52e   : > { %p2906_p0 = pnand %p5558_p13, %p3231_p6 }
 0x530   : > { %p2907_p5 = pneg %p2906_p0 }
 0x532   : > { %3122 = dma.done.wait (%p2907_p5), %s2774_s14, 4096  }
 0x533   : > { %3124 = vsyncadd (%p2907_p5), %s2774_s14, 4294963200  ;;  %s5559_s23 = sld [smem:[#allocation11_spill]]  ;;  %p22_p7 = scmp.ge.s32.totalorder %s3249_s19, 4  }
 0x534   : > { %s5560_s27 = smov %s3131_s28  ;;  %s5561_s28 = smov %s3135_s29 }
 0x535   : > { %s5563_s30 = smov %s3249_s19  ;;  %24 = sbr.rel (!%p22_p7) target bundleno = 8 (0x8), region = 104 }
 0x539   : > { %s5562_s29 = smov %s5559_s23 }
 0x53a   :  { %2780 = vsyncpa [#allocation3], 1 }
 0x53b   :  { %2782 = vsyncpa [#allocation3 + $0x1], 1 }
 0x53c   :  { %2783 = vsyncpa [#allocation6], 1 }
 0x53d   :  { %2784 = vsyncpa [#allocation4], 1 }
 0x53e   :  { %2786 = vsyncpa [#allocation4 + $0x1], 1 }

</bundles_post_ra>
